<compile_context>
chip_gen: v6e
topology: v6e:2x2x1
jax: 0.10.0
libtpu: 0.0.40
codegen_flags: <defaults>
</compile_context>

<pallas_src>
import math
import functools

import numpy as np
import jax
import jax.numpy as jnp
from jax import lax
from jax.experimental import pallas as pl
from jax.experimental.pallas import tpu as pltpu

_NEG_INF = -1e30
_VMEM_LIMIT = 32 * 1024 * 1024


# ----------------------------------------------------------------------------
# helpers
# ----------------------------------------------------------------------------

def _round_up(x, m):
    return (x + m - 1) // m * m


def _tile_dim(dim, align, candidates):
    """Pad `dim` up to `align`, pick the largest candidate tile dividing it."""
    p = _round_up(dim, align)
    tile = next((c for c in candidates if c <= p and p % c == 0), p)
    return p, tile


def _rope_tables(seq_len, head_size, freq_base):
    inv = freq_base ** (-jnp.arange(0, head_size, 2, dtype=jnp.float32) / head_size)
    pos = jnp.arange(seq_len, dtype=jnp.float32)
    freqs = jnp.outer(pos, inv)                      # (S, D/2)
    emb = jnp.concatenate([freqs, freqs], axis=-1)   # (S, D)
    return jnp.cos(emb), jnp.sin(emb)


def _additive_mask(attention_mask, B, S):
    """Convert a user mask (bool 'attend' or float additive) to (B, S, S) f32."""
    if attention_mask is None:
        return None
    am = jnp.asarray(attention_mask)
    if am.dtype == jnp.bool_:
        am = jnp.where(am, 0.0, _NEG_INF).astype(jnp.float32)
    else:
        am = am.astype(jnp.float32)
    if am.ndim == 2:
        am = am[None]
    if am.ndim == 4:
        # TODO(synk): per-head masks are collapsed to head 0 (shared across heads).
        am = am[:, 0]
    return jnp.broadcast_to(am, (B, S, S))


# ----------------------------------------------------------------------------
# fused RMSNorm + matmul kernel (normalized tile cached in VMEM across N tiles)
# ----------------------------------------------------------------------------

def _rms_matmul_kernel(x_ref, g_ref, w_ref, o_ref, xn_ref, *, eps, n_true):
    @pl.when(pl.program_id(1) == 0)
    def _():
        x = x_ref[...].astype(jnp.float32)
        # padded hidden columns are exactly zero -> sum/n_true == mean over true hidden
        ss = jnp.sum(x * x, axis=-1, keepdims=True)
        inv = lax.rsqrt(ss * (1.0 / n_true) + eps)
        xn_ref[...] = (x * inv * g_ref[...].astype(jnp.float32)).astype(xn_ref.dtype)

    o_ref[...] = jnp.dot(xn_ref[...], w_ref[...],
                         preferred_element_type=jnp.float32).astype(o_ref.dtype)


def pallas_rms_matmul(x2d, gamma, w, *, eps, n_true,
                      compute_dtype=jnp.bfloat16, out_dtype=jnp.float32):
    """x2d: (M, K) residual stream, gamma: (1, K), w: (K, N) bf16 pre-transposed."""
    M, K = x2d.shape
    Kw, N = w.shape
    assert K == Kw
    Mp, tm = _tile_dim(M, 8, (256, 128, 64, 32, 16, 8))
    Np, tn = _tile_dim(N, 128, (512, 256, 128))

    xin = jnp.pad(x2d, ((0, Mp - M), (0, 0))) if Mp != M else x2d
    wc = w.astype(compute_dtype)
    if Np != N:
        wc = jnp.pad(wc, ((0, 0), (0, Np - N)))

    out = pl.pallas_call(
        functools.partial(_rms_matmul_kernel, eps=eps, n_true=n_true),
        out_shape=jax.ShapeDtypeStruct((Mp, Np), out_dtype),
        grid=(Mp // tm, Np // tn),
        in_specs=[
            pl.BlockSpec((tm, K), lambda i, j: (i, 0)),   # x row-tile (full K)
            pl.BlockSpec((1, K), lambda i, j: (0, 0)),    # rmsnorm gamma
            pl.BlockSpec((K, tn), lambda i, j: (0, j)),   # weight column tile
        ],
        out_specs=pl.BlockSpec((tm, tn), lambda i, j: (i, j)),
        scratch_shapes=[pltpu.VMEM((tm, K), compute_dtype)],
        compiler_params=pltpu.CompilerParams(
            dimension_semantics=("parallel", "arbitrary"),
            vmem_limit_bytes=_VMEM_LIMIT),
    )(xin, gamma, wc)
    if (Mp, Np) != (M, N):
        out = out[:M, :N]
    return out


# ----------------------------------------------------------------------------
# tiled matmul + residual-add kernel (bf16 MXU, f32 accumulator)
# ----------------------------------------------------------------------------

def _matmul_residual_kernel(x_ref, w_ref, r_ref, o_ref, acc_ref, *, compute_dtype):
    @pl.when(pl.program_id(2) == 0)
    def _():
        acc_ref[...] = jnp.zeros_like(acc_ref)

    acc_ref[...] += jnp.dot(x_ref[...].astype(compute_dtype), w_ref[...],
                            preferred_element_type=jnp.float32)

    @pl.when(pl.program_id(2) == pl.num_programs(2) - 1)
    def _():
        o_ref[...] = (acc_ref[...] + r_ref[...].astype(jnp.float32)).astype(o_ref.dtype)


def pallas_matmul_residual(x, w, res, *, compute_dtype=jnp.bfloat16,
                           out_dtype=jnp.float32):
    """x: (M, K), w: (K, N) bf16, res: (M, N) f32. Returns x@w + res."""
    M, K = x.shape
    Kw, N = w.shape
    assert K == Kw and res.shape == (M, N)
    Mp, tm = _tile_dim(M, 8, (256, 128, 64, 32, 16, 8))
    Np, tn = _tile_dim(N, 128, (256, 128))
    Kp, tk = _tile_dim(K, 128, (512, 256, 128))

    xc = x if (Mp, Kp) == (M, K) else jnp.pad(x, ((0, Mp - M), (0, Kp - K)))
    wc = w.astype(compute_dtype)
    if (Kp, Np) != (K, N):
        wc = jnp.pad(wc, ((0, Kp - K), (0, Np - N)))
    rc = res if (Mp, Np) == (M, N) else jnp.pad(res, ((0, Mp - M), (0, Np - N)))

    out = pl.pallas_call(
        functools.partial(_matmul_residual_kernel, compute_dtype=compute_dtype),
        out_shape=jax.ShapeDtypeStruct((Mp, Np), out_dtype),
        grid=(Mp // tm, Np // tn, Kp // tk),
        in_specs=[
            pl.BlockSpec((tm, tk), lambda i, j, k: (i, k)),
            pl.BlockSpec((tk, tn), lambda i, j, k: (k, j)),
            pl.BlockSpec((tm, tn), lambda i, j, k: (i, j)),
        ],
        out_specs=pl.BlockSpec((tm, tn), lambda i, j, k: (i, j)),
        scratch_shapes=[pltpu.VMEM((tm, tn), jnp.float32)],
        compiler_params=pltpu.CompilerParams(
            dimension_semantics=("parallel", "parallel", "arbitrary"),
            vmem_limit_bytes=_VMEM_LIMIT),
    )(xc, wc, rc)
    if (Mp, Np) != (M, N):
        out = out[:M, :N]
    return out


# ----------------------------------------------------------------------------
# fused SiLU(gate)*up + down-projection + residual kernel
# ----------------------------------------------------------------------------

def _swiglu_down_residual_kernel(g_ref, u_ref, w_ref, r_ref, o_ref, acc_ref,
                                 *, compute_dtype):
    @pl.when(pl.program_id(2) == 0)
    def _():
        acc_ref[...] = jnp.zeros_like(acc_ref)

    g = g_ref[...].astype(jnp.float32)
    u = u_ref[...].astype(jnp.float32)
    act = g * (1.0 / (1.0 + jnp.exp(-g))) * u          # SiLU(gate)*up in f32 (EUP exp)
    acc_ref[...] += jnp.dot(act.astype(compute_dtype), w_ref[...],
                            preferred_element_type=jnp.float32)

    @pl.when(pl.program_id(2) == pl.num_programs(2) - 1)
    def _():
        o_ref[...] = (acc_ref[...] + r_ref[...].astype(jnp.float32)).astype(o_ref.dtype)


def pallas_swiglu_down_residual(gate_up, w_down, res, *, ffn_pad,
                                compute_dtype=jnp.bfloat16):
    """gate_up: (M, 2*Fp) [gate|up] halves, w_down: (Fp, N), res: (M, N)."""
    M, two_fp = gate_up.shape
    Fp = ffn_pad
    assert two_fp == 2 * Fp
    K, N = w_down.shape
    assert K == Fp and res.shape == (M, N)
    Mp, tm = _tile_dim(M, 8, (256, 128, 64, 32, 16, 8))
    Np, tn = _tile_dim(N, 128, (256, 128))
    tk = next((c for c in (512, 256, 128) if Fp % c == 0), Fp)
    koff = Fp // tk

    gu = jnp.pad(gate_up, ((0, Mp - M), (0, 0))) if Mp != M else gate_up
    rc = res if (Mp, Np) == (M, N) else jnp.pad(res, ((0, Mp - M), (0, Np - N)))
    wd = w_down.astype(compute_dtype)
    if Np != N:
        wd = jnp.pad(wd, ((0, 0), (0, Np - N)))

    out = pl.pallas_call(
        functools.partial(_swiglu_down_residual_kernel, compute_dtype=compute_dtype),
        out_shape=jax.ShapeDtypeStruct((Mp, Np), jnp.float32),
        grid=(Mp // tm, Np // tn, Fp // tk),
        in_specs=[
            pl.BlockSpec((tm, tk), lambda i, j, k: (i, k)),           # gate cols
            pl.BlockSpec((tm, tk), lambda i, j, k: (i, k + koff)),    # up cols
            pl.BlockSpec((tk, tn), lambda i, j, k: (k, j)),
            pl.BlockSpec((tm, tn), lambda i, j, k: (i, j)),           # residual
        ],
        out_specs=pl.BlockSpec((tm, tn), lambda i, j, k: (i, j)),
        scratch_shapes=[pltpu.VMEM((tm, tn), jnp.float32)],
        compiler_params=pltpu.CompilerParams(
            dimension_semantics=("parallel", "parallel", "arbitrary"),
            vmem_limit_bytes=_VMEM_LIMIT),
    )(gu, gu, wd, rc)
    if (Mp, Np) != (M, N):
        out = out[:M, :N]
    return out


# ----------------------------------------------------------------------------
# flash attention kernel (online softmax, fused heads, in-kernel RoPE & masks)
# ----------------------------------------------------------------------------

def _rotate_half(x, half):
    # concatenate variant lowers robustly for D < 128
    return jnp.concatenate([-x[:, half:], x[:, :half]], axis=-1)


def _flash_attn_kernel(*refs, num_heads, head_size, s_actual, causal, has_mask,
                       scale, compute_dtype):
    if has_mask:
        (q_ref, k_ref, v_ref, cosq_ref, sinq_ref, cosk_ref, sink_ref, mask_ref,
         o_ref, qr_ref, m_ref, l_ref, acc_ref) = refs
    else:
        (q_ref, k_ref, v_ref, cosq_ref, sinq_ref, cosk_ref, sink_ref,
         o_ref, qr_ref, m_ref, l_ref, acc_ref) = refs
        mask_ref = None

    H, D = num_heads, head_size
    half = D // 2
    qi = pl.program_id(1)
    kv = pl.program_id(2)
    tq = q_ref.shape[1]
    tkv = k_ref.shape[1]
    hdp = q_ref.shape[2]

    # ---- once per (b, q-tile): reset online-softmax state, RoPE+scale q ----
    @pl.when(kv == 0)
    def _init():
        m_ref[...] = jnp.full_like(m_ref, _NEG_INF)
        l_ref[...] = jnp.zeros_like(l_ref)
        acc_ref[...] = jnp.zeros_like(acc_ref)
        q = q_ref[0].astype(jnp.float32)                 # (tq, HDp)
        cq = cosq_ref[...]
        sq = sinq_ref[...]
        for h in range(H):
            qh = q[:, h * D:(h + 1) * D]
            qr_ref[h] = (qh * cq + _rotate_half(qh, half) * sq) * scale

    # ---- per kv-tile: RoPE(k), scores, online softmax, p@v for every head ----
    k = k_ref[0].astype(jnp.float32)                     # (tkv, HDp)
    v = v_ref[0]
    ck = cosk_ref[...]
    sk = sink_ref[...]

    row = qi * tq + lax.broadcasted_iota(jnp.int32, (tq, tkv), 0)
    col = kv * tkv + lax.broadcasted_iota(jnp.int32, (tq, tkv), 1)
    valid = col < s_actual                               # mask padded key positions
    if causal:
        valid = jnp.logical_and(valid, col <= row)

    for h in range(H):
        kh = k[:, h * D:(h + 1) * D]
        kh = kh * ck + _rotate_half(kh, half) * sk       # (tkv, D), f32
        qh = qr_ref[h]                                   # (tq, D), f32, pre-scaled
        s = lax.dot_general(
            qh.astype(compute_dtype), kh.astype(compute_dtype),
            (((1,), (1,)), ((), ())),
            preferred_element_type=jnp.float32)          # (tq, tkv)  -- no k.T needed
        s = jnp.where(valid, s, _NEG_INF)
        if has_mask:
            s = s + mask_ref[0]

        m_prev = m_ref[h]
        l_prev = l_ref[h]
        m_new = jnp.maximum(m_prev, jnp.max(s, axis=-1, keepdims=True))
        alpha = jnp.exp(m_prev - m_new)
        p = jnp.exp(s - m_new)
        l_ref[h] = alpha * l_prev + jnp.sum(p, axis=-1, keepdims=True)
        m_ref[h] = m_new
        pv = jnp.dot(p.astype(compute_dtype),
                     v[:, h * D:(h + 1) * D].astype(compute_dtype),
                     preferred_element_type=jnp.float32)  # (tq, D)
        acc_ref[h] = alpha * acc_ref[h] + pv

    # ---- finalize: normalize and write a single lane-dense (tq, HDp) block ----
    @pl.when(kv == pl.num_programs(2) - 1)
    def _fin():
        parts = []
        for h in range(H):
            inv = pl.reciprocal(jnp.maximum(l_ref[h], 1e-30), approx=True)
            parts.append(acc_ref[h] * inv)
        if hdp > H * D:
            parts.append(jnp.zeros((tq, hdp - H * D), jnp.float32))
        full = jnp.concatenate(parts, axis=-1) if len(parts) > 1 else parts[0]
        o_ref[0] = full.astype(o_ref.dtype)


def pallas_flash_attention(qkv, cos, sin, mask, *, num_heads, head_size,
                           s_actual, causal, compute_dtype=jnp.bfloat16):
    """qkv: (B, S_pad, 3*HDp) fused projection output (q|k|v segments of width HDp).
    Returns attention output (B, S_pad, HDp) bf16 in (batch, seq, heads*dim) layout."""
    B, S_pad, three_hdp = qkv.shape
    HDp = three_hdp // 3
    H, D = num_heads, head_size
    tq = next(c for c in (256, 128, 64, 32, 16, 8) if S_pad % c == 0)
    tkv = next((c for c in (256, 128) if S_pad % c == 0), S_pad)
    has_mask = mask is not None

    kernel = functools.partial(
        _flash_attn_kernel, num_heads=H, head_size=D, s_actual=s_actual,
        causal=causal, has_mask=has_mask, scale=1.0 / math.sqrt(D),
        compute_dtype=compute_dtype)

    in_specs = [
        pl.BlockSpec((1, tq, HDp), lambda b, qi, kv: (b, qi, 0)),    # q segment
        pl.BlockSpec((1, tkv, HDp), lambda b, qi, kv: (b, kv, 1)),   # k segment
        pl.BlockSpec((1, tkv, HDp), lambda b, qi, kv: (b, kv, 2)),   # v segment
        pl.BlockSpec((tq, D), lambda b, qi, kv: (qi, 0)),            # cos (q rows)
        pl.BlockSpec((tq, D), lambda b, qi, kv: (qi, 0)),            # sin (q rows)
        pl.BlockSpec((tkv, D), lambda b, qi, kv: (kv, 0)),           # cos (k rows)
        pl.BlockSpec((tkv, D), lambda b, qi, kv: (kv, 0)),           # sin (k rows)
    ]
    inputs = [qkv, qkv, qkv, cos, sin, cos, sin]
    if has_mask:
        in_specs.append(pl.BlockSpec((1, tq, tkv), lambda b, qi, kv: (b, qi, kv)))
        inputs.append(mask)

    return pl.pallas_call(
        kernel,
        out_shape=jax.ShapeDtypeStruct((B, S_pad, HDp), compute_dtype),
        grid=(B, S_pad // tq, S_pad // tkv),
        in_specs=in_specs,
        out_specs=pl.BlockSpec((1, tq, HDp), lambda b, qi, kv: (b, qi, 0)),
        scratch_shapes=[
            pltpu.VMEM((H, tq, D), jnp.float32),    # RoPE'd + scaled q
            pltpu.VMEM((H, tq, 1), jnp.float32),    # running max
            pltpu.VMEM((H, tq, 1), jnp.float32),    # running denominator
            pltpu.VMEM((H, tq, D), jnp.float32),    # output accumulator
        ],
        compiler_params=pltpu.CompilerParams(
            dimension_semantics=("parallel", "parallel", "arbitrary"),
            vmem_limit_bytes=_VMEM_LIMIT),
    )(*inputs)


# ----------------------------------------------------------------------------
# parameters (padded to lane-friendly sizes, weights pre-transposed & bf16)
# ----------------------------------------------------------------------------

def init_transformer_params(key, hidden, num_layers, num_heads, head_size,
                            freq_base=10000, eps=1e-8, compute_dtype=jnp.bfloat16):
    HD = num_heads * head_size
    F = hidden * 8 // 3
    hp = _round_up(hidden, 128)
    HDp = _round_up(HD, 128)
    Fp = _round_up(F, 128)

    def lin(k, fan_in, fan_out):  # nn.Linear default U(-1/sqrt(in), 1/sqrt(in))
        b = 1.0 / math.sqrt(fan_in)
        return jax.random.uniform(k, (fan_in, fan_out), jnp.float32,
                                  minval=-b, maxval=b)

    layers = []
    for li in range(num_layers):
        lk = jax.random.fold_in(key, li)
        ks = jax.random.split(lk, 7)
        wq, wk, wv = lin(ks[0], hidden, HD), lin(ks[1], hidden, HD), lin(ks[2], hidden, HD)
        wo = lin(ks[3], HD, hidden)
        wg, wu = lin(ks[4], hidden, F), lin(ks[5], hidden, F)
        wd = lin(ks[6], F, hidden)

        w_qkv = jnp.zeros((hp, 3 * HDp), jnp.float32)
        w_qkv = w_qkv.at[:hidden, 0:HD].set(wq)
        w_qkv = w_qkv.at[:hidden, HDp:HDp + HD].set(wk)
        w_qkv = w_qkv.at[:hidden, 2 * HDp:2 * HDp + HD].set(wv)
        w_o = jnp.zeros((HDp, hp), jnp.float32).at[:HD, :hidden].set(wo)
        w_gu = jnp.zeros((hp, 2 * Fp), jnp.float32)
        w_gu = w_gu.at[:hidden, 0:F].set(wg).at[:hidden, Fp:Fp + F].set(wu)
        w_dn = jnp.zeros((Fp, hp), jnp.float32).at[:F, :hidden].set(wd)
        ln1 = jnp.zeros((1, hp), jnp.float32).at[:, :hidden].set(1.0)
        ln2 = jnp.zeros((1, hp), jnp.float32).at[:, :hidden].set(1.0)

        layers.append({
            "w_qkv": w_qkv.astype(compute_dtype),
            "w_o": w_o.astype(compute_dtype),
            "w_gate_up": w_gu.astype(compute_dtype),
            "w_down": w_dn.astype(compute_dtype),
            "ln1_w": ln1,
            "ln2_w": ln2,
        })

    params = {"layers": layers}
    cfg = dict(hidden=hidden, num_heads=num_heads, head_size=head_size,
               ffn=F, hidden_pad=hp, hd_pad=HDp, ffn_pad=Fp,
               eps=eps, freq_base=freq_base, compute_dtype=compute_dtype)
    return params, cfg


# ----------------------------------------------------------------------------
# forward pass (5 fused Pallas kernels per layer; residual adds in-kernel)
# ----------------------------------------------------------------------------

def transformer_forward(params, cfg, input_embeds, attention_mask=None, is_causal=False):
    B, S, hidden = input_embeds.shape
    hp, HDp, Fp = cfg["hidden_pad"], cfg["hd_pad"], cfg["ffn_pad"]
    H, D = cfg["num_heads"], cfg["head_size"]
    cdt, eps = cfg["compute_dtype"], cfg["eps"]

    S_pad = _round_up(S, 8)
    x = jnp.pad(input_embeds.astype(jnp.float32),
                ((0, 0), (0, S_pad - S), (0, hp - hidden)))
    x2d = x.reshape(B * S_pad, hp)

    cos, sin = _rope_tables(S_pad, D, cfg["freq_base"])
    mask = _additive_mask(attention_mask, B, S)
    if mask is not None:
        mask = jnp.pad(mask, ((0, 0), (0, S_pad - S), (0, S_pad - S)))

    for lp in params["layers"]:
        # --- attention block ---
        qkv = pallas_rms_matmul(x2d, lp["ln1_w"], lp["w_qkv"],
                                eps=eps, n_true=hidden, compute_dtype=cdt)
        qkv = qkv.reshape(B, S_pad, 3 * HDp)
        attn = pallas_flash_attention(
            qkv, cos, sin, mask, num_heads=H, head_size=D,
            s_actual=S, causal=is_causal, compute_dtype=cdt)             # (B,S,HDp) bf16
        x2d = pallas_matmul_residual(attn.reshape(B * S_pad, HDp), lp["w_o"], x2d,
                                     compute_dtype=cdt)
        # --- MLP block ---
        gu = pallas_rms_matmul(x2d, lp["ln2_w"], lp["w_gate_up"],
                               eps=eps, n_true=hidden, compute_dtype=cdt)
        x2d = pallas_swiglu_down_residual(gu, lp["w_down"], x2d, ffn_pad=Fp,
                                          compute_dtype=cdt)

    return x2d.reshape(B, S_pad, hp)[:, :S, :hidden]


# ----------------------------------------------------------------------------
# pure-JAX reference (mirrors the kernels' bf16 matmul casts / masking)
# ----------------------------------------------------------------------------

def transformer_reference(params, cfg, input_embeds, attention_mask=None, is_causal=False):
    B, S, hidden = input_embeds.shape
    H, D = cfg["num_heads"], cfg["head_size"]
    HD, HDp, F, Fp = H * D, cfg["hd_pad"], cfg["ffn"], cfg["ffn_pad"]
    cdt, eps = cfg["compute_dtype"], cfg["eps"]
    scale = 1.0 / math.sqrt(D)

    def mm(a, w):
        return jnp.dot(a.astype(cdt), w.astype(cdt),
                       preferred_element_type=jnp.float32)

    cos, sin = _rope_tables(S, D, cfg["freq_base"])

    def rope(t):  # t: (B, H, S, D)
        half = D // 2
        tr = jnp.concatenate([-t[..., half:], t[..., :half]], axis=-1)
        return t * cos[None, None] + tr * sin[None, None]

    def rms(t, g):
        ms = jnp.mean(t.astype(jnp.float32) ** 2, axis=-1, keepdims=True)
        return t * lax.rsqrt(ms + eps) * g

    idx = jnp.arange(S)
    causal_ok = idx[None, :] <= idx[:, None]
    add_mask = _additive_mask(attention_mask, B, S)

    h_x = input_embeds.astype(jnp.float32)
    for lp in params["layers"]:
        wq = lp["w_qkv"][:hidden, 0:HD]
        wk = lp["w_qkv"][:hidden, HDp:HDp + HD]
        wv = lp["w_qkv"][:hidden, 2 * HDp:2 * HDp + HD]
        wo = lp["w_o"][:HD, :hidden]
        wg = lp["w_gate_up"][:hidden, 0:F]
        wu = lp["w_gate_up"][:hidden, Fp:Fp + F]
        wd = lp["w_down"][:F, :hidden]
        g1 = lp["ln1_w"][0, :hidden]
        g2 = lp["ln2_w"][0, :hidden]

        hn = rms(h_x, g1).reshape(B * S, hidden)
        q = mm(hn, wq).reshape(B, S, H, D).transpose(0, 2, 1, 3)
        k = mm(hn, wk).reshape(B, S, H, D).transpose(0, 2, 1, 3)
        v = mm(hn, wv).reshape(B, S, H, D).transpose(0, 2, 1, 3)
        q = rope(q) * scale
        k = rope(k)
        s = jnp.einsum("bhqd,bhkd->bhqk", q.astype(cdt), k.astype(cdt),
                       preferred_element_type=jnp.float32)
        if is_causal:
            s = jnp.where(causal_ok[None, None], s, _NEG_INF)
        if add_mask is not None:
            s = s + add_mask[:, None]
        p = jax.nn.softmax(s, axis=-1)
        o = jnp.einsum("bhqk,bhkd->bhqd", p.astype(cdt), v.astype(cdt),
                       preferred_element_type=jnp.float32)
        o = o.transpose(0, 2, 1, 3).reshape(B * S, HD)
        h_x = h_x + mm(o, wo).reshape(B, S, hidden)

        hn = rms(h_x, g2).reshape(B * S, hidden)
        g = mm(hn, wg)
        u = mm(hn, wu)
        act = g * (1.0 / (1.0 + jnp.exp(-g))) * u
        h_x = h_x + mm(act, wd).reshape(B, S, hidden)
    return h_x


# ----------------------------------------------------------------------------
# demo
# ----------------------------------------------------------------------------

if __name__ == "__main__":
    key = jax.random.PRNGKey(0)
    k_param, k_x = jax.random.split(key)

    batch, seq, hidden, num_heads, head_size, num_layers = 2, 8, 32, 4, 8, 2
    params, cfg = init_transformer_params(k_param, hidden, num_layers,
                                          num_heads, head_size)
    input_embeds = jax.random.normal(k_x, (batch, seq, hidden), jnp.float32)

    @functools.partial(jax.jit, static_argnames=("is_causal",))
    def run(p, x, mask, is_causal):
        return transformer_forward(p, cfg, x, mask, is_causal)

    # causal self-attention
    out = jax.block_until_ready(run(params, input_embeds, None, is_causal=True))
    ref = transformer_reference(params, cfg, input_embeds, is_causal=True)
    np.testing.assert_allclose(np.asarray(out), np.asarray(ref), rtol=3e-2, atol=3e-2)

    # non-causal with a key-padding mask (bool, True = attend)
    keep = jnp.array([[True] * seq, [True] * (seq - 2) + [False] * 2])
    attn_mask = jnp.broadcast_to(keep[:, None, :], (batch, seq, seq))
    out2 = jax.block_until_ready(run(params, input_embeds, attn_mask, is_causal=False))
    ref2 = transformer_reference(params, cfg, input_embeds,
                                 attention_mask=attn_mask, is_causal=False)
    np.testing.assert_allclose(np.asarray(out2), np.asarray(ref2), rtol=3e-2, atol=3e-2)

    print("KERNEL_OK")
</pallas_src>

<mosaic_0001>
module attributes {stable_mosaic.version = 11 : i64} {
  func.func @_matmul_residual_kernel(%arg0: i32, %arg1: i32, %arg2: i32, %arg3: memref<16x128xbf16, #tpu.memory_space<vmem>>, %arg4: memref<128x128xbf16, #tpu.memory_space<vmem>>, %arg5: memref<16x128xf32, #tpu.memory_space<vmem>>, %arg6: memref<16x128xf32, #tpu.memory_space<vmem>>, %arg7: memref<16x128xf32, #tpu.memory_space<vmem>>) attributes {dimension_semantics = [#tpu.dimension_semantics<parallel>, #tpu.dimension_semantics<parallel>, #tpu.dimension_semantics<arbitrary>], iteration_bounds = array<i64: 1, 1, 1>, scalar_prefetch = 0 : i64, scratch_operands = 1 : i64, tpu.core_type = #tpu.core_type<tc>, window_params = [{transform_indices = @transform_0, window_bounds = array<i64: 16, 128>}, {transform_indices = @transform_1, window_bounds = array<i64: 128, 128>}, {transform_indices = @transform_2, window_bounds = array<i64: 16, 128>}, {transform_indices = @transform_3, window_bounds = array<i64: 16, 128>}]} {
    %c0_i32 = arith.constant 0 : i32
    %0 = arith.cmpi eq, %arg2, %c0_i32 : i32
    %1 = arith.extui %0 : i1 to i32
    %c0_i32_0 = arith.constant 0 : i32
    %2 = arith.cmpi ne, %1, %c0_i32_0 : i32
    scf.if %2 {
      %cst_10 = arith.constant 0.000000e+00 : f32
      %12 = vector.broadcast %cst_10 : f32 to vector<16x128xf32>
      %c0_11 = arith.constant 0 : index
      %c0_12 = arith.constant 0 : index
      %13 = vector.load %arg7[%c0_11, %c0_12] : memref<16x128xf32, #tpu.memory_space<vmem>>, vector<16x128xf32>
      tpu.vector_store %arg7[%c0_11, %c0_12], %12 {strides = array<i32>} : memref<16x128xf32, #tpu.memory_space<vmem>>, vector<16x128xf32>,
    } else {
    }
    %c0 = arith.constant 0 : index
    %c0_1 = arith.constant 0 : index
    %3 = vector.load %arg7[%c0, %c0_1] : memref<16x128xf32, #tpu.memory_space<vmem>>, vector<16x128xf32>
    %c0_2 = arith.constant 0 : index
    %c0_3 = arith.constant 0 : index
    %4 = vector.load %arg3[%c0_2, %c0_3] : memref<16x128xbf16, #tpu.memory_space<vmem>>, vector<16x128xbf16>
    %c0_4 = arith.constant 0 : index
    %c0_5 = arith.constant 0 : index
    %5 = vector.load %arg4[%c0_4, %c0_5] : memref<128x128xbf16, #tpu.memory_space<vmem>>, vector<128x128xbf16>
    %cst = arith.constant dense<0.000000e+00> : vector<16x128xf32>
    %6 = tpu.matmul %4, %5, %cst {dimension_numbers = #tpu.dot_dimension_numbers<[1], [0], [0], [1], [0, 0, 1, 1], [], []>} : vector<16x128xbf16>, vector<128x128xbf16>, vector<16x128xf32> -> vector<16x128xf32>
    %7 = arith.addf %3, %6 : vector<16x128xf32>
    %c0_6 = arith.constant 0 : index
    %c0_7 = arith.constant 0 : index
    %8 = vector.load %arg7[%c0_6, %c0_7] : memref<16x128xf32, #tpu.memory_space<vmem>>, vector<16x128xf32>
    tpu.vector_store %arg7[%c0_6, %c0_7], %7 {strides = array<i32>} : memref<16x128xf32, #tpu.memory_space<vmem>>, vector<16x128xf32>,
    %c0_i32_8 = arith.constant 0 : i32
    %9 = arith.cmpi eq, %arg2, %c0_i32_8 : i32
    %10 = arith.extui %9 : i1 to i32
    %c0_i32_9 = arith.constant 0 : i32
    %11 = arith.cmpi ne, %10, %c0_i32_9 : i32
    scf.if %11 {
      %c0_10 = arith.constant 0 : index
      %c0_11 = arith.constant 0 : index
      %12 = vector.load %arg7[%c0_10, %c0_11] : memref<16x128xf32, #tpu.memory_space<vmem>>, vector<16x128xf32>
      %c0_12 = arith.constant 0 : index
      %c0_13 = arith.constant 0 : index
      %13 = vector.load %arg5[%c0_12, %c0_13] : memref<16x128xf32, #tpu.memory_space<vmem>>, vector<16x128xf32>
      %14 = arith.addf %12, %13 : vector<16x128xf32>
      %c0_14 = arith.constant 0 : index
      %c0_15 = arith.constant 0 : index
      %15 = vector.load %arg6[%c0_14, %c0_15] : memref<16x128xf32, #tpu.memory_space<vmem>>, vector<16x128xf32>
      tpu.vector_store %arg6[%c0_14, %c0_15], %14 {strides = array<i32>} : memref<16x128xf32, #tpu.memory_space<vmem>>, vector<16x128xf32>,
    } else {
    }
    return
  }
  func.func @transform_0(%arg0: i32, %arg1: i32, %arg2: i32) -> (i32, i32) {
    %c0_i32 = arith.constant 0 : i32
    return %arg0, %arg2 : i32, i32
  }
  func.func @transform_1(%arg0: i32, %arg1: i32, %arg2: i32) -> (i32, i32) {
    %c0_i32 = arith.constant 0 : i32
    return %arg2, %arg1 : i32, i32
  }
  func.func @transform_2(%arg0: i32, %arg1: i32, %arg2: i32) -> (i32, i32) {
    %c0_i32 = arith.constant 0 : i32
    return %arg0, %arg1 : i32, i32
  }
  func.func @transform_3(%arg0: i32, %arg1: i32, %arg2: i32) -> (i32, i32) {
    %c0_i32 = arith.constant 0 : i32
    return %arg0, %arg1 : i32, i32
  }
}

module attributes {stable_mosaic.version = 11 : i64} {
  func.func @_rms_matmul_kernel(%arg0: i32, %arg1: i32, %arg2: memref<16x128xf32, #tpu.memory_space<vmem>>, %arg3: memref<1x128xf32, #tpu.memory_space<vmem>>, %arg4: memref<128x128xbf16, #tpu.memory_space<vmem>>, %arg5: memref<16x128xf32, #tpu.memory_space<vmem>>, %arg6: memref<16x128xbf16, #tpu.memory_space<vmem>>) attributes {dimension_semantics = [#tpu.dimension_semantics<parallel>, #tpu.dimension_semantics<arbitrary>], iteration_bounds = array<i64: 1, 3>, scalar_prefetch = 0 : i64, scratch_operands = 1 : i64, tpu.core_type = #tpu.core_type<tc>, window_params = [{transform_indices = @transform_0, window_bounds = array<i64: 16, 128>}, {pipeline_mode = #tpu.pipeline_mode<synchronous>, transform_indices = @transform_1, window_bounds = array<i64: 1, 128>}, {transform_indices = @transform_2, window_bounds = array<i64: 128, 128>}, {transform_indices = @transform_3, window_bounds = array<i64: 16, 128>}]} {
    %c0_i32 = arith.constant 0 : i32
    %0 = arith.cmpi eq, %arg1, %c0_i32 : i32
    %1 = arith.extui %0 : i1 to i32
    %c0_i32_0 = arith.constant 0 : i32
    %2 = arith.cmpi ne, %1, %c0_i32_0 : i32
    scf.if %2 {
      %c0_6 = arith.constant 0 : index
      %c0_7 = arith.constant 0 : index
      %7 = vector.load %arg2[%c0_6, %c0_7] : memref<16x128xf32, #tpu.memory_space<vmem>>, vector<16x128xf32>
      %8 = arith.mulf %7, %7 : vector<16x128xf32>
      %cst_8 = arith.constant dense<0.000000e+00> : vector<16xf32>
      %9 = vector.multi_reduction <add>, %8, %cst_8 [1] : vector<16x128xf32> to vector<16xf32>
      %10 = vector.shape_cast %9 : vector<16xf32> to vector<16x1xf32>
      %cst_9 = arith.constant 3.125000e-02 : f32
      %11 = vector.broadcast %cst_9 : f32 to vector<16x1xf32>
      %12 = arith.mulf %10, %11 : vector<16x1xf32>
      %cst_10 = arith.constant 9.99999993E-9 : f32
      %13 = vector.broadcast %cst_10 : f32 to vector<16x1xf32>
      %14 = arith.addf %12, %13 : vector<16x1xf32>
      %15 = math.rsqrt %14 : vector<16x1xf32>
      %16 = vector.broadcast %15 : vector<16x1xf32> to vector<16x128xf32>
      %17 = arith.mulf %7, %16 : vector<16x128xf32>
      %c0_11 = arith.constant 0 : index
      %c0_12 = arith.constant 0 : index
      %18 = vector.load %arg3[%c0_11, %c0_12] : memref<1x128xf32, #tpu.memory_space<vmem>>, vector<1x128xf32>
      %19 = vector.broadcast %18 : vector<1x128xf32> to vector<16x128xf32>
      %20 = arith.mulf %17, %19 : vector<16x128xf32>
      %21 = arith.truncf %20 : vector<16x128xf32> to vector<16x128xbf16>
      %c0_13 = arith.constant 0 : index
      %c0_14 = arith.constant 0 : index
      %22 = vector.load %arg6[%c0_13, %c0_14] : memref<16x128xbf16, #tpu.memory_space<vmem>>, vector<16x128xbf16>
      tpu.vector_store %arg6[%c0_13, %c0_14], %21 {strides = array<i32>} : memref<16x128xbf16, #tpu.memory_space<vmem>>, vector<16x128xbf16>,
    } else {
    }
    %c0 = arith.constant 0 : index
    %c0_1 = arith.constant 0 : index
    %3 = vector.load %arg6[%c0, %c0_1] : memref<16x128xbf16, #tpu.memory_space<vmem>>, vector<16x128xbf16>
    %c0_2 = arith.constant 0 : index
    %c0_3 = arith.constant 0 : index
    %4 = vector.load %arg4[%c0_2, %c0_3] : memref<128x128xbf16, #tpu.memory_space<vmem>>, vector<128x128xbf16>
    %cst = arith.constant dense<0.000000e+00> : vector<16x128xf32>
    %5 = tpu.matmul %3, %4, %cst {dimension_numbers = #tpu.dot_dimension_numbers<[1], [0], [0], [1], [0, 0, 1, 1], [], []>} : vector<16x128xbf16>, vector<128x128xbf16>, vector<16x128xf32> -> vector<16x128xf32>
    %c0_4 = arith.constant 0 : index
    %c0_5 = arith.constant 0 : index
    %6 = vector.load %arg5[%c0_4, %c0_5] : memref<16x128xf32, #tpu.memory_space<vmem>>, vector<16x128xf32>
    tpu.vector_store %arg5[%c0_4, %c0_5], %5 {strides = array<i32>} : memref<16x128xf32, #tpu.memory_space<vmem>>, vector<16x128xf32>,
    return
  }
  func.func @transform_0(%arg0: i32, %arg1: i32) -> (i32, i32) {
    %c0_i32 = arith.constant 0 : i32
    %c0_i32_0 = arith.constant 0 : i32
    return %arg0, %c0_i32 : i32, i32
  }
  func.func @transform_1(%arg0: i32, %arg1: i32) -> (i32, i32) {
    %c0_i32 = arith.constant 0 : i32
    %c0_i32_0 = arith.constant 0 : i32
    %c0_i32_1 = arith.constant 0 : i32
    return %c0_i32, %c0_i32_0 : i32, i32
  }
  func.func @transform_2(%arg0: i32, %arg1: i32) -> (i32, i32) {
    %c0_i32 = arith.constant 0 : i32
    %c0_i32_0 = arith.constant 0 : i32
    return %c0_i32, %arg1 : i32, i32
  }
  func.func @transform_3(%arg0: i32, %arg1: i32) -> (i32, i32) {
    %c0_i32 = arith.constant 0 : i32
    return %arg0, %arg1 : i32, i32
  }
}

module attributes {stable_mosaic.version = 11 : i64} {
  func.func @_flash_attn_kernel(%arg0: i32, %arg1: i32, %arg2: i32, %arg3: memref<1x8x128xf32, #tpu.memory_space<vmem>>, %arg4: memref<1x8x128xf32, #tpu.memory_space<vmem>>, %arg5: memref<1x8x128xf32, #tpu.memory_space<vmem>>, %arg6: memref<8x8xf32, #tpu.memory_space<vmem>>, %arg7: memref<8x8xf32, #tpu.memory_space<vmem>>, %arg8: memref<8x8xf32, #tpu.memory_space<vmem>>, %arg9: memref<8x8xf32, #tpu.memory_space<vmem>>, %arg10: memref<1x8x128xbf16, #tpu.memory_space<vmem>>, %arg11: memref<4x8x8xf32, #tpu.memory_space<vmem>>, %arg12: memref<4x8x1xf32, #tpu.memory_space<vmem>>, %arg13: memref<4x8x1xf32, #tpu.memory_space<vmem>>, %arg14: memref<4x8x8xf32, #tpu.memory_space<vmem>>) attributes {dimension_semantics = [#tpu.dimension_semantics<parallel>, #tpu.dimension_semantics<parallel>, #tpu.dimension_semantics<arbitrary>], iteration_bounds = array<i64: 2, 1, 1>, scalar_prefetch = 0 : i64, scratch_operands = 4 : i64, tpu.core_type = #tpu.core_type<tc>, window_params = [{transform_indices = @transform_0, window_bounds = array<i64: 1, 8, 128>}, {transform_indices = @transform_1, window_bounds = array<i64: 1, 8, 128>}, {transform_indices = @transform_2, window_bounds = array<i64: 1, 8, 128>}, {transform_indices = @transform_3, window_bounds = array<i64: 8, 8>}, {transform_indices = @transform_4, window_bounds = array<i64: 8, 8>}, {transform_indices = @transform_5, window_bounds = array<i64: 8, 8>}, {transform_indices = @transform_6, window_bounds = array<i64: 8, 8>}, {transform_indices = @transform_7, window_bounds = array<i64: 1, 8, 128>}]} {
    %c0_i32 = arith.constant 0 : i32
    %0 = arith.cmpi eq, %arg2, %c0_i32 : i32
    %1 = arith.extui %0 : i1 to i32
    %c0_i32_0 = arith.constant 0 : i32
    %2 = arith.cmpi ne, %1, %c0_i32_0 : i32
    scf.if %2 {
      %cst_118 = arith.constant -1.000000e+30 : f32
      %224 = vector.broadcast %cst_118 : f32 to vector<4x8x1xf32>
      %c0_119 = arith.constant 0 : index
      %c0_120 = arith.constant 0 : index
      %c0_121 = arith.constant 0 : index
      %225 = vector.load %arg12[%c0_119, %c0_120, %c0_121] : memref<4x8x1xf32, #tpu.memory_space<vmem>>, vector<4x8x1xf32>
      tpu.vector_store %arg12[%c0_119, %c0_120, %c0_121], %224 {strides = array<i32>} : memref<4x8x1xf32, #tpu.memory_space<vmem>>, vector<4x8x1xf32>,
      %cst_122 = arith.constant 0.000000e+00 : f32
      %226 = vector.broadcast %cst_122 : f32 to vector<4x8x1xf32>
      %c0_123 = arith.constant 0 : index
      %c0_124 = arith.constant 0 : index
      %c0_125 = arith.constant 0 : index
      %227 = vector.load %arg13[%c0_123, %c0_124, %c0_125] : memref<4x8x1xf32, #tpu.memory_space<vmem>>, vector<4x8x1xf32>
      tpu.vector_store %arg13[%c0_123, %c0_124, %c0_125], %226 {strides = array<i32>} : memref<4x8x1xf32, #tpu.memory_space<vmem>>, vector<4x8x1xf32>,
      %cst_126 = arith.constant 0.000000e+00 : f32
      %228 = vector.broadcast %cst_126 : f32 to vector<4x8x8xf32>
      %c0_127 = arith.constant 0 : index
      %c0_128 = arith.constant 0 : index
      %c0_129 = arith.constant 0 : index
      %229 = vector.load %arg14[%c0_127, %c0_128, %c0_129] : memref<4x8x8xf32, #tpu.memory_space<vmem>>, vector<4x8x8xf32>
      tpu.vector_store %arg14[%c0_127, %c0_128, %c0_129], %228 {strides = array<i32>} : memref<4x8x8xf32, #tpu.memory_space<vmem>>, vector<4x8x8xf32>,
      %c0_130 = arith.constant 0 : index
      %c0_131 = arith.constant 0 : index
      %c0_132 = arith.constant 0 : index
      %230 = vector.load %arg3[%c0_130, %c0_131, %c0_132] : memref<1x8x128xf32, #tpu.memory_space<vmem>>, vector<1x8x128xf32>
      %231 = vector.shape_cast %230 : vector<1x8x128xf32> to vector<8x128xf32>
      %c0_133 = arith.constant 0 : index
      %c0_134 = arith.constant 0 : index
      %232 = vector.load %arg6[%c0_133, %c0_134] : memref<8x8xf32, #tpu.memory_space<vmem>>, vector<8x8xf32>
      %c0_135 = arith.constant 0 : index
      %c0_136 = arith.constant 0 : index
      %233 = vector.load %arg7[%c0_135, %c0_136] : memref<8x8xf32, #tpu.memory_space<vmem>>, vector<8x8xf32>
      %234 = vector.extract_strided_slice %231 {offsets = [0, 0], sizes = [8, 8], strides = [1, 1]} : vector<8x128xf32> to vector<8x8xf32>
      %235 = arith.mulf %234, %232 : vector<8x8xf32>
      %236 = vector.extract_strided_slice %234 {offsets = [0, 4], sizes = [8, 4], strides = [1, 1]} : vector<8x8xf32> to vector<8x4xf32>
      %cst_137 = arith.constant 0.000000e+00 : f32
      %237 = vector.broadcast %cst_137 : f32 to vector<8x4xf32>
      %238 = arith.subf %237, %236 : vector<8x4xf32>
      %239 = vector.extract_strided_slice %234 {offsets = [0, 0], sizes = [8, 4], strides = [1, 1]} : vector<8x8xf32> to vector<8x4xf32>
      %240 = tpu.concatenate %238, %239 in 1 : vector<8x4xf32>, vector<8x4xf32> -> vector<8x8xf32>
      %241 = arith.mulf %240, %233 : vector<8x8xf32>
      %242 = arith.addf %235, %241 : vector<8x8xf32>
      %cst_138 = arith.constant 0.353553385 : f32
      %243 = vector.broadcast %cst_138 : f32 to vector<8x8xf32>
      %244 = arith.mulf %242, %243 : vector<8x8xf32>
      %c0_139 = arith.constant 0 : index
      %c0_140 = arith.constant 0 : index
      %c0_141 = arith.constant 0 : index
      %245 = vector.load %arg11[%c0_139, %c0_140, %c0_141] : memref<4x8x8xf32, #tpu.memory_space<vmem>>, vector<1x8x8xf32>
      %246 = vector.shape_cast %245 : vector<1x8x8xf32> to vector<8x8xf32>
      %247 = vector.shape_cast %244 : vector<8x8xf32> to vector<1x8x8xf32>
      tpu.vector_store %arg11[%c0_139, %c0_140, %c0_141], %247 {strides = array<i32>} : memref<4x8x8xf32, #tpu.memory_space<vmem>>, vector<1x8x8xf32>,
      %248 = vector.extract_strided_slice %231 {offsets = [0, 8], sizes = [8, 8], strides = [1, 1]} : vector<8x128xf32> to vector<8x8xf32>
      %249 = arith.mulf %248, %232 : vector<8x8xf32>
      %250 = vector.extract_strided_slice %248 {offsets = [0, 4], sizes = [8, 4], strides = [1, 1]} : vector<8x8xf32> to vector<8x4xf32>
      %cst_142 = arith.constant 0.000000e+00 : f32
      %251 = vector.broadcast %cst_142 : f32 to vector<8x4xf32>
      %252 = arith.subf %251, %250 : vector<8x4xf32>
      %253 = vector.extract_strided_slice %248 {offsets = [0, 0], sizes = [8, 4], strides = [1, 1]} : vector<8x8xf32> to vector<8x4xf32>
      %254 = tpu.concatenate %252, %253 in 1 : vector<8x4xf32>, vector<8x4xf32> -> vector<8x8xf32>
      %255 = arith.mulf %254, %233 : vector<8x8xf32>
      %256 = arith.addf %249, %255 : vector<8x8xf32>
      %cst_143 = arith.constant 0.353553385 : f32
      %257 = vector.broadcast %cst_143 : f32 to vector<8x8xf32>
      %258 = arith.mulf %256, %257 : vector<8x8xf32>
      %c1_144 = arith.constant 1 : index
      %c0_145 = arith.constant 0 : index
      %c0_146 = arith.constant 0 : index
      %259 = vector.load %arg11[%c1_144, %c0_145, %c0_146] : memref<4x8x8xf32, #tpu.memory_space<vmem>>, vector<1x8x8xf32>
      %260 = vector.shape_cast %259 : vector<1x8x8xf32> to vector<8x8xf32>
      %261 = vector.shape_cast %258 : vector<8x8xf32> to vector<1x8x8xf32>
      tpu.vector_store %arg11[%c1_144, %c0_145, %c0_146], %261 {strides = array<i32>} : memref<4x8x8xf32, #tpu.memory_space<vmem>>, vector<1x8x8xf32>,
      %262 = vector.extract_strided_slice %231 {offsets = [0, 16], sizes = [8, 8], strides = [1, 1]} : vector<8x128xf32> to vector<8x8xf32>
      %263 = arith.mulf %262, %232 : vector<8x8xf32>
      %264 = vector.extract_strided_slice %262 {offsets = [0, 4], sizes = [8, 4], strides = [1, 1]} : vector<8x8xf32> to vector<8x4xf32>
      %cst_147 = arith.constant 0.000000e+00 : f32
      %265 = vector.broadcast %cst_147 : f32 to vector<8x4xf32>
      %266 = arith.subf %265, %264 : vector<8x4xf32>
      %267 = vector.extract_strided_slice %262 {offsets = [0, 0], sizes = [8, 4], strides = [1, 1]} : vector<8x8xf32> to vector<8x4xf32>
      %268 = tpu.concatenate %266, %267 in 1 : vector<8x4xf32>, vector<8x4xf32> -> vector<8x8xf32>
      %269 = arith.mulf %268, %233 : vector<8x8xf32>
      %270 = arith.addf %263, %269 : vector<8x8xf32>
      %cst_148 = arith.constant 0.353553385 : f32
      %271 = vector.broadcast %cst_148 : f32 to vector<8x8xf32>
      %272 = arith.mulf %270, %271 : vector<8x8xf32>
      %c2_149 = arith.constant 2 : index
      %c0_150 = arith.constant 0 : index
      %c0_151 = arith.constant 0 : index
      %273 = vector.load %arg11[%c2_149, %c0_150, %c0_151] : memref<4x8x8xf32, #tpu.memory_space<vmem>>, vector<1x8x8xf32>
      %274 = vector.shape_cast %273 : vector<1x8x8xf32> to vector<8x8xf32>
      %275 = vector.shape_cast %272 : vector<8x8xf32> to vector<1x8x8xf32>
      tpu.vector_store %arg11[%c2_149, %c0_150, %c0_151], %275 {strides = array<i32>} : memref<4x8x8xf32, #tpu.memory_space<vmem>>, vector<1x8x8xf32>,
      %276 = vector.extract_strided_slice %231 {offsets = [0, 24], sizes = [8, 8], strides = [1, 1]} : vector<8x128xf32> to vector<8x8xf32>
      %277 = arith.mulf %276, %232 : vector<8x8xf32>
      %278 = vector.extract_strided_slice %276 {offsets = [0, 4], sizes = [8, 4], strides = [1, 1]} : vector<8x8xf32> to vector<8x4xf32>
      %cst_152 = arith.constant 0.000000e+00 : f32
      %279 = vector.broadcast %cst_152 : f32 to vector<8x4xf32>
      %280 = arith.subf %279, %278 : vector<8x4xf32>
      %281 = vector.extract_strided_slice %276 {offsets = [0, 0], sizes = [8, 4], strides = [1, 1]} : vector<8x8xf32> to vector<8x4xf32>
      %282 = tpu.concatenate %280, %281 in 1 : vector<8x4xf32>, vector<8x4xf32> -> vector<8x8xf32>
      %283 = arith.mulf %282, %233 : vector<8x8xf32>
      %284 = arith.addf %277, %283 : vector<8x8xf32>
      %cst_153 = arith.constant 0.353553385 : f32
      %285 = vector.broadcast %cst_153 : f32 to vector<8x8xf32>
      %286 = arith.mulf %284, %285 : vector<8x8xf32>
      %c3_154 = arith.constant 3 : index
      %c0_155 = arith.constant 0 : index
      %c0_156 = arith.constant 0 : index
      %287 = vector.load %arg11[%c3_154, %c0_155, %c0_156] : memref<4x8x8xf32, #tpu.memory_space<vmem>>, vector<1x8x8xf32>
      %288 = vector.shape_cast %287 : vector<1x8x8xf32> to vector<8x8xf32>
      %289 = vector.shape_cast %286 : vector<8x8xf32> to vector<1x8x8xf32>
      tpu.vector_store %arg11[%c3_154, %c0_155, %c0_156], %289 {strides = array<i32>} : memref<4x8x8xf32, #tpu.memory_space<vmem>>, vector<1x8x8xf32>,
    } else {
    }
    %c0 = arith.constant 0 : index
    %c0_1 = arith.constant 0 : index
    %c0_2 = arith.constant 0 : index
    %3 = vector.load %arg4[%c0, %c0_1, %c0_2] : memref<1x8x128xf32, #tpu.memory_space<vmem>>, vector<1x8x128xf32>
    %4 = vector.shape_cast %3 : vector<1x8x128xf32> to vector<8x128xf32>
    %c0_3 = arith.constant 0 : index
    %c0_4 = arith.constant 0 : index
    %c0_5 = arith.constant 0 : index
    %5 = vector.load %arg5[%c0_3, %c0_4, %c0_5] : memref<1x8x128xf32, #tpu.memory_space<vmem>>, vector<1x8x128xf32>
    %6 = vector.shape_cast %5 : vector<1x8x128xf32> to vector<8x128xf32>
    %c0_6 = arith.constant 0 : index
    %c0_7 = arith.constant 0 : index
    %7 = vector.load %arg8[%c0_6, %c0_7] : memref<8x8xf32, #tpu.memory_space<vmem>>, vector<8x8xf32>
    %c0_8 = arith.constant 0 : index
    %c0_9 = arith.constant 0 : index
    %8 = vector.load %arg9[%c0_8, %c0_9] : memref<8x8xf32, #tpu.memory_space<vmem>>, vector<8x8xf32>
    %c8_i32 = arith.constant 8 : i32
    %9 = arith.muli %arg1, %c8_i32 : i32
    %10 = tpu.iota {dimensions = array<i32: 0>} : vector<8x8xi32>
    %11 = vector.broadcast %9 : i32 to vector<8x8xi32>
    %12 = arith.addi %11, %10 : vector<8x8xi32>
    %c8_i32_10 = arith.constant 8 : i32
    %13 = arith.muli %arg2, %c8_i32_10 : i32
    %14 = tpu.iota {dimensions = array<i32: 1>} : vector<8x8xi32>
    %15 = vector.broadcast %13 : i32 to vector<8x8xi32>
    %16 = arith.addi %15, %14 : vector<8x8xi32>
    %c8_i32_11 = arith.constant 8 : i32
    %17 = vector.broadcast %c8_i32_11 : i32 to vector<8x8xi32>
    %18 = arith.cmpi slt, %16, %17 : vector<8x8xi32>
    %19 = arith.cmpi sle, %16, %12 : vector<8x8xi32>
    %20 = arith.andi %18, %19 : vector<8x8xi1>
    %21 = vector.extract_strided_slice %4 {offsets = [0, 0], sizes = [8, 8], strides = [1, 1]} : vector<8x128xf32> to vector<8x8xf32>
    %22 = arith.mulf %21, %7 : vector<8x8xf32>
    %23 = vector.extract_strided_slice %21 {offsets = [0, 4], sizes = [8, 4], strides = [1, 1]} : vector<8x8xf32> to vector<8x4xf32>
    %cst = arith.constant 0.000000e+00 : f32
    %24 = vector.broadcast %cst : f32 to vector<8x4xf32>
    %25 = arith.subf %24, %23 : vector<8x4xf32>
    %26 = vector.extract_strided_slice %21 {offsets = [0, 0], sizes = [8, 4], strides = [1, 1]} : vector<8x8xf32> to vector<8x4xf32>
    %27 = tpu.concatenate %25, %26 in 1 : vector<8x4xf32>, vector<8x4xf32> -> vector<8x8xf32>
    %28 = arith.mulf %27, %8 : vector<8x8xf32>
    %29 = arith.addf %22, %28 : vector<8x8xf32>
    %c0_12 = arith.constant 0 : index
    %c0_13 = arith.constant 0 : index
    %c0_14 = arith.constant 0 : index
    %30 = vector.load %arg11[%c0_12, %c0_13, %c0_14] : memref<4x8x8xf32, #tpu.memory_space<vmem>>, vector<1x8x8xf32>
    %31 = vector.shape_cast %30 : vector<1x8x8xf32> to vector<8x8xf32>
    %32 = arith.truncf %31 : vector<8x8xf32> to vector<8x8xbf16>
    %33 = arith.truncf %29 : vector<8x8xf32> to vector<8x8xbf16>
    %cst_15 = arith.constant dense<0.000000e+00> : vector<8x8xf32>
    %34 = tpu.matmul %32, %33, %cst_15 {dimension_numbers = #tpu.dot_dimension_numbers<[1], [1], [0], [0], [0, 0, 1, 0], [], []>} : vector<8x8xbf16>, vector<8x8xbf16>, vector<8x8xf32> -> vector<8x8xf32>
    %cst_16 = arith.constant -1.000000e+30 : f32
    %35 = vector.broadcast %cst_16 : f32 to vector<8x8xf32>
    %36 = arith.select %20, %34, %35 : vector<8x8xi1>, vector<8x8xf32>
    %c0_17 = arith.constant 0 : index
    %c0_18 = arith.constant 0 : index
    %c0_19 = arith.constant 0 : index
    %37 = vector.load %arg12[%c0_17, %c0_18, %c0_19] : memref<4x8x1xf32, #tpu.memory_space<vmem>>, vector<1x8x1xf32>
    %38 = vector.shape_cast %37 : vector<1x8x1xf32> to vector<8x1xf32>
    %c0_20 = arith.constant 0 : index
    %c0_21 = arith.constant 0 : index
    %c0_22 = arith.constant 0 : index
    %39 = vector.load %arg13[%c0_20, %c0_21, %c0_22] : memref<4x8x1xf32, #tpu.memory_space<vmem>>, vector<1x8x1xf32>
    %40 = vector.shape_cast %39 : vector<1x8x1xf32> to vector<8x1xf32>
    %cst_23 = arith.constant dense<0xFF800000> : vector<8xf32>
    %41 = vector.multi_reduction <maximumf>, %36, %cst_23 [1] : vector<8x8xf32> to vector<8xf32>
    %42 = vector.shape_cast %41 : vector<8xf32> to vector<8x1xf32>
    %43 = arith.maximumf %38, %42 : vector<8x1xf32>
    %44 = arith.subf %38, %43 : vector<8x1xf32>
    %45 = math.exp %44 : vector<8x1xf32>
    %46 = vector.broadcast %43 : vector<8x1xf32> to vector<8x8xf32>
    %47 = arith.subf %36, %46 : vector<8x8xf32>
    %48 = math.exp %47 : vector<8x8xf32>
    %49 = arith.mulf %45, %40 : vector<8x1xf32>
    %cst_24 = arith.constant dense<0.000000e+00> : vector<8xf32>
    %50 = vector.multi_reduction <add>, %48, %cst_24 [1] : vector<8x8xf32> to vector<8xf32>
    %51 = vector.shape_cast %50 : vector<8xf32> to vector<8x1xf32>
    %52 = arith.addf %49, %51 : vector<8x1xf32>
    %c0_25 = arith.constant 0 : index
    %c0_26 = arith.constant 0 : index
    %c0_27 = arith.constant 0 : index
    %53 = vector.load %arg13[%c0_25, %c0_26, %c0_27] : memref<4x8x1xf32, #tpu.memory_space<vmem>>, vector<1x8x1xf32>
    %54 = vector.shape_cast %53 : vector<1x8x1xf32> to vector<8x1xf32>
    %55 = vector.shape_cast %52 : vector<8x1xf32> to vector<1x8x1xf32>
    tpu.vector_store %arg13[%c0_25, %c0_26, %c0_27], %55 {strides = array<i32>} : memref<4x8x1xf32, #tpu.memory_space<vmem>>, vector<1x8x1xf32>,
    %c0_28 = arith.constant 0 : index
    %c0_29 = arith.constant 0 : index
    %c0_30 = arith.constant 0 : index
    %56 = vector.load %arg12[%c0_28, %c0_29, %c0_30] : memref<4x8x1xf32, #tpu.memory_space<vmem>>, vector<1x8x1xf32>
    %57 = vector.shape_cast %56 : vector<1x8x1xf32> to vector<8x1xf32>
    %58 = vector.shape_cast %43 : vector<8x1xf32> to vector<1x8x1xf32>
    tpu.vector_store %arg12[%c0_28, %c0_29, %c0_30], %58 {strides = array<i32>} : memref<4x8x1xf32, #tpu.memory_space<vmem>>, vector<1x8x1xf32>,
    %59 = arith.truncf %48 : vector<8x8xf32> to vector<8x8xbf16>
    %60 = vector.extract_strided_slice %6 {offsets = [0, 0], sizes = [8, 8], strides = [1, 1]} : vector<8x128xf32> to vector<8x8xf32>
    %61 = arith.truncf %60 : vector<8x8xf32> to vector<8x8xbf16>
    %cst_31 = arith.constant dense<0.000000e+00> : vector<8x8xf32>
    %62 = tpu.matmul %59, %61, %cst_31 {dimension_numbers = #tpu.dot_dimension_numbers<[1], [0], [0], [1], [0, 0, 1, 1], [], []>} : vector<8x8xbf16>, vector<8x8xbf16>, vector<8x8xf32> -> vector<8x8xf32>
    %c0_32 = arith.constant 0 : index
    %c0_33 = arith.constant 0 : index
    %c0_34 = arith.constant 0 : index
    %63 = vector.load %arg14[%c0_32, %c0_33, %c0_34] : memref<4x8x8xf32, #tpu.memory_space<vmem>>, vector<1x8x8xf32>
    %64 = vector.shape_cast %63 : vector<1x8x8xf32> to vector<8x8xf32>
    %65 = vector.broadcast %45 : vector<8x1xf32> to vector<8x8xf32>
    %66 = arith.mulf %65, %64 : vector<8x8xf32>
    %67 = arith.addf %66, %62 : vector<8x8xf32>
    %c0_35 = arith.constant 0 : index
    %c0_36 = arith.constant 0 : index
    %c0_37 = arith.constant 0 : index
    %68 = vector.load %arg14[%c0_35, %c0_36, %c0_37] : memref<4x8x8xf32, #tpu.memory_space<vmem>>, vector<1x8x8xf32>
    %69 = vector.shape_cast %68 : vector<1x8x8xf32> to vector<8x8xf32>
    %70 = vector.shape_cast %67 : vector<8x8xf32> to vector<1x8x8xf32>
    tpu.vector_store %arg14[%c0_35, %c0_36, %c0_37], %70 {strides = array<i32>} : memref<4x8x8xf32, #tpu.memory_space<vmem>>, vector<1x8x8xf32>,
    %71 = vector.extract_strided_slice %4 {offsets = [0, 8], sizes = [8, 8], strides = [1, 1]} : vector<8x128xf32> to vector<8x8xf32>
    %72 = arith.mulf %71, %7 : vector<8x8xf32>
    %73 = vector.extract_strided_slice %71 {offsets = [0, 4], sizes = [8, 4], strides = [1, 1]} : vector<8x8xf32> to vector<8x4xf32>
    %cst_38 = arith.constant 0.000000e+00 : f32
    %74 = vector.broadcast %cst_38 : f32 to vector<8x4xf32>
    %75 = arith.subf %74, %73 : vector<8x4xf32>
    %76 = vector.extract_strided_slice %71 {offsets = [0, 0], sizes = [8, 4], strides = [1, 1]} : vector<8x8xf32> to vector<8x4xf32>
    %77 = tpu.concatenate %75, %76 in 1 : vector<8x4xf32>, vector<8x4xf32> -> vector<8x8xf32>
    %78 = arith.mulf %77, %8 : vector<8x8xf32>
    %79 = arith.addf %72, %78 : vector<8x8xf32>
    %c1 = arith.constant 1 : index
    %c0_39 = arith.constant 0 : index
    %c0_40 = arith.constant 0 : index
    %80 = vector.load %arg11[%c1, %c0_39, %c0_40] : memref<4x8x8xf32, #tpu.memory_space<vmem>>, vector<1x8x8xf32>
    %81 = vector.shape_cast %80 : vector<1x8x8xf32> to vector<8x8xf32>
    %82 = arith.truncf %81 : vector<8x8xf32> to vector<8x8xbf16>
    %83 = arith.truncf %79 : vector<8x8xf32> to vector<8x8xbf16>
    %cst_41 = arith.constant dense<0.000000e+00> : vector<8x8xf32>
    %84 = tpu.matmul %82, %83, %cst_41 {dimension_numbers = #tpu.dot_dimension_numbers<[1], [1], [0], [0], [0, 0, 1, 0], [], []>} : vector<8x8xbf16>, vector<8x8xbf16>, vector<8x8xf32> -> vector<8x8xf32>
    %cst_42 = arith.constant -1.000000e+30 : f32
    %85 = vector.broadcast %cst_42 : f32 to vector<8x8xf32>
    %86 = arith.select %20, %84, %85 : vector<8x8xi1>, vector<8x8xf32>
    %c1_43 = arith.constant 1 : index
    %c0_44 = arith.constant 0 : index
    %c0_45 = arith.constant 0 : index
    %87 = vector.load %arg12[%c1_43, %c0_44, %c0_45] : memref<4x8x1xf32, #tpu.memory_space<vmem>>, vector<1x8x1xf32>
    %88 = vector.shape_cast %87 : vector<1x8x1xf32> to vector<8x1xf32>
    %c1_46 = arith.constant 1 : index
    %c0_47 = arith.constant 0 : index
    %c0_48 = arith.constant 0 : index
    %89 = vector.load %arg13[%c1_46, %c0_47, %c0_48] : memref<4x8x1xf32, #tpu.memory_space<vmem>>, vector<1x8x1xf32>
    %90 = vector.shape_cast %89 : vector<1x8x1xf32> to vector<8x1xf32>
    %cst_49 = arith.constant dense<0xFF800000> : vector<8xf32>
    %91 = vector.multi_reduction <maximumf>, %86, %cst_49 [1] : vector<8x8xf32> to vector<8xf32>
    %92 = vector.shape_cast %91 : vector<8xf32> to vector<8x1xf32>
    %93 = arith.maximumf %88, %92 : vector<8x1xf32>
    %94 = arith.subf %88, %93 : vector<8x1xf32>
    %95 = math.exp %94 : vector<8x1xf32>
    %96 = vector.broadcast %93 : vector<8x1xf32> to vector<8x8xf32>
    %97 = arith.subf %86, %96 : vector<8x8xf32>
    %98 = math.exp %97 : vector<8x8xf32>
    %99 = arith.mulf %95, %90 : vector<8x1xf32>
    %cst_50 = arith.constant dense<0.000000e+00> : vector<8xf32>
    %100 = vector.multi_reduction <add>, %98, %cst_50 [1] : vector<8x8xf32> to vector<8xf32>
    %101 = vector.shape_cast %100 : vector<8xf32> to vector<8x1xf32>
    %102 = arith.addf %99, %101 : vector<8x1xf32>
    %c1_51 = arith.constant 1 : index
    %c0_52 = arith.constant 0 : index
    %c0_53 = arith.constant 0 : index
    %103 = vector.load %arg13[%c1_51, %c0_52, %c0_53] : memref<4x8x1xf32, #tpu.memory_space<vmem>>, vector<1x8x1xf32>
    %104 = vector.shape_cast %103 : vector<1x8x1xf32> to vector<8x1xf32>
    %105 = vector.shape_cast %102 : vector<8x1xf32> to vector<1x8x1xf32>
    tpu.vector_store %arg13[%c1_51, %c0_52, %c0_53], %105 {strides = array<i32>} : memref<4x8x1xf32, #tpu.memory_space<vmem>>, vector<1x8x1xf32>,
    %c1_54 = arith.constant 1 : index
    %c0_55 = arith.constant 0 : index
    %c0_56 = arith.constant 0 : index
    %106 = vector.load %arg12[%c1_54, %c0_55, %c0_56] : memref<4x8x1xf32, #tpu.memory_space<vmem>>, vector<1x8x1xf32>
    %107 = vector.shape_cast %106 : vector<1x8x1xf32> to vector<8x1xf32>
    %108 = vector.shape_cast %93 : vector<8x1xf32> to vector<1x8x1xf32>
    tpu.vector_store %arg12[%c1_54, %c0_55, %c0_56], %108 {strides = array<i32>} : memref<4x8x1xf32, #tpu.memory_space<vmem>>, vector<1x8x1xf32>,
    %109 = arith.truncf %98 : vector<8x8xf32> to vector<8x8xbf16>
    %110 = vector.extract_strided_slice %6 {offsets = [0, 8], sizes = [8, 8], strides = [1, 1]} : vector<8x128xf32> to vector<8x8xf32>
    %111 = arith.truncf %110 : vector<8x8xf32> to vector<8x8xbf16>
    %cst_57 = arith.constant dense<0.000000e+00> : vector<8x8xf32>
    %112 = tpu.matmul %109, %111, %cst_57 {dimension_numbers = #tpu.dot_dimension_numbers<[1], [0], [0], [1], [0, 0, 1, 1], [], []>} : vector<8x8xbf16>, vector<8x8xbf16>, vector<8x8xf32> -> vector<8x8xf32>
    %c1_58 = arith.constant 1 : index
    %c0_59 = arith.constant 0 : index
    %c0_60 = arith.constant 0 : index
    %113 = vector.load %arg14[%c1_58, %c0_59, %c0_60] : memref<4x8x8xf32, #tpu.memory_space<vmem>>, vector<1x8x8xf32>
    %114 = vector.shape_cast %113 : vector<1x8x8xf32> to vector<8x8xf32>
    %115 = vector.broadcast %95 : vector<8x1xf32> to vector<8x8xf32>
    %116 = arith.mulf %115, %114 : vector<8x8xf32>
    %117 = arith.addf %116, %112 : vector<8x8xf32>
    %c1_61 = arith.constant 1 : index
    %c0_62 = arith.constant 0 : index
    %c0_63 = arith.constant 0 : index
    %118 = vector.load %arg14[%c1_61, %c0_62, %c0_63] : memref<4x8x8xf32, #tpu.memory_space<vmem>>, vector<1x8x8xf32>
    %119 = vector.shape_cast %118 : vector<1x8x8xf32> to vector<8x8xf32>
    %120 = vector.shape_cast %117 : vector<8x8xf32> to vector<1x8x8xf32>
    tpu.vector_store %arg14[%c1_61, %c0_62, %c0_63], %120 {strides = array<i32>} : memref<4x8x8xf32, #tpu.memory_space<vmem>>, vector<1x8x8xf32>,
    %121 = vector.extract_strided_slice %4 {offsets = [0, 16], sizes = [8, 8], strides = [1, 1]} : vector<8x128xf32> to vector<8x8xf32>
    %122 = arith.mulf %121, %7 : vector<8x8xf32>
    %123 = vector.extract_strided_slice %121 {offsets = [0, 4], sizes = [8, 4], strides = [1, 1]} : vector<8x8xf32> to vector<8x4xf32>
    %cst_64 = arith.constant 0.000000e+00 : f32
    %124 = vector.broadcast %cst_64 : f32 to vector<8x4xf32>
    %125 = arith.subf %124, %123 : vector<8x4xf32>
    %126 = vector.extract_strided_slice %121 {offsets = [0, 0], sizes = [8, 4], strides = [1, 1]} : vector<8x8xf32> to vector<8x4xf32>
    %127 = tpu.concatenate %125, %126 in 1 : vector<8x4xf32>, vector<8x4xf32> -> vector<8x8xf32>
    %128 = arith.mulf %127, %8 : vector<8x8xf32>
    %129 = arith.addf %122, %128 : vector<8x8xf32>
    %c2 = arith.constant 2 : index
    %c0_65 = arith.constant 0 : index
    %c0_66 = arith.constant 0 : index
    %130 = vector.load %arg11[%c2, %c0_65, %c0_66] : memref<4x8x8xf32, #tpu.memory_space<vmem>>, vector<1x8x8xf32>
    %131 = vector.shape_cast %130 : vector<1x8x8xf32> to vector<8x8xf32>
    %132 = arith.truncf %131 : vector<8x8xf32> to vector<8x8xbf16>
    %133 = arith.truncf %129 : vector<8x8xf32> to vector<8x8xbf16>
    %cst_67 = arith.constant dense<0.000000e+00> : vector<8x8xf32>
    %134 = tpu.matmul %132, %133, %cst_67 {dimension_numbers = #tpu.dot_dimension_numbers<[1], [1], [0], [0], [0, 0, 1, 0], [], []>} : vector<8x8xbf16>, vector<8x8xbf16>, vector<8x8xf32> -> vector<8x8xf32>
    %cst_68 = arith.constant -1.000000e+30 : f32
    %135 = vector.broadcast %cst_68 : f32 to vector<8x8xf32>
    %136 = arith.select %20, %134, %135 : vector<8x8xi1>, vector<8x8xf32>
    %c2_69 = arith.constant 2 : index
    %c0_70 = arith.constant 0 : index
    %c0_71 = arith.constant 0 : index
    %137 = vector.load %arg12[%c2_69, %c0_70, %c0_71] : memref<4x8x1xf32, #tpu.memory_space<vmem>>, vector<1x8x1xf32>
    %138 = vector.shape_cast %137 : vector<1x8x1xf32> to vector<8x1xf32>
    %c2_72 = arith.constant 2 : index
    %c0_73 = arith.constant 0 : index
    %c0_74 = arith.constant 0 : index
    %139 = vector.load %arg13[%c2_72, %c0_73, %c0_74] : memref<4x8x1xf32, #tpu.memory_space<vmem>>, vector<1x8x1xf32>
    %140 = vector.shape_cast %139 : vector<1x8x1xf32> to vector<8x1xf32>
    %cst_75 = arith.constant dense<0xFF800000> : vector<8xf32>
    %141 = vector.multi_reduction <maximumf>, %136, %cst_75 [1] : vector<8x8xf32> to vector<8xf32>
    %142 = vector.shape_cast %141 : vector<8xf32> to vector<8x1xf32>
    %143 = arith.maximumf %138, %142 : vector<8x1xf32>
    %144 = arith.subf %138, %143 : vector<8x1xf32>
    %145 = math.exp %144 : vector<8x1xf32>
    %146 = vector.broadcast %143 : vector<8x1xf32> to vector<8x8xf32>
    %147 = arith.subf %136, %146 : vector<8x8xf32>
    %148 = math.exp %147 : vector<8x8xf32>
    %149 = arith.mulf %145, %140 : vector<8x1xf32>
    %cst_76 = arith.constant dense<0.000000e+00> : vector<8xf32>
    %150 = vector.multi_reduction <add>, %148, %cst_76 [1] : vector<8x8xf32> to vector<8xf32>
    %151 = vector.shape_cast %150 : vector<8xf32> to vector<8x1xf32>
    %152 = arith.addf %149, %151 : vector<8x1xf32>
    %c2_77 = arith.constant 2 : index
    %c0_78 = arith.constant 0 : index
    %c0_79 = arith.constant 0 : index
    %153 = vector.load %arg13[%c2_77, %c0_78, %c0_79] : memref<4x8x1xf32, #tpu.memory_space<vmem>>, vector<1x8x1xf32>
    %154 = vector.shape_cast %153 : vector<1x8x1xf32> to vector<8x1xf32>
    %155 = vector.shape_cast %152 : vector<8x1xf32> to vector<1x8x1xf32>
    tpu.vector_store %arg13[%c2_77, %c0_78, %c0_79], %155 {strides = array<i32>} : memref<4x8x1xf32, #tpu.memory_space<vmem>>, vector<1x8x1xf32>,
    %c2_80 = arith.constant 2 : index
    %c0_81 = arith.constant 0 : index
    %c0_82 = arith.constant 0 : index
    %156 = vector.load %arg12[%c2_80, %c0_81, %c0_82] : memref<4x8x1xf32, #tpu.memory_space<vmem>>, vector<1x8x1xf32>
    %157 = vector.shape_cast %156 : vector<1x8x1xf32> to vector<8x1xf32>
    %158 = vector.shape_cast %143 : vector<8x1xf32> to vector<1x8x1xf32>
    tpu.vector_store %arg12[%c2_80, %c0_81, %c0_82], %158 {strides = array<i32>} : memref<4x8x1xf32, #tpu.memory_space<vmem>>, vector<1x8x1xf32>,
    %159 = arith.truncf %148 : vector<8x8xf32> to vector<8x8xbf16>
    %160 = vector.extract_strided_slice %6 {offsets = [0, 16], sizes = [8, 8], strides = [1, 1]} : vector<8x128xf32> to vector<8x8xf32>
    %161 = arith.truncf %160 : vector<8x8xf32> to vector<8x8xbf16>
    %cst_83 = arith.constant dense<0.000000e+00> : vector<8x8xf32>
    %162 = tpu.matmul %159, %161, %cst_83 {dimension_numbers = #tpu.dot_dimension_numbers<[1], [0], [0], [1], [0, 0, 1, 1], [], []>} : vector<8x8xbf16>, vector<8x8xbf16>, vector<8x8xf32> -> vector<8x8xf32>
    %c2_84 = arith.constant 2 : index
    %c0_85 = arith.constant 0 : index
    %c0_86 = arith.constant 0 : index
    %163 = vector.load %arg14[%c2_84, %c0_85, %c0_86] : memref<4x8x8xf32, #tpu.memory_space<vmem>>, vector<1x8x8xf32>
    %164 = vector.shape_cast %163 : vector<1x8x8xf32> to vector<8x8xf32>
    %165 = vector.broadcast %145 : vector<8x1xf32> to vector<8x8xf32>
    %166 = arith.mulf %165, %164 : vector<8x8xf32>
    %167 = arith.addf %166, %162 : vector<8x8xf32>
    %c2_87 = arith.constant 2 : index
    %c0_88 = arith.constant 0 : index
    %c0_89 = arith.constant 0 : index
    %168 = vector.load %arg14[%c2_87, %c0_88, %c0_89] : memref<4x8x8xf32, #tpu.memory_space<vmem>>, vector<1x8x8xf32>
    %169 = vector.shape_cast %168 : vector<1x8x8xf32> to vector<8x8xf32>
    %170 = vector.shape_cast %167 : vector<8x8xf32> to vector<1x8x8xf32>
    tpu.vector_store %arg14[%c2_87, %c0_88, %c0_89], %170 {strides = array<i32>} : memref<4x8x8xf32, #tpu.memory_space<vmem>>, vector<1x8x8xf32>,
    %171 = vector.extract_strided_slice %4 {offsets = [0, 24], sizes = [8, 8], strides = [1, 1]} : vector<8x128xf32> to vector<8x8xf32>
    %172 = arith.mulf %171, %7 : vector<8x8xf32>
    %173 = vector.extract_strided_slice %171 {offsets = [0, 4], sizes = [8, 4], strides = [1, 1]} : vector<8x8xf32> to vector<8x4xf32>
    %cst_90 = arith.constant 0.000000e+00 : f32
    %174 = vector.broadcast %cst_90 : f32 to vector<8x4xf32>
    %175 = arith.subf %174, %173 : vector<8x4xf32>
    %176 = vector.extract_strided_slice %171 {offsets = [0, 0], sizes = [8, 4], strides = [1, 1]} : vector<8x8xf32> to vector<8x4xf32>
    %177 = tpu.concatenate %175, %176 in 1 : vector<8x4xf32>, vector<8x4xf32> -> vector<8x8xf32>
    %178 = arith.mulf %177, %8 : vector<8x8xf32>
    %179 = arith.addf %172, %178 : vector<8x8xf32>
    %c3 = arith.constant 3 : index
    %c0_91 = arith.constant 0 : index
    %c0_92 = arith.constant 0 : index
    %180 = vector.load %arg11[%c3, %c0_91, %c0_92] : memref<4x8x8xf32, #tpu.memory_space<vmem>>, vector<1x8x8xf32>
    %181 = vector.shape_cast %180 : vector<1x8x8xf32> to vector<8x8xf32>
    %182 = arith.truncf %181 : vector<8x8xf32> to vector<8x8xbf16>
    %183 = arith.truncf %179 : vector<8x8xf32> to vector<8x8xbf16>
    %cst_93 = arith.constant dense<0.000000e+00> : vector<8x8xf32>
    %184 = tpu.matmul %182, %183, %cst_93 {dimension_numbers = #tpu.dot_dimension_numbers<[1], [1], [0], [0], [0, 0, 1, 0], [], []>} : vector<8x8xbf16>, vector<8x8xbf16>, vector<8x8xf32> -> vector<8x8xf32>
    %cst_94 = arith.constant -1.000000e+30 : f32
    %185 = vector.broadcast %cst_94 : f32 to vector<8x8xf32>
    %186 = arith.select %20, %184, %185 : vector<8x8xi1>, vector<8x8xf32>
    %c3_95 = arith.constant 3 : index
    %c0_96 = arith.constant 0 : index
    %c0_97 = arith.constant 0 : index
    %187 = vector.load %arg12[%c3_95, %c0_96, %c0_97] : memref<4x8x1xf32, #tpu.memory_space<vmem>>, vector<1x8x1xf32>
    %188 = vector.shape_cast %187 : vector<1x8x1xf32> to vector<8x1xf32>
    %c3_98 = arith.constant 3 : index
    %c0_99 = arith.constant 0 : index
    %c0_100 = arith.constant 0 : index
    %189 = vector.load %arg13[%c3_98, %c0_99, %c0_100] : memref<4x8x1xf32, #tpu.memory_space<vmem>>, vector<1x8x1xf32>
    %190 = vector.shape_cast %189 : vector<1x8x1xf32> to vector<8x1xf32>
    %cst_101 = arith.constant dense<0xFF800000> : vector<8xf32>
    %191 = vector.multi_reduction <maximumf>, %186, %cst_101 [1] : vector<8x8xf32> to vector<8xf32>
    %192 = vector.shape_cast %191 : vector<8xf32> to vector<8x1xf32>
    %193 = arith.maximumf %188, %192 : vector<8x1xf32>
    %194 = arith.subf %188, %193 : vector<8x1xf32>
    %195 = math.exp %194 : vector<8x1xf32>
    %196 = vector.broadcast %193 : vector<8x1xf32> to vector<8x8xf32>
    %197 = arith.subf %186, %196 : vector<8x8xf32>
    %198 = math.exp %197 : vector<8x8xf32>
    %199 = arith.mulf %195, %190 : vector<8x1xf32>
    %cst_102 = arith.constant dense<0.000000e+00> : vector<8xf32>
    %200 = vector.multi_reduction <add>, %198, %cst_102 [1] : vector<8x8xf32> to vector<8xf32>
    %201 = vector.shape_cast %200 : vector<8xf32> to vector<8x1xf32>
    %202 = arith.addf %199, %201 : vector<8x1xf32>
    %c3_103 = arith.constant 3 : index
    %c0_104 = arith.constant 0 : index
    %c0_105 = arith.constant 0 : index
    %203 = vector.load %arg13[%c3_103, %c0_104, %c0_105] : memref<4x8x1xf32, #tpu.memory_space<vmem>>, vector<1x8x1xf32>
    %204 = vector.shape_cast %203 : vector<1x8x1xf32> to vector<8x1xf32>
    %205 = vector.shape_cast %202 : vector<8x1xf32> to vector<1x8x1xf32>
    tpu.vector_store %arg13[%c3_103, %c0_104, %c0_105], %205 {strides = array<i32>} : memref<4x8x1xf32, #tpu.memory_space<vmem>>, vector<1x8x1xf32>,
    %c3_106 = arith.constant 3 : index
    %c0_107 = arith.constant 0 : index
    %c0_108 = arith.constant 0 : index
    %206 = vector.load %arg12[%c3_106, %c0_107, %c0_108] : memref<4x8x1xf32, #tpu.memory_space<vmem>>, vector<1x8x1xf32>
    %207 = vector.shape_cast %206 : vector<1x8x1xf32> to vector<8x1xf32>
    %208 = vector.shape_cast %193 : vector<8x1xf32> to vector<1x8x1xf32>
    tpu.vector_store %arg12[%c3_106, %c0_107, %c0_108], %208 {strides = array<i32>} : memref<4x8x1xf32, #tpu.memory_space<vmem>>, vector<1x8x1xf32>,
    %209 = arith.truncf %198 : vector<8x8xf32> to vector<8x8xbf16>
    %210 = vector.extract_strided_slice %6 {offsets = [0, 24], sizes = [8, 8], strides = [1, 1]} : vector<8x128xf32> to vector<8x8xf32>
    %211 = arith.truncf %210 : vector<8x8xf32> to vector<8x8xbf16>
    %cst_109 = arith.constant dense<0.000000e+00> : vector<8x8xf32>
    %212 = tpu.matmul %209, %211, %cst_109 {dimension_numbers = #tpu.dot_dimension_numbers<[1], [0], [0], [1], [0, 0, 1, 1], [], []>} : vector<8x8xbf16>, vector<8x8xbf16>, vector<8x8xf32> -> vector<8x8xf32>
    %c3_110 = arith.constant 3 : index
    %c0_111 = arith.constant 0 : index
    %c0_112 = arith.constant 0 : index
    %213 = vector.load %arg14[%c3_110, %c0_111, %c0_112] : memref<4x8x8xf32, #tpu.memory_space<vmem>>, vector<1x8x8xf32>
    %214 = vector.shape_cast %213 : vector<1x8x8xf32> to vector<8x8xf32>
    %215 = vector.broadcast %195 : vector<8x1xf32> to vector<8x8xf32>
    %216 = arith.mulf %215, %214 : vector<8x8xf32>
    %217 = arith.addf %216, %212 : vector<8x8xf32>
    %c3_113 = arith.constant 3 : index
    %c0_114 = arith.constant 0 : index
    %c0_115 = arith.constant 0 : index
    %218 = vector.load %arg14[%c3_113, %c0_114, %c0_115] : memref<4x8x8xf32, #tpu.memory_space<vmem>>, vector<1x8x8xf32>
    %219 = vector.shape_cast %218 : vector<1x8x8xf32> to vector<8x8xf32>
    %220 = vector.shape_cast %217 : vector<8x8xf32> to vector<1x8x8xf32>
    tpu.vector_store %arg14[%c3_113, %c0_114, %c0_115], %220 {strides = array<i32>} : memref<4x8x8xf32, #tpu.memory_space<vmem>>, vector<1x8x8xf32>,
    %c0_i32_116 = arith.constant 0 : i32
    %221 = arith.cmpi eq, %arg2, %c0_i32_116 : i32
    %222 = arith.extui %221 : i1 to i32
    %c0_i32_117 = arith.constant 0 : i32
    %223 = arith.cmpi ne, %222, %c0_i32_117 : i32
    scf.if %223 {
      %c0_118 = arith.constant 0 : index
      %c0_119 = arith.constant 0 : index
      %c0_120 = arith.constant 0 : index
      %224 = vector.load %arg13[%c0_118, %c0_119, %c0_120] : memref<4x8x1xf32, #tpu.memory_space<vmem>>, vector<1x8x1xf32>
      %225 = vector.shape_cast %224 : vector<1x8x1xf32> to vector<8x1xf32>
      %cst_121 = arith.constant 1.000000e-30 : f32
      %226 = vector.broadcast %cst_121 : f32 to vector<8x1xf32>
      %227 = arith.maximumf %225, %226 : vector<8x1xf32>
      %228 = tpu.reciprocal %227 {approx = true} : vector<8x1xf32> -> vector<8x1xf32>
      %c0_122 = arith.constant 0 : index
      %c0_123 = arith.constant 0 : index
      %c0_124 = arith.constant 0 : index
      %229 = vector.load %arg14[%c0_122, %c0_123, %c0_124] : memref<4x8x8xf32, #tpu.memory_space<vmem>>, vector<1x8x8xf32>
      %230 = vector.shape_cast %229 : vector<1x8x8xf32> to vector<8x8xf32>
      %231 = vector.broadcast %228 : vector<8x1xf32> to vector<8x8xf32>
      %232 = arith.mulf %230, %231 : vector<8x8xf32>
      %c1_125 = arith.constant 1 : index
      %c0_126 = arith.constant 0 : index
      %c0_127 = arith.constant 0 : index
      %233 = vector.load %arg13[%c1_125, %c0_126, %c0_127] : memref<4x8x1xf32, #tpu.memory_space<vmem>>, vector<1x8x1xf32>
      %234 = vector.shape_cast %233 : vector<1x8x1xf32> to vector<8x1xf32>
      %cst_128 = arith.constant 1.000000e-30 : f32
      %235 = vector.broadcast %cst_128 : f32 to vector<8x1xf32>
      %236 = arith.maximumf %234, %235 : vector<8x1xf32>
      %237 = tpu.reciprocal %236 {approx = true} : vector<8x1xf32> -> vector<8x1xf32>
      %c1_129 = arith.constant 1 : index
      %c0_130 = arith.constant 0 : index
      %c0_131 = arith.constant 0 : index
      %238 = vector.load %arg14[%c1_129, %c0_130, %c0_131] : memref<4x8x8xf32, #tpu.memory_space<vmem>>, vector<1x8x8xf32>
      %239 = vector.shape_cast %238 : vector<1x8x8xf32> to vector<8x8xf32>
      %240 = vector.broadcast %237 : vector<8x1xf32> to vector<8x8xf32>
      %241 = arith.mulf %239, %240 : vector<8x8xf32>
      %c2_132 = arith.constant 2 : index
      %c0_133 = arith.constant 0 : index
      %c0_134 = arith.constant 0 : index
      %242 = vector.load %arg13[%c2_132, %c0_133, %c0_134] : memref<4x8x1xf32, #tpu.memory_space<vmem>>, vector<1x8x1xf32>
      %243 = vector.shape_cast %242 : vector<1x8x1xf32> to vector<8x1xf32>
      %cst_135 = arith.constant 1.000000e-30 : f32
      %244 = vector.broadcast %cst_135 : f32 to vector<8x1xf32>
      %245 = arith.maximumf %243, %244 : vector<8x1xf32>
      %246 = tpu.reciprocal %245 {approx = true} : vector<8x1xf32> -> vector<8x1xf32>
      %c2_136 = arith.constant 2 : index
      %c0_137 = arith.constant 0 : index
      %c0_138 = arith.constant 0 : index
      %247 = vector.load %arg14[%c2_136, %c0_137, %c0_138] : memref<4x8x8xf32, #tpu.memory_space<vmem>>, vector<1x8x8xf32>
      %248 = vector.shape_cast %247 : vector<1x8x8xf32> to vector<8x8xf32>
      %249 = vector.broadcast %246 : vector<8x1xf32> to vector<8x8xf32>
      %250 = arith.mulf %248, %249 : vector<8x8xf32>
      %c3_139 = arith.constant 3 : index
      %c0_140 = arith.constant 0 : index
      %c0_141 = arith.constant 0 : index
      %251 = vector.load %arg13[%c3_139, %c0_140, %c0_141] : memref<4x8x1xf32, #tpu.memory_space<vmem>>, vector<1x8x1xf32>
      %252 = vector.shape_cast %251 : vector<1x8x1xf32> to vector<8x1xf32>
      %cst_142 = arith.constant 1.000000e-30 : f32
      %253 = vector.broadcast %cst_142 : f32 to vector<8x1xf32>
      %254 = arith.maximumf %252, %253 : vector<8x1xf32>
      %255 = tpu.reciprocal %254 {approx = true} : vector<8x1xf32> -> vector<8x1xf32>
      %c3_143 = arith.constant 3 : index
      %c0_144 = arith.constant 0 : index
      %c0_145 = arith.constant 0 : index
      %256 = vector.load %arg14[%c3_143, %c0_144, %c0_145] : memref<4x8x8xf32, #tpu.memory_space<vmem>>, vector<1x8x8xf32>
      %257 = vector.shape_cast %256 : vector<1x8x8xf32> to vector<8x8xf32>
      %258 = vector.broadcast %255 : vector<8x1xf32> to vector<8x8xf32>
      %259 = arith.mulf %257, %258 : vector<8x8xf32>
      %cst_146 = arith.constant 0.000000e+00 : f32
      %260 = vector.broadcast %cst_146 : f32 to vector<8x96xf32>
      %261 = tpu.concatenate %232, %241, %250, %259, %260 in 1 : vector<8x8xf32>, vector<8x8xf32>, vector<8x8xf32>, vector<8x8xf32>, vector<8x96xf32> -> vector<8x128xf32>
      %262 = arith.truncf %261 : vector<8x128xf32> to vector<8x128xbf16>
      %c0_147 = arith.constant 0 : index
      %c0_148 = arith.constant 0 : index
      %c0_149 = arith.constant 0 : index
      %263 = vector.load %arg10[%c0_147, %c0_148, %c0_149] : memref<1x8x128xbf16, #tpu.memory_space<vmem>>, vector<1x8x128xbf16>
      %264 = vector.shape_cast %263 : vector<1x8x128xbf16> to vector<8x128xbf16>
      %265 = vector.shape_cast %262 : vector<8x128xbf16> to vector<1x8x128xbf16>
      tpu.vector_store %arg10[%c0_147, %c0_148, %c0_149], %265 {strides = array<i32>} : memref<1x8x128xbf16, #tpu.memory_space<vmem>>, vector<1x8x128xbf16>,
    } else {
    }
    return
  }
  func.func @transform_0(%arg0: i32, %arg1: i32, %arg2: i32) -> (i32, i32, i32) {
    %c0_i32 = arith.constant 0 : i32
    %c0_i32_0 = arith.constant 0 : i32
    return %arg0, %arg1, %c0_i32 : i32, i32, i32
  }
  func.func @transform_1(%arg0: i32, %arg1: i32, %arg2: i32) -> (i32, i32, i32) {
    %c1_i32 = arith.constant 1 : i32
    %c0_i32 = arith.constant 0 : i32
    return %arg0, %arg2, %c1_i32 : i32, i32, i32
  }
  func.func @transform_2(%arg0: i32, %arg1: i32, %arg2: i32) -> (i32, i32, i32) {
    %c2_i32 = arith.constant 2 : i32
    %c0_i32 = arith.constant 0 : i32
    return %arg0, %arg2, %c2_i32 : i32, i32, i32
  }
  func.func @transform_3(%arg0: i32, %arg1: i32, %arg2: i32) -> (i32, i32) {
    %c0_i32 = arith.constant 0 : i32
    %c0_i32_0 = arith.constant 0 : i32
    return %arg1, %c0_i32 : i32, i32
  }
  func.func @transform_4(%arg0: i32, %arg1: i32, %arg2: i32) -> (i32, i32) {
    %c0_i32 = arith.constant 0 : i32
    %c0_i32_0 = arith.constant 0 : i32
    return %arg1, %c0_i32 : i32, i32
  }
  func.func @transform_5(%arg0: i32, %arg1: i32, %arg2: i32) -> (i32, i32) {
    %c0_i32 = arith.constant 0 : i32
    %c0_i32_0 = arith.constant 0 : i32
    return %arg2, %c0_i32 : i32, i32
  }
  func.func @transform_6(%arg0: i32, %arg1: i32, %arg2: i32) -> (i32, i32) {
    %c0_i32 = arith.constant 0 : i32
    %c0_i32_0 = arith.constant 0 : i32
    return %arg2, %c0_i32 : i32, i32
  }
  func.func @transform_7(%arg0: i32, %arg1: i32, %arg2: i32) -> (i32, i32, i32) {
    %c0_i32 = arith.constant 0 : i32
    %c0_i32_0 = arith.constant 0 : i32
    return %arg0, %arg1, %c0_i32 : i32, i32, i32
  }
}

module attributes {stable_mosaic.version = 11 : i64} {
  func.func @_rms_matmul_kernel(%arg0: i32, %arg1: i32, %arg2: memref<16x128xf32, #tpu.memory_space<vmem>>, %arg3: memref<1x128xf32, #tpu.memory_space<vmem>>, %arg4: memref<128x256xbf16, #tpu.memory_space<vmem>>, %arg5: memref<16x256xf32, #tpu.memory_space<vmem>>, %arg6: memref<16x128xbf16, #tpu.memory_space<vmem>>) attributes {dimension_semantics = [#tpu.dimension_semantics<parallel>, #tpu.dimension_semantics<arbitrary>], iteration_bounds = array<i64: 1, 1>, scalar_prefetch = 0 : i64, scratch_operands = 1 : i64, tpu.core_type = #tpu.core_type<tc>, window_params = [{transform_indices = @transform_0, window_bounds = array<i64: 16, 128>}, {pipeline_mode = #tpu.pipeline_mode<synchronous>, transform_indices = @transform_1, window_bounds = array<i64: 1, 128>}, {transform_indices = @transform_2, window_bounds = array<i64: 128, 256>}, {transform_indices = @transform_3, window_bounds = array<i64: 16, 256>}]} {
    %c0_i32 = arith.constant 0 : i32
    %0 = arith.cmpi eq, %arg1, %c0_i32 : i32
    %1 = arith.extui %0 : i1 to i32
    %c0_i32_0 = arith.constant 0 : i32
    %2 = arith.cmpi ne, %1, %c0_i32_0 : i32
    scf.if %2 {
      %c0_6 = arith.constant 0 : index
      %c0_7 = arith.constant 0 : index
      %7 = vector.load %arg2[%c0_6, %c0_7] : memref<16x128xf32, #tpu.memory_space<vmem>>, vector<16x128xf32>
      %8 = arith.mulf %7, %7 : vector<16x128xf32>
      %cst_8 = arith.constant dense<0.000000e+00> : vector<16xf32>
      %9 = vector.multi_reduction <add>, %8, %cst_8 [1] : vector<16x128xf32> to vector<16xf32>
      %10 = vector.shape_cast %9 : vector<16xf32> to vector<16x1xf32>
      %cst_9 = arith.constant 3.125000e-02 : f32
      %11 = vector.broadcast %cst_9 : f32 to vector<16x1xf32>
      %12 = arith.mulf %10, %11 : vector<16x1xf32>
      %cst_10 = arith.constant 9.99999993E-9 : f32
      %13 = vector.broadcast %cst_10 : f32 to vector<16x1xf32>
      %14 = arith.addf %12, %13 : vector<16x1xf32>
      %15 = math.rsqrt %14 : vector<16x1xf32>
      %16 = vector.broadcast %15 : vector<16x1xf32> to vector<16x128xf32>
      %17 = arith.mulf %7, %16 : vector<16x128xf32>
      %c0_11 = arith.constant 0 : index
      %c0_12 = arith.constant 0 : index
      %18 = vector.load %arg3[%c0_11, %c0_12] : memref<1x128xf32, #tpu.memory_space<vmem>>, vector<1x128xf32>
      %19 = vector.broadcast %18 : vector<1x128xf32> to vector<16x128xf32>
      %20 = arith.mulf %17, %19 : vector<16x128xf32>
      %21 = arith.truncf %20 : vector<16x128xf32> to vector<16x128xbf16>
      %c0_13 = arith.constant 0 : index
      %c0_14 = arith.constant 0 : index
      %22 = vector.load %arg6[%c0_13, %c0_14] : memref<16x128xbf16, #tpu.memory_space<vmem>>, vector<16x128xbf16>
      tpu.vector_store %arg6[%c0_13, %c0_14], %21 {strides = array<i32>} : memref<16x128xbf16, #tpu.memory_space<vmem>>, vector<16x128xbf16>,
    } else {
    }
    %c0 = arith.constant 0 : index
    %c0_1 = arith.constant 0 : index
    %3 = vector.load %arg6[%c0, %c0_1] : memref<16x128xbf16, #tpu.memory_space<vmem>>, vector<16x128xbf16>
    %c0_2 = arith.constant 0 : index
    %c0_3 = arith.constant 0 : index
    %4 = vector.load %arg4[%c0_2, %c0_3] : memref<128x256xbf16, #tpu.memory_space<vmem>>, vector<128x256xbf16>
    %cst = arith.constant dense<0.000000e+00> : vector<16x256xf32>
    %5 = tpu.matmul %3, %4, %cst {dimension_numbers = #tpu.dot_dimension_numbers<[1], [0], [0], [1], [0, 0, 1, 1], [], []>} : vector<16x128xbf16>, vector<128x256xbf16>, vector<16x256xf32> -> vector<16x256xf32>
    %c0_4 = arith.constant 0 : index
    %c0_5 = arith.constant 0 : index
    %6 = vector.load %arg5[%c0_4, %c0_5] : memref<16x256xf32, #tpu.memory_space<vmem>>, vector<16x256xf32>
    tpu.vector_store %arg5[%c0_4, %c0_5], %5 {strides = array<i32>} : memref<16x256xf32, #tpu.memory_space<vmem>>, vector<16x256xf32>,
    return
  }
  func.func @transform_0(%arg0: i32, %arg1: i32) -> (i32, i32) {
    %c0_i32 = arith.constant 0 : i32
    %c0_i32_0 = arith.constant 0 : i32
    return %arg0, %c0_i32 : i32, i32
  }
  func.func @transform_1(%arg0: i32, %arg1: i32) -> (i32, i32) {
    %c0_i32 = arith.constant 0 : i32
    %c0_i32_0 = arith.constant 0 : i32
    %c0_i32_1 = arith.constant 0 : i32
    return %c0_i32, %c0_i32_0 : i32, i32
  }
  func.func @transform_2(%arg0: i32, %arg1: i32) -> (i32, i32) {
    %c0_i32 = arith.constant 0 : i32
    %c0_i32_0 = arith.constant 0 : i32
    return %c0_i32, %arg1 : i32, i32
  }
  func.func @transform_3(%arg0: i32, %arg1: i32) -> (i32, i32) {
    %c0_i32 = arith.constant 0 : i32
    return %arg0, %arg1 : i32, i32
  }
}

module attributes {stable_mosaic.version = 11 : i64} {
  func.func @_swiglu_down_residual_kernel(%arg0: i32, %arg1: i32, %arg2: i32, %arg3: memref<16x128xf32, #tpu.memory_space<vmem>>, %arg4: memref<16x128xf32, #tpu.memory_space<vmem>>, %arg5: memref<128x128xbf16, #tpu.memory_space<vmem>>, %arg6: memref<16x128xf32, #tpu.memory_space<vmem>>, %arg7: memref<16x128xf32, #tpu.memory_space<vmem>>, %arg8: memref<16x128xf32, #tpu.memory_space<vmem>>) attributes {dimension_semantics = [#tpu.dimension_semantics<parallel>, #tpu.dimension_semantics<parallel>, #tpu.dimension_semantics<arbitrary>], iteration_bounds = array<i64: 1, 1, 1>, scalar_prefetch = 0 : i64, scratch_operands = 1 : i64, tpu.core_type = #tpu.core_type<tc>, window_params = [{transform_indices = @transform_0, window_bounds = array<i64: 16, 128>}, {transform_indices = @transform_1, window_bounds = array<i64: 16, 128>}, {transform_indices = @transform_2, window_bounds = array<i64: 128, 128>}, {transform_indices = @transform_3, window_bounds = array<i64: 16, 128>}, {transform_indices = @transform_4, window_bounds = array<i64: 16, 128>}]} {
    %c0_i32 = arith.constant 0 : i32
    %0 = arith.cmpi eq, %arg2, %c0_i32 : i32
    %1 = arith.extui %0 : i1 to i32
    %c0_i32_0 = arith.constant 0 : i32
    %2 = arith.cmpi ne, %1, %c0_i32_0 : i32
    scf.if %2 {
      %cst_15 = arith.constant 0.000000e+00 : f32
      %23 = vector.broadcast %cst_15 : f32 to vector<16x128xf32>
      %c0_16 = arith.constant 0 : index
      %c0_17 = arith.constant 0 : index
      %24 = vector.load %arg8[%c0_16, %c0_17] : memref<16x128xf32, #tpu.memory_space<vmem>>, vector<16x128xf32>
      tpu.vector_store %arg8[%c0_16, %c0_17], %23 {strides = array<i32>} : memref<16x128xf32, #tpu.memory_space<vmem>>, vector<16x128xf32>,
    } else {
    }
    %c0 = arith.constant 0 : index
    %c0_1 = arith.constant 0 : index
    %3 = vector.load %arg3[%c0, %c0_1] : memref<16x128xf32, #tpu.memory_space<vmem>>, vector<16x128xf32>
    %c0_2 = arith.constant 0 : index
    %c0_3 = arith.constant 0 : index
    %4 = vector.load %arg4[%c0_2, %c0_3] : memref<16x128xf32, #tpu.memory_space<vmem>>, vector<16x128xf32>
    %cst = arith.constant 0.000000e+00 : f32
    %5 = vector.broadcast %cst : f32 to vector<16x128xf32>
    %6 = arith.subf %5, %3 : vector<16x128xf32>
    %7 = math.exp %6 : vector<16x128xf32>
    %cst_4 = arith.constant 1.000000e+00 : f32
    %8 = vector.broadcast %cst_4 : f32 to vector<16x128xf32>
    %9 = arith.addf %8, %7 : vector<16x128xf32>
    %cst_5 = arith.constant 1.000000e+00 : f32
    %10 = vector.broadcast %cst_5 : f32 to vector<16x128xf32>
    %11 = arith.divf %10, %9 : vector<16x128xf32>
    %12 = arith.mulf %3, %11 : vector<16x128xf32>
    %13 = arith.mulf %12, %4 : vector<16x128xf32>
    %c0_6 = arith.constant 0 : index
    %c0_7 = arith.constant 0 : index
    %14 = vector.load %arg8[%c0_6, %c0_7] : memref<16x128xf32, #tpu.memory_space<vmem>>, vector<16x128xf32>
    %15 = arith.truncf %13 : vector<16x128xf32> to vector<16x128xbf16>
    %c0_8 = arith.constant 0 : index
    %c0_9 = arith.constant 0 : index
    %16 = vector.load %arg5[%c0_8, %c0_9] : memref<128x128xbf16, #tpu.memory_space<vmem>>, vector<128x128xbf16>
    %cst_10 = arith.constant dense<0.000000e+00> : vector<16x128xf32>
    %17 = tpu.matmul %15, %16, %cst_10 {dimension_numbers = #tpu.dot_dimension_numbers<[1], [0], [0], [1], [0, 0, 1, 1], [], []>} : vector<16x128xbf16>, vector<128x128xbf16>, vector<16x128xf32> -> vector<16x128xf32>
    %18 = arith.addf %14, %17 : vector<16x128xf32>
    %c0_11 = arith.constant 0 : index
    %c0_12 = arith.constant 0 : index
    %19 = vector.load %arg8[%c0_11, %c0_12] : memref<16x128xf32, #tpu.memory_space<vmem>>, vector<16x128xf32>
    tpu.vector_store %arg8[%c0_11, %c0_12], %18 {strides = array<i32>} : memref<16x128xf32, #tpu.memory_space<vmem>>, vector<16x128xf32>,
    %c0_i32_13 = arith.constant 0 : i32
    %20 = arith.cmpi eq, %arg2, %c0_i32_13 : i32
    %21 = arith.extui %20 : i1 to i32
    %c0_i32_14 = arith.constant 0 : i32
    %22 = arith.cmpi ne, %21, %c0_i32_14 : i32
    scf.if %22 {
      %c0_15 = arith.constant 0 : index
      %c0_16 = arith.constant 0 : index
      %23 = vector.load %arg8[%c0_15, %c0_16] : memref<16x128xf32, #tpu.memory_space<vmem>>, vector<16x128xf32>
      %c0_17 = arith.constant 0 : index
      %c0_18 = arith.constant 0 : index
      %24 = vector.load %arg6[%c0_17, %c0_18] : memref<16x128xf32, #tpu.memory_space<vmem>>, vector<16x128xf32>
      %25 = arith.addf %23, %24 : vector<16x128xf32>
      %c0_19 = arith.constant 0 : index
      %c0_20 = arith.constant 0 : index
      %26 = vector.load %arg7[%c0_19, %c0_20] : memref<16x128xf32, #tpu.memory_space<vmem>>, vector<16x128xf32>
      tpu.vector_store %arg7[%c0_19, %c0_20], %25 {strides = array<i32>} : memref<16x128xf32, #tpu.memory_space<vmem>>, vector<16x128xf32>,
    } else {
    }
    return
  }
  func.func @transform_0(%arg0: i32, %arg1: i32, %arg2: i32) -> (i32, i32) {
    %c0_i32 = arith.constant 0 : i32
    return %arg0, %arg2 : i32, i32
  }
  func.func @transform_1(%arg0: i32, %arg1: i32, %arg2: i32) -> (i32, i32) {
    %c1_i32 = arith.constant 1 : i32
    %0 = arith.addi %arg2, %c1_i32 : i32
    %c0_i32 = arith.constant 0 : i32
    return %arg0, %0 : i32, i32
  }
  func.func @transform_2(%arg0: i32, %arg1: i32, %arg2: i32) -> (i32, i32) {
    %c0_i32 = arith.constant 0 : i32
    return %arg2, %arg1 : i32, i32
  }
  func.func @transform_3(%arg0: i32, %arg1: i32, %arg2: i32) -> (i32, i32) {
    %c0_i32 = arith.constant 0 : i32
    return %arg0, %arg1 : i32, i32
  }
  func.func @transform_4(%arg0: i32, %arg1: i32, %arg2: i32) -> (i32, i32) {
    %c0_i32 = arith.constant 0 : i32
    return %arg0, %arg1 : i32, i32
  }
}

module attributes {stable_mosaic.version = 11 : i64} {
  func.func @_rms_matmul_kernel(%arg0: i32, %arg1: i32, %arg2: memref<16x128xf32, #tpu.memory_space<vmem>>, %arg3: memref<1x128xf32, #tpu.memory_space<vmem>>, %arg4: memref<128x128xbf16, #tpu.memory_space<vmem>>, %arg5: memref<16x128xf32, #tpu.memory_space<vmem>>, %arg6: memref<16x128xbf16, #tpu.memory_space<vmem>>) attributes {dimension_semantics = [#tpu.dimension_semantics<parallel>, #tpu.dimension_semantics<arbitrary>], iteration_bounds = array<i64: 1, 3>, scalar_prefetch = 0 : i64, scratch_operands = 1 : i64, tpu.core_type = #tpu.core_type<tc>, window_params = [{transform_indices = @transform_0, window_bounds = array<i64: 16, 128>}, {pipeline_mode = #tpu.pipeline_mode<synchronous>, transform_indices = @transform_1, window_bounds = array<i64: 1, 128>}, {transform_indices = @transform_2, window_bounds = array<i64: 128, 128>}, {transform_indices = @transform_3, window_bounds = array<i64: 16, 128>}]} {
    %c0_i32 = arith.constant 0 : i32
    %0 = arith.cmpi eq, %arg1, %c0_i32 : i32
    %1 = arith.extui %0 : i1 to i32
    %c0_i32_0 = arith.constant 0 : i32
    %2 = arith.cmpi ne, %1, %c0_i32_0 : i32
    scf.if %2 {
      %c0_6 = arith.constant 0 : index
      %c0_7 = arith.constant 0 : index
      %7 = vector.load %arg2[%c0_6, %c0_7] : memref<16x128xf32, #tpu.memory_space<vmem>>, vector<16x128xf32>
      %8 = arith.mulf %7, %7 : vector<16x128xf32>
      %cst_8 = arith.constant dense<0.000000e+00> : vector<16xf32>
      %9 = vector.multi_reduction <add>, %8, %cst_8 [1] : vector<16x128xf32> to vector<16xf32>
      %10 = vector.shape_cast %9 : vector<16xf32> to vector<16x1xf32>
      %cst_9 = arith.constant 3.125000e-02 : f32
      %11 = vector.broadcast %cst_9 : f32 to vector<16x1xf32>
      %12 = arith.mulf %10, %11 : vector<16x1xf32>
      %cst_10 = arith.constant 9.99999993E-9 : f32
      %13 = vector.broadcast %cst_10 : f32 to vector<16x1xf32>
      %14 = arith.addf %12, %13 : vector<16x1xf32>
      %15 = math.rsqrt %14 : vector<16x1xf32>
      %16 = vector.broadcast %15 : vector<16x1xf32> to vector<16x128xf32>
      %17 = arith.mulf %7, %16 : vector<16x128xf32>
      %c0_11 = arith.constant 0 : index
      %c0_12 = arith.constant 0 : index
      %18 = vector.load %arg3[%c0_11, %c0_12] : memref<1x128xf32, #tpu.memory_space<vmem>>, vector<1x128xf32>
      %19 = vector.broadcast %18 : vector<1x128xf32> to vector<16x128xf32>
      %20 = arith.mulf %17, %19 : vector<16x128xf32>
      %21 = arith.truncf %20 : vector<16x128xf32> to vector<16x128xbf16>
      %c0_13 = arith.constant 0 : index
      %c0_14 = arith.constant 0 : index
      %22 = vector.load %arg6[%c0_13, %c0_14] : memref<16x128xbf16, #tpu.memory_space<vmem>>, vector<16x128xbf16>
      tpu.vector_store %arg6[%c0_13, %c0_14], %21 {strides = array<i32>} : memref<16x128xbf16, #tpu.memory_space<vmem>>, vector<16x128xbf16>,
    } else {
    }
    %c0 = arith.constant 0 : index
    %c0_1 = arith.constant 0 : index
    %3 = vector.load %arg6[%c0, %c0_1] : memref<16x128xbf16, #tpu.memory_space<vmem>>, vector<16x128xbf16>
    %c0_2 = arith.constant 0 : index
    %c0_3 = arith.constant 0 : index
    %4 = vector.load %arg4[%c0_2, %c0_3] : memref<128x128xbf16, #tpu.memory_space<vmem>>, vector<128x128xbf16>
    %cst = arith.constant dense<0.000000e+00> : vector<16x128xf32>
    %5 = tpu.matmul %3, %4, %cst {dimension_numbers = #tpu.dot_dimension_numbers<[1], [0], [0], [1], [0, 0, 1, 1], [], []>} : vector<16x128xbf16>, vector<128x128xbf16>, vector<16x128xf32> -> vector<16x128xf32>
    %c0_4 = arith.constant 0 : index
    %c0_5 = arith.constant 0 : index
    %6 = vector.load %arg5[%c0_4, %c0_5] : memref<16x128xf32, #tpu.memory_space<vmem>>, vector<16x128xf32>
    tpu.vector_store %arg5[%c0_4, %c0_5], %5 {strides = array<i32>} : memref<16x128xf32, #tpu.memory_space<vmem>>, vector<16x128xf32>,
    return
  }
  func.func @transform_0(%arg0: i32, %arg1: i32) -> (i32, i32) {
    %c0_i32 = arith.constant 0 : i32
    %c0_i32_0 = arith.constant 0 : i32
    return %arg0, %c0_i32 : i32, i32
  }
  func.func @transform_1(%arg0: i32, %arg1: i32) -> (i32, i32) {
    %c0_i32 = arith.constant 0 : i32
    %c0_i32_0 = arith.constant 0 : i32
    %c0_i32_1 = arith.constant 0 : i32
    return %c0_i32, %c0_i32_0 : i32, i32
  }
  func.func @transform_2(%arg0: i32, %arg1: i32) -> (i32, i32) {
    %c0_i32 = arith.constant 0 : i32
    %c0_i32_0 = arith.constant 0 : i32
    return %c0_i32, %arg1 : i32, i32
  }
  func.func @transform_3(%arg0: i32, %arg1: i32) -> (i32, i32) {
    %c0_i32 = arith.constant 0 : i32
    return %arg0, %arg1 : i32, i32
  }
}

module attributes {stable_mosaic.version = 11 : i64} {
  func.func @_swiglu_down_residual_kernel(%arg0: i32, %arg1: i32, %arg2: i32, %arg3: memref<16x128xf32, #tpu.memory_space<vmem>>, %arg4: memref<16x128xf32, #tpu.memory_space<vmem>>, %arg5: memref<128x128xbf16, #tpu.memory_space<vmem>>, %arg6: memref<16x128xf32, #tpu.memory_space<vmem>>, %arg7: memref<16x128xf32, #tpu.memory_space<vmem>>, %arg8: memref<16x128xf32, #tpu.memory_space<vmem>>) attributes {dimension_semantics = [#tpu.dimension_semantics<parallel>, #tpu.dimension_semantics<parallel>, #tpu.dimension_semantics<arbitrary>], iteration_bounds = array<i64: 1, 1, 1>, scalar_prefetch = 0 : i64, scratch_operands = 1 : i64, tpu.core_type = #tpu.core_type<tc>, window_params = [{transform_indices = @transform_0, window_bounds = array<i64: 16, 128>}, {transform_indices = @transform_1, window_bounds = array<i64: 16, 128>}, {transform_indices = @transform_2, window_bounds = array<i64: 128, 128>}, {transform_indices = @transform_3, window_bounds = array<i64: 16, 128>}, {transform_indices = @transform_4, window_bounds = array<i64: 16, 128>}]} {
    %c0_i32 = arith.constant 0 : i32
    %0 = arith.cmpi eq, %arg2, %c0_i32 : i32
    %1 = arith.extui %0 : i1 to i32
    %c0_i32_0 = arith.constant 0 : i32
    %2 = arith.cmpi ne, %1, %c0_i32_0 : i32
    scf.if %2 {
      %cst_15 = arith.constant 0.000000e+00 : f32
      %23 = vector.broadcast %cst_15 : f32 to vector<16x128xf32>
      %c0_16 = arith.constant 0 : index
      %c0_17 = arith.constant 0 : index
      %24 = vector.load %arg8[%c0_16, %c0_17] : memref<16x128xf32, #tpu.memory_space<vmem>>, vector<16x128xf32>
      tpu.vector_store %arg8[%c0_16, %c0_17], %23 {strides = array<i32>} : memref<16x128xf32, #tpu.memory_space<vmem>>, vector<16x128xf32>,
    } else {
    }
    %c0 = arith.constant 0 : index
    %c0_1 = arith.constant 0 : index
    %3 = vector.load %arg3[%c0, %c0_1] : memref<16x128xf32, #tpu.memory_space<vmem>>, vector<16x128xf32>
    %c0_2 = arith.constant 0 : index
    %c0_3 = arith.constant 0 : index
    %4 = vector.load %arg4[%c0_2, %c0_3] : memref<16x128xf32, #tpu.memory_space<vmem>>, vector<16x128xf32>
    %cst = arith.constant 0.000000e+00 : f32
    %5 = vector.broadcast %cst : f32 to vector<16x128xf32>
    %6 = arith.subf %5, %3 : vector<16x128xf32>
    %7 = math.exp %6 : vector<16x128xf32>
    %cst_4 = arith.constant 1.000000e+00 : f32
    %8 = vector.broadcast %cst_4 : f32 to vector<16x128xf32>
    %9 = arith.addf %8, %7 : vector<16x128xf32>
    %cst_5 = arith.constant 1.000000e+00 : f32
    %10 = vector.broadcast %cst_5 : f32 to vector<16x128xf32>
    %11 = arith.divf %10, %9 : vector<16x128xf32>
    %12 = arith.mulf %3, %11 : vector<16x128xf32>
    %13 = arith.mulf %12, %4 : vector<16x128xf32>
    %c0_6 = arith.constant 0 : index
    %c0_7 = arith.constant 0 : index
    %14 = vector.load %arg8[%c0_6, %c0_7] : memref<16x128xf32, #tpu.memory_space<vmem>>, vector<16x128xf32>
    %15 = arith.truncf %13 : vector<16x128xf32> to vector<16x128xbf16>
    %c0_8 = arith.constant 0 : index
    %c0_9 = arith.constant 0 : index
    %16 = vector.load %arg5[%c0_8, %c0_9] : memref<128x128xbf16, #tpu.memory_space<vmem>>, vector<128x128xbf16>
    %cst_10 = arith.constant dense<0.000000e+00> : vector<16x128xf32>
    %17 = tpu.matmul %15, %16, %cst_10 {dimension_numbers = #tpu.dot_dimension_numbers<[1], [0], [0], [1], [0, 0, 1, 1], [], []>} : vector<16x128xbf16>, vector<128x128xbf16>, vector<16x128xf32> -> vector<16x128xf32>
    %18 = arith.addf %14, %17 : vector<16x128xf32>
    %c0_11 = arith.constant 0 : index
    %c0_12 = arith.constant 0 : index
    %19 = vector.load %arg8[%c0_11, %c0_12] : memref<16x128xf32, #tpu.memory_space<vmem>>, vector<16x128xf32>
    tpu.vector_store %arg8[%c0_11, %c0_12], %18 {strides = array<i32>} : memref<16x128xf32, #tpu.memory_space<vmem>>, vector<16x128xf32>,
    %c0_i32_13 = arith.constant 0 : i32
    %20 = arith.cmpi eq, %arg2, %c0_i32_13 : i32
    %21 = arith.extui %20 : i1 to i32
    %c0_i32_14 = arith.constant 0 : i32
    %22 = arith.cmpi ne, %21, %c0_i32_14 : i32
    scf.if %22 {
      %c0_15 = arith.constant 0 : index
      %c0_16 = arith.constant 0 : index
      %23 = vector.load %arg8[%c0_15, %c0_16] : memref<16x128xf32, #tpu.memory_space<vmem>>, vector<16x128xf32>
      %c0_17 = arith.constant 0 : index
      %c0_18 = arith.constant 0 : index
      %24 = vector.load %arg6[%c0_17, %c0_18] : memref<16x128xf32, #tpu.memory_space<vmem>>, vector<16x128xf32>
      %25 = arith.addf %23, %24 : vector<16x128xf32>
      %c0_19 = arith.constant 0 : index
      %c0_20 = arith.constant 0 : index
      %26 = vector.load %arg7[%c0_19, %c0_20] : memref<16x128xf32, #tpu.memory_space<vmem>>, vector<16x128xf32>
      tpu.vector_store %arg7[%c0_19, %c0_20], %25 {strides = array<i32>} : memref<16x128xf32, #tpu.memory_space<vmem>>, vector<16x128xf32>,
    } else {
    }
    return
  }
  func.func @transform_0(%arg0: i32, %arg1: i32, %arg2: i32) -> (i32, i32) {
    %c0_i32 = arith.constant 0 : i32
    return %arg0, %arg2 : i32, i32
  }
  func.func @transform_1(%arg0: i32, %arg1: i32, %arg2: i32) -> (i32, i32) {
    %c1_i32 = arith.constant 1 : i32
    %0 = arith.addi %arg2, %c1_i32 : i32
    %c0_i32 = arith.constant 0 : i32
    return %arg0, %0 : i32, i32
  }
  func.func @transform_2(%arg0: i32, %arg1: i32, %arg2: i32) -> (i32, i32) {
    %c0_i32 = arith.constant 0 : i32
    return %arg2, %arg1 : i32, i32
  }
  func.func @transform_3(%arg0: i32, %arg1: i32, %arg2: i32) -> (i32, i32) {
    %c0_i32 = arith.constant 0 : i32
    return %arg0, %arg1 : i32, i32
  }
  func.func @transform_4(%arg0: i32, %arg1: i32, %arg2: i32) -> (i32, i32) {
    %c0_i32 = arith.constant 0 : i32
    return %arg0, %arg1 : i32, i32
  }
}

</mosaic_0001>

<bundles_post_ra>
// kernel: run.12
= control target key start
LH: loop header
LB: loop body
LE: loop exit
PB: predicated region body
PF: predicated region fallthrough
CT: control target
= control target key end

     0   :  { %v204_v0 = vmov 0.0   ;;  %vm205_vm0 = vmmov 0   ;;  %s265_s1 = inlined_call_operand.vmem [shape: bf16[128,128], index: 1, kind: input, shape index: {}]   ;;  %s266_s0 = inlined_call_operand.vmem [shape: bf16[16,128], index: 0, kind: input, shape index: {}]   ;;  %s267_s2 = inlined_call_operand.vmem [shape: f32[16,128], index: 2, kind: input, shape index: {}]   ;;  %s268_s3 = inlined_call_operand.vmem [shape: f32[16,128], index: 3, kind: output, shape index: {}]  }
   0x1   :  { %173 = vmatprep.subr.bf16.mxu0 %v204_v0  ;;  %v195_v1 = vld [vmem:[%s265_s1 + $0x38] sm:$0xff]   ;;  %189 = vmatprep.mubr.msk.bf16.mxu0 %vm205_vm0, %v204_v0  ;;  %v196_v2 = vld [vmem:[%s265_s1 + $0x30] sm:$0xff]   ;;  %v197_v3 = vld [vmem:[%s265_s1 + $0x28] sm:$0xff]  }
   0x2   :  { %174 = vmatpush3.bf16.msra.mxu0 %v195_v1  ;;  %v198_v4 = vld [vmem:[%s265_s1 + $0x20] sm:$0xff]   ;;  %v199_v5 = vld [vmem:[%s265_s1 + $0x18] sm:$0xff]   ;;  %v200_v6 = vld [vmem:[%s265_s1 + $0x10] sm:$0xff]  }
   0x3   :  { %175 = vmatprep.subr.bf16.mxu0 %v204_v0  ;;  %v201_v7 = vld [vmem:[%s265_s1 + $0x8] sm:$0xff]   ;;  %v202_v8 = vld [vmem:[%s265_s1] sm:$0xff]  }
   0x4   :  { %v203_v9 = vld [vmem:[%s266_s0] sm:$0xff]   ;;  %v146_v14 = vld [vmem:[%s267_s2 + $0x8] sm:$0xff] }
   0x5   :  { %v145_v10 = vld [vmem:[%s267_s2] sm:$0xff] }
   0x6   :  { %176 = vmatpush3.bf16.msra.mxu0 %v196_v2 }
   0x7   :  { %177 = vmatprep.subr.bf16.mxu0 %v204_v0 }
   0xa   :  { %178 = vmatpush3.bf16.msra.mxu0 %v197_v3 }
   0xb   :  { %179 = vmatprep.subr.bf16.mxu0 %v204_v0 }
   0xe   :  { %180 = vmatpush3.bf16.msra.mxu0 %v198_v4 }
   0xf   :  { %181 = vmatprep.subr.bf16.mxu0 %v204_v0 }
  0x12   :  { %182 = vmatpush3.bf16.msra.mxu0 %v199_v5 }
  0x13   :  { %183 = vmatprep.subr.bf16.mxu0 %v204_v0 }
  0x16   :  { %184 = vmatpush3.bf16.msra.mxu0 %v200_v6 }
  0x17   :  { %185 = vmatprep.subr.bf16.mxu0 %v204_v0 }
  0x1a   :  { %186 = vmatpush3.bf16.msra.mxu0 %v201_v7 }
  0x1b   :  { %187 = vmatprep.subr.bf16.mxu0 %v204_v0 }
  0x1e   :  { %188 = vmatpush3.bf16.msra.mxu0 %v202_v8 }
  0x21   :  { %190 = vmatmul.mubr.bf16.vlgmr.msra.gmra.mxu0 %v203_v9 }
  0xe1   :  { %v129_v11 = vpop.f32.mrf.mxu0 }
  0xe2   :  { %v147_v12 = vadd.f32 %v145_v10, %v129_v11 }
  0xe3   :  { %v191_v13 = vpop.f32.mrf.mxu0 }
  0xe4   :  { %149 = vst [vmem:[%s268_s3] sm:$0xff] %v147_v12 }
  0xe5   :  { %v132_v15 = vpop.f32.mrf.mxu0 }
  0xe6   :  { %v148_v16 = vadd.f32 %v146_v14, %v132_v15 }
  0xe7   :  { %v192_v17 = vpop.f32.mrf.mxu0 }
  0xe8   :  { %150 = vst [vmem:[%s268_s3 + $0x8] sm:$0xff] %v148_v16 }

// kernel: run.10
= control target key start
LH: loop header
LB: loop body
LE: loop exit
PB: predicated region body
PF: predicated region fallthrough
CT: control target
= control target key end

     0   :  { %8 = vsyncpa [#allocation4], 0  ;;  %s883_s0 = inlined_call_operand.vmem [shape: f32[16,128], index: 0, kind: input, shape index: {}]   ;;  %s884_s1 = inlined_call_operand.vmem [shape: f32[1,128], index: 1, kind: input, shape index: {}]   ;;  %s885_s2 = inlined_call_operand.hbm [shape: bf16[128,384], index: 2, kind: input, shape index: {}]   ;;  %s886_s3 = inlined_call_operand.vmem [shape: f32[16,384], index: 3, kind: output, shape index: {}]  }
   0x1   :  { %10 = vsyncpa [#allocation4 + $0x1], 0  ;;  %s754_s12 = smov 0   ;;  %s756_s13 = smov 0  }
   0x2   :  { %s758_s14 = smov 0   ;;  %s760_s15 = smov 0  }
   0x3   :  { %s762_s16 = smov 0   ;;  %s764_s17 = smov 0  }
   0x4 LB: > { %s512_s18 = sadd.s32 4294967295, %s726_s17   ;;  %s25_s19 = sadd.s32 1, %s722_s16  ;;  %s726_s17 = sphi %s764_s17, %s16_s17   ;;  %s722_s16 = sphi %s762_s16, %s895_s16   ;;  %s718_s15 = sphi %s760_s15, %s894_s15   ;;  %s714_s14 = sphi %s758_s14, %s893_s14   ;;  %s710_s13 = sphi %s756_s13, %s892_s13   ;;  %s706_s12 = sphi %s754_s12, %s891_s12  }
   0x5   : > { %p26_p0 = scmp.ge.s32.totalorder %s25_s19, 3  ;;  %s82_s20 = sadd.s32 1, %s714_s14 }
   0x6   : > { %p89_p1 = scmp.ne.s32.totalorder %s714_s14, %s710_s13  ;;  %p90_p2 = scmp.eq.s32.totalorder %s726_s17, 0 }
   0x7   : > { %s897_s19 = smov (%p26_p0, %s25_s19), 0  ;;  %p95_p4 = scmp.ne.s32.totalorder %s710_s13, %s706_s12 }
   0x8   : > { %p790_p3 = por %p90_p2, %p89_p1  ;;  %s79_s22 = ssub.s32 %s722_s16, %s897_s19 }
   0x9   : > { %p96_p5 = scmp.eq.s32.totalorder %s512_s18, 0  ;;  %p80_p6 = scmp.eq.s32.totalorder %s79_s22, 0 }
   0xa   : > { %p121_p7 = scmp.eq.s32.totalorder %s512_s18, 2  ;;  %p581_p10 = scmp.lt.s32.totalorder %s726_s17, 3 }
   0xb   : > { %p797_p8 = por %p96_p5, %p95_p4  ;;  %s159_s26 = sand.u32 1, %s714_s14  }
   0xc   : > { %s802_s24 = scalar_select %p80_p6, %s714_s14, %s82_s20  }
   0xd   : > { %p804_p9 = por %p121_p7, %p89_p1  ;;  %s518_s27 = sshll.u32 %s722_s16, 6 }
   0xe   : > { %s517_s28 = sshll.u32 %s159_s26, 6  ;;  %s168_s4 = scalar_lea.hbm %s885_s2, %s518_s27 }
   0xf   : > { %s163_s5 = scalar_lea.vmem [#allocation3], %s517_s28  ;;  %p816_p11 = pnand %p581_p10, %p790_p3 }
  0x10   : > { %s169_s6 = sshll.u32 %s163_s5, 4  ;;  %p519_p12 = scmp.ge.s32.totalorder %s726_s17, 1  ;;  %s170_s6 = int_to_ptr.vmem [resolvable:$true] %s169_s6 }
  0x11   : > { %s160_s8 = scalar_lea.sflag [#allocation4], %s159_s26  ;;  %p650_p13 = pneg %p816_p11 }
  0x12   : > { %s661_s9 = scalar_lea.vmem %s170_s6, 1024  ;;  %s728_s10 = smov [#allocation3]  }
  0x13   : > { %p662_p0 = scmp.ne.s32.totalorder %s170_s6, %s661_s9  ;;  %s666_s11 = sshll.u32 %s728_s10, 4  ;;  %s667_s11 = int_to_ptr.vmem [resolvable:$false] %s666_s11 }
  0x14   : > { %s668_s12 = scalar_lea.vmem %s667_s11, 2048  ;;  %p669_p4 = scmp.lt.s32.totalorder %s170_s6, %s667_s11 }
  0x15   : > { %p664_p1 = pnand %p662_p0, %p650_p13  ;;  %p670_p5 = scmp.lt.s32.totalorder %s668_s12, %s661_s9 }
  0x17   : > { %p665_p2 = pneg %p664_p1  ;;  %p671_p3 = por %p670_p5, %p669_p4 }
  0x19   : > { %p672_p6 = pnand %p671_p3, %p665_p2 }
  0x1b   : > { %675 = shalt.err (!%p672_p6)
}
  0x1c   : > { %s729_s18 = smov 192   ;;  %s730_s20 = smov 64  }
  0x1d   : > { %s731_s21 = smov 4   ;;  %p177_p7 = scmp.lt.s32.totalorder %s726_s17, 4 }
  0x1e   : > { %580 = dma.hbm_to_vmem [thread:$0]  (!%p816_p11), %s168_s4, 1024, %s170_s6, %s160_s8, %s729_s18, %s730_s20, %s731_s21  }
  0x1f   : > { %p178_p10 = pnand %p519_p12, %p177_p7 }
  0x20   : > { %s183_s22 = sand.u32 (!%p178_p10), 1, %s710_s13  }
  0x21   : > { %181 = sbr.rel (%p178_p10) target bundleno = 455 (0x1c7), region = 32  ;;  %s520_s26 = sshll.u32 (!%p178_p10), %s183_s22, 6 }
  0x22   : > { %s184_s27 = scalar_lea.sflag (!%p178_p10), [#allocation4], %s183_s22  ;;  %s829_s28 = scalar_lea.vmem (!%p178_p10), [#allocation3], %s520_s26 }
  0x26   : > { %701 = dma.done.wait (%p797_p8), %s184_s27, 1024  }
  0x27   : > { %703 = vsyncadd (%p797_p8), %s184_s27, 4294966272  ;;  %s521_s29 = sshll.u32 %s183_s22, 4  ;;  %p522_p11 = scmp.ne.s32.totalorder %s718_s15, 0 }
  0x28   : > { %s835_s30 = scalar_lea.vmem [#allocation5], %s521_s29 }
  0x29   : > { %225 = sbr.rel (%p522_p11) target bundleno = 216 (0xd8), region = 40 }
  0x2e   : > { %v226_v0 = vld [vmem:[%s883_s0] sm:$0xff]  ;;  %v227_v1 = vld [vmem:[%s883_s0 + $0x8] sm:$0xff] }
  0x2f   : > { %v228_v2 = vmul.f32 %v226_v0, %v226_v0  ;;  %v229_v3 = vmul.f32 %v227_v1, %v227_v1  ;;  %v523_v13 = vld [vmem:[%s884_s1] ss:$0 sm:$0xff] }
  0x31   : > { %230 = vadd.xlane.f32.xlu0 %v228_v2 }
  0x35   : > { %232 = vadd.xlane.f32.xlu0 %v229_v3 }
  0xba   : > { %v231_v4 = vpop.xlane.xlu0 %230 }
  0xbb   : > { %v234_v5 = vmul.f32 0.03125, %v231_v4 }
  0xbd   : > { %v236_v6 = vadd.f32 1e-08, %v234_v5 }
  0xbe   : > { %v233_v7 = vpop.xlane.xlu0 %232 }
  0xbf   : > { %635 = vrsqrt.f32 %v236_v6  ;;  %v235_v8 = vmul.f32 0.03125, %v233_v7 }
  0xc1   : > { %v237_v9 = vadd.f32 1e-08, %v235_v8 }
  0xc3   : > { %637 = vrsqrt.f32 %v237_v9 }
  0xcc   : > { %v636_v10 = vpop.eup %635 }
  0xcd   : > { %v240_v11 = vmul.f32 %v636_v10, %v226_v0 }
  0xcf   : > { %v249_v15 = vmul.f32 %v523_v13, %v240_v11 }
  0xd0   : > { %v638_v12 = vpop.eup %637 }
  0xd1   : > { %v241_v14 = vmul.f32 %v638_v12, %v227_v1 }
  0xd3   : > { %v250_v16 = vmul.f32 %v523_v13, %v241_v14 }
  0xd5   : > { %v544_v17 = vpack.c.bf16 %v250_v16, %v249_v15 }
  0xd7   : > { %545 = vst [vmem:[#allocation2] sm:$0xff] %v544_v17  }
  0xd8 PF: > { %v639_v18 = vld [vmem:[%s829_s28 + $0x38] sm:$0xff]   ;;  %v732_v19 = vmov 0.0   ;;  %v640_v20 = vld [vmem:[%s829_s28 + $0x30] sm:$0xff]   ;;  %vm733_vm0 = vmmov 0   ;;  %v641_v21 = vld [vmem:[%s829_s28 + $0x28] sm:$0xff]   ;;  %s536_s9 = sshll.u32 (%p804_p9), %s718_s15, 3 }
  0xd9   : > { %555 = vmatprep.subr.bf16.mxu0 %v732_v19  ;;  %571 = vmatprep.mubr.msk.bf16.mxu0 %vm733_vm0, %v732_v19  ;;  %v642_v22 = vld [vmem:[%s829_s28 + $0x20] sm:$0xff]   ;;  %v643_v23 = vld [vmem:[%s829_s28 + $0x18] sm:$0xff]   ;;  %v644_v24 = vld [vmem:[%s829_s28 + $0x10] sm:$0xff]   ;;  %s387_s12 = scalar_lea.vmem (%p804_p9), %s886_s3, %s536_s9 }
  0xda   : > { %556 = vmatpush3.bf16.msra.mxu0 %v639_v18  ;;  %v645_v25 = vld [vmem:[%s829_s28 + $0x8] sm:$0xff]   ;;  %v646_v26 = vld [vmem:[%s829_s28] sm:$0xff]  }
  0xdb   : > { %557 = vmatprep.subr.bf16.mxu0 %v732_v19 }
  0xde   : > { %558 = vmatpush3.bf16.msra.mxu0 %v640_v20  ;;  %v647_v27 = vld [vmem:[#allocation2] sm:$0xff]  }
  0xdf   : > { %559 = vmatprep.subr.bf16.mxu0 %v732_v19 }
  0xe2   : > { %560 = vmatpush3.bf16.msra.mxu0 %v641_v21 }
  0xe3   : > { %561 = vmatprep.subr.bf16.mxu0 %v732_v19 }
  0xe6   : > { %562 = vmatpush3.bf16.msra.mxu0 %v642_v22 }
  0xe7   : > { %563 = vmatprep.subr.bf16.mxu0 %v732_v19 }
  0xea   : > { %564 = vmatpush3.bf16.msra.mxu0 %v643_v23 }
  0xeb   : > { %565 = vmatprep.subr.bf16.mxu0 %v732_v19 }
  0xee   : > { %566 = vmatpush3.bf16.msra.mxu0 %v644_v24 }
  0xef   : > { %567 = vmatprep.subr.bf16.mxu0 %v732_v19 }
  0xf2   : > { %568 = vmatpush3.bf16.msra.mxu0 %v645_v25 }
  0xf3   : > { %569 = vmatprep.subr.bf16.mxu0 %v732_v19 }
  0xf6   : > { %570 = vmatpush3.bf16.msra.mxu0 %v646_v26 }
  0xf9   : > { %572 = vmatmul.mubr.bf16.vlgmr.msra.gmra.mxu0 %v647_v27 }
 0x1b9   : > { %v367_v28 = vpop.f32.mrf.mxu0 }
 0x1ba   : > { %374 = vst [vmem:[%s835_s30] sm:$0xff] %v367_v28 }
 0x1bb   : > { %v573_v29 = vpop.f32.mrf.mxu0  ;;  %382 = sbr.rel (!%p804_p9) target bundleno = 455 (0x1c7), region = 44 }
 0x1bd   : > { %v370_v30 = vpop.f32.mrf.mxu0 }
 0x1be   : > { %375 = vst [vmem:[%s835_s30 + $0x8] sm:$0xff] %v370_v30 }
 0x1bf   : > { %v574_v31 = vpop.f32.mrf.mxu0 }
 0x1c1   : > { %v418_v32 = vld [vmem:[%s835_s30] sm:$0xff] }
 0x1c2   : > { %419 = vst [vmem:[%s387_s12] sm:$0xff] %v418_v32 }
 0x1c5   : > { %v420_v33 = vld [vmem:[%s835_s30 + $0x8] sm:$0xff] }
 0x1c6   : > { %421 = vst [vmem:[%s387_s12 + $0x18] sm:$0xff] %v420_v33 }
 0x1c7 PF: > { %s16_s17 = sadd.s32 1, %s726_s17   ;;  %s891_s12 = smov %s710_s13 }
 0x1c8   : > { %p13_p8 = scmp.ge.s32.totalorder %s16_s17, 5   ;;  %s892_s13 = smov %s714_s14 }
 0x1c9   : > { %s893_s14 = smov %s802_s24  ;;  %s894_s15 = smov %s722_s16 }
 0x1ca   : > { %s895_s16 = smov %s897_s19  ;;  %15 = sbr.rel (!%p13_p8) target bundleno = 4 (0x4), region = 117 }
 0x1cf   :  { %437 = vsyncpa [#allocation4], 1 }
 0x1d0   :  { %439 = vsyncpa [#allocation4 + $0x1], 1 }

// kernel: run.13
= control target key start
LH: loop header
LB: loop body
LE: loop exit
PB: predicated region body
PF: predicated region fallthrough
CT: control target
= control target key end

     0   :  { %v266_v20 = vmov 0   ;;  %s356_s0 = inlined_call_operand.vmem [shape: f32[16,128], index: 0, kind: input, shape index: {}]   ;;  %s357_s2 = inlined_call_operand.vmem [shape: bf16[128,256], index: 2, kind: input, shape index: {}]   ;;  %s358_s1 = inlined_call_operand.vmem [shape: f32[1,128], index: 1, kind: input, shape index: {}]   ;;  %s359_s3 = inlined_call_operand.vmem [shape: f32[16,256], index: 3, kind: output, shape index: {}]  }
   0x1   :  { %v19_v0 = vld [vmem:[%s356_s0] sm:$0xff]  ;;  %v20_v1 = vld [vmem:[%s356_s0 + $0x8] sm:$0xff]  ;;  %v237_v4 = vld [vmem:[%s357_s2 + $0x74] ss:$8 sps:$4 sm:$0xff]   ;;  %190 = vmatprep.mubr.bf16.mxu0 %v266_v20 }
   0x2   :  { %v21_v2 = vmul.f32 %v19_v0, %v19_v0  ;;  %v22_v3 = vmul.f32 %v20_v1, %v20_v1  ;;  %v239_v5 = vld [vmem:[%s357_s2 + $0x70] ss:$8 sps:$4 sm:$0xff]   ;;  %158 = vmatprep.subr.bf16.mxu0 %v237_v4  ;;  %v240_v6 = vld [vmem:[%s357_s2 + $0x64] ss:$8 sps:$4 sm:$0xff]   ;;  %v242_v7 = vld [vmem:[%s357_s2 + $0x60] ss:$8 sps:$4 sm:$0xff]  }
   0x3   :  { %159 = vmatpush1.bf16.msra.mxu0 %v239_v5  ;;  %v243_v8 = vld [vmem:[%s357_s2 + $0x54] ss:$8 sps:$4 sm:$0xff]   ;;  %v245_v9 = vld [vmem:[%s357_s2 + $0x50] ss:$8 sps:$4 sm:$0xff]   ;;  %v246_v10 = vld [vmem:[%s357_s2 + $0x44] ss:$8 sps:$4 sm:$0xff]  }
   0x4   :  { %23 = vadd.xlane.f32.xlu0 %v21_v2  ;;  %160 = vmatprep.subr.bf16.mxu0 %v240_v6  ;;  %v248_v11 = vld [vmem:[%s357_s2 + $0x40] ss:$8 sps:$4 sm:$0xff]   ;;  %v249_v12 = vld [vmem:[%s357_s2 + $0x34] ss:$8 sps:$4 sm:$0xff]   ;;  %v251_v13 = vld [vmem:[%s357_s2 + $0x30] ss:$8 sps:$4 sm:$0xff]  }
   0x5   :  { %v252_v14 = vld [vmem:[%s357_s2 + $0x24] ss:$8 sps:$4 sm:$0xff]   ;;  %v254_v15 = vld [vmem:[%s357_s2 + $0x20] ss:$8 sps:$4 sm:$0xff]   ;;  %v255_v16 = vld [vmem:[%s357_s2 + $0x14] ss:$8 sps:$4 sm:$0xff]  }
   0x6   :  { %v257_v17 = vld [vmem:[%s357_s2 + $0x10] ss:$8 sps:$4 sm:$0xff]   ;;  %v258_v18 = vld [vmem:[%s357_s2 + $0x4] ss:$8 sps:$4 sm:$0xff]   ;;  %v260_v19 = vld [vmem:[%s357_s2] ss:$8 sps:$4 sm:$0xff]  }
   0x7   :  { %161 = vmatpush1.bf16.msra.mxu0 %v242_v7  ;;  %v209_v30 = vld [vmem:[%s358_s1] ss:$0 sm:$0xff] }
   0x8   :  { %25 = vadd.xlane.f32.xlu0 %v22_v3  ;;  %162 = vmatprep.subr.bf16.mxu0 %v243_v8 }
   0xb   :  { %163 = vmatpush1.bf16.msra.mxu0 %v245_v9 }
   0xc   :  { %164 = vmatprep.subr.bf16.mxu0 %v246_v10 }
   0xf   :  { %165 = vmatpush1.bf16.msra.mxu0 %v248_v11 }
  0x10   :  { %166 = vmatprep.subr.bf16.mxu0 %v249_v12 }
  0x13   :  { %167 = vmatpush1.bf16.msra.mxu0 %v251_v13 }
  0x14   :  { %168 = vmatprep.subr.bf16.mxu0 %v252_v14 }
  0x17   :  { %169 = vmatpush1.bf16.msra.mxu0 %v254_v15 }
  0x18   :  { %170 = vmatprep.subr.bf16.mxu0 %v255_v16 }
  0x1b   :  { %171 = vmatpush1.bf16.msra.mxu0 %v257_v17 }
  0x1c   :  { %172 = vmatprep.subr.bf16.mxu0 %v258_v18 }
  0x1f   :  { %173 = vmatpush1.bf16.msra.mxu0 %v260_v19 }
  0x8d   :  { %v24_v21 = vpop.xlane.xlu0 %23 }
  0x8e   :  { %v27_v22 = vmul.f32 0.03125, %v24_v21 }
  0x90   :  { %v29_v23 = vadd.f32 1e-08, %v27_v22 }
  0x91   :  { %v26_v24 = vpop.xlane.xlu0 %25 }
  0x92   :  { %262 = vrsqrt.f32 %v29_v23  ;;  %v28_v25 = vmul.f32 0.03125, %v26_v24 }
  0x94   :  { %v30_v26 = vadd.f32 1e-08, %v28_v25 }
  0x96   :  { %264 = vrsqrt.f32 %v30_v26 }
  0x9f   :  { %v263_v27 = vpop.eup %262 }
  0xa0   :  { %v33_v28 = vmul.f32 %v263_v27, %v19_v0 }
  0xa2   :  { %v42_v32 = vmul.f32 %v209_v30, %v33_v28 }
  0xa3   :  { %v265_v29 = vpop.eup %264 }
  0xa4   :  { %v34_v31 = vmul.f32 %v265_v29, %v20_v1 }
  0xa6   :  { %v43_v33 = vmul.f32 %v209_v30, %v34_v31 }
  0xa8   :  { %v234_v34 = vpack.c.bf16 %v43_v33, %v42_v32 }
  0xaa   :  { %235 = vst [vmem:[#allocation2] sm:$0xff] %v234_v34  }
  0xb1   :  { %v261_v35 = vld [vmem:[#allocation2] sm:$0xff]  }
  0xb2   :  { %191 = vmatmul.mubr.bf16.vlgmr.msra.gmra.mxu0 %v261_v35 }
 0x172   :  { %v192_v36 = vpop.f32.mrf.mxu0 }
 0x173   :  { %201 = vst [vmem:[%s359_s3] sm:$0xff] %v192_v36 }
 0x174   :  { %v194_v37 = vpop.f32.mrf.mxu0 }
 0x175   :  { %202 = vst [vmem:[%s359_s3 + $0x8] sm:$0xff] %v194_v37 }
 0x176   :  { %v196_v38 = vpop.f32.mrf.mxu0 }
 0x177   :  { %203 = vst [vmem:[%s359_s3 + $0x10] sm:$0xff] %v196_v38 }
 0x178   :  { %v198_v39 = vpop.f32.mrf.mxu0 }
 0x179   :  { %204 = vst [vmem:[%s359_s3 + $0x18] sm:$0xff] %v198_v39 }

// kernel: run.14
= control target key start
LH: loop header
LB: loop body
LE: loop exit
PB: predicated region body
PF: predicated region fallthrough
CT: control target
= control target key end

     0   :  { %v319_v1 = vmov 0.0   ;;  %vm320_vm0 = vmmov 0   ;;  %s394_s0 = inlined_call_operand.vmem [shape: f32[16,256], index: 0, kind: input, shape index: {}, may-alias: {0,1}]   ;;  %s395_s1 = inlined_call_operand.vmem [shape: f32[16,256], index: 1, kind: input, shape index: {}, may-alias: {0,1}]   ;;  %s396_s2 = inlined_call_operand.vmem [shape: bf16[128,128], index: 2, kind: input, shape index: {}]   ;;  %s397_s3 = inlined_call_operand.vmem [shape: f32[16,128], index: 3, kind: input, shape index: {}]   ;;  %s398_s4 = inlined_call_operand.vmem [shape: f32[16,128], index: 4, kind: output, shape index: {}]  }
   0x1   :  { %v303_v0 = vld [vmem:[%s396_s2 + $0x38] sm:$0xff]   ;;  %281 = vmatprep.subr.bf16.mxu0 %v319_v1  ;;  %v304_v2 = vld [vmem:[%s396_s2 + $0x30] sm:$0xff]   ;;  %297 = vmatprep.mubr.msk.bf16.mxu0 %vm320_vm0, %v319_v1  ;;  %v305_v3 = vld [vmem:[%s396_s2 + $0x28] sm:$0xff]  }
   0x2   :  { %282 = vmatpush3.bf16.msra.mxu0 %v303_v0  ;;  %v41_v4 = vld [vmem:[%s394_s0] sm:$0xff]  ;;  %v43_v5 = vld [vmem:[%s394_s0 + $0x10] sm:$0xff]  ;;  %v307_v11 = vld [vmem:[%s396_s2 + $0x18] sm:$0xff]  }
   0x3   :  { %283 = vmatprep.subr.bf16.mxu0 %v319_v1  ;;  %v110_v6 = vsub.f32 0.0, %v41_v4  ;;  %v111_v7 = vsub.f32 0.0, %v43_v5  ;;  %v306_v8 = vld [vmem:[%s396_s2 + $0x20] sm:$0xff]   ;;  %v308_v12 = vld [vmem:[%s396_s2 + $0x10] sm:$0xff]   ;;  %v309_v13 = vld [vmem:[%s396_s2 + $0x8] sm:$0xff]  }
   0x4   :  { %v310_v15 = vld [vmem:[%s396_s2] sm:$0xff]   ;;  %v262_v20 = vld [vmem:[%s395_s1 + $0x8] sm:$0xff]  ;;  %v263_v22 = vld [vmem:[%s395_s1 + $0x18] sm:$0xff] }
   0x5   :  { %v112_v9 = vmul.f32 1.442695, %v110_v6  ;;  %v114_v10 = vmul.f32 1.442695, %v111_v7  ;;  %v243_v28 = vld [vmem:[%s397_s3] sm:$0xff]  ;;  %v244_v32 = vld [vmem:[%s397_s3 + $0x8] sm:$0xff] }
   0x6   :  { %284 = vmatpush3.bf16.msra.mxu0 %v304_v2 }
   0x7   :  { %285 = vmatprep.subr.bf16.mxu0 %v319_v1  ;;  %311 = vpow2.f32 %v112_v9 }
   0x8   :  { %313 = vpow2.f32 %v114_v10 }
   0xa   :  { %286 = vmatpush3.bf16.msra.mxu0 %v305_v3 }
   0xb   :  { %287 = vmatprep.subr.bf16.mxu0 %v319_v1 }
   0xe   :  { %288 = vmatpush3.bf16.msra.mxu0 %v306_v8 }
   0xf   :  { %289 = vmatprep.subr.bf16.mxu0 %v319_v1 }
  0x12   :  { %290 = vmatpush3.bf16.msra.mxu0 %v307_v11 }
  0x13   :  { %291 = vmatprep.subr.bf16.mxu0 %v319_v1 }
  0x14   :  { %v312_v14 = vpop.eup %311 }
  0x15   :  { %v314_v16 = vpop.eup %313  ;;  %v116_v17 = vadd.f32 1.0, %v312_v14 }
  0x16   :  { %292 = vmatpush3.bf16.msra.mxu0 %v308_v12  ;;  %v117_v18 = vadd.f32 1.0, %v314_v16 }
  0x17   :  { %293 = vmatprep.subr.bf16.mxu0 %v319_v1  ;;  %315 = vrcp.f32 %v116_v17 }
  0x18   :  { %317 = vrcp.f32 %v117_v18 }
  0x1a   :  { %294 = vmatpush3.bf16.msra.mxu0 %v309_v13 }
  0x1b   :  { %295 = vmatprep.subr.bf16.mxu0 %v319_v1 }
  0x1e   :  { %296 = vmatpush3.bf16.msra.mxu0 %v310_v15 }
  0x24   :  { %v316_v19 = vpop.eup %315 }
  0x25   :  { %v318_v21 = vpop.eup %317  ;;  %v122_v23 = vmul.f32 %v316_v19, %v41_v4 }
  0x26   :  { %v123_v24 = vmul.f32 %v318_v21, %v43_v5 }
  0x27   :  { %v124_v25 = vmul.f32 %v262_v20, %v122_v23 }
  0x28   :  { %v125_v26 = vmul.f32 %v263_v22, %v123_v24 }
  0x2a   :  { %v128_v27 = vpack.c.bf16 %v125_v26, %v124_v25 }
  0x2c   :  { %298 = vmatmul.mubr.bf16.vlgmr.msra.gmra.mxu0 %v128_v27 }
  0xec   :  { %v227_v29 = vpop.f32.mrf.mxu0 }
  0xed   :  { %v245_v30 = vadd.f32 %v243_v28, %v227_v29 }
  0xee   :  { %v299_v31 = vpop.f32.mrf.mxu0 }
  0xef   :  { %247 = vst [vmem:[%s398_s4] sm:$0xff] %v245_v30 }
  0xf0   :  { %v230_v33 = vpop.f32.mrf.mxu0 }
  0xf1   :  { %v246_v34 = vadd.f32 %v244_v32, %v230_v33 }
  0xf2   :  { %v300_v35 = vpop.f32.mrf.mxu0 }
  0xf3   :  { %248 = vst [vmem:[%s398_s4 + $0x8] sm:$0xff] %v246_v34 }

// kernel: run.11
= control target key start
LH: loop header
LB: loop body
LE: loop exit
PB: predicated region body
PF: predicated region fallthrough
CT: control target
= control target key end

     0   :  { %s1696_s24 = smov 0   ;;  %s1698_s25 = smov 0   ;;  %s1955_s0 = inlined_call_operand.vmem [shape: f32[2,8,384], index: 0, kind: input, shape index: {}, may-alias: {0,1,2}]   ;;  %s1956_s1 = inlined_call_operand.vmem [shape: f32[2,8,384], index: 1, kind: input, shape index: {}, may-alias: {0,1,2}]   ;;  %s1957_s2 = inlined_call_operand.vmem [shape: f32[2,8,384], index: 2, kind: input, shape index: {}, may-alias: {0,1,2}]   ;;  %s1958_s3 = inlined_call_operand.vmem [shape: f32[8,8], index: 3, kind: input, shape index: {}, may-alias: {3,5}]   ;;  %s1959_s4 = inlined_call_operand.vmem [shape: f32[8,8], index: 4, kind: input, shape index: {}, may-alias: {4,6}]   ;;  %s1960_s5 = inlined_call_operand.vmem [shape: f32[8,8], index: 5, kind: input, shape index: {}, may-alias: {3,5}]   ;;  %s1961_s6 = inlined_call_operand.vmem [shape: f32[8,8], index: 6, kind: input, shape index: {}, may-alias: {4,6}]   ;;  %s1962_s7 = inlined_call_operand.vmem [shape: bf16[2,8,128], index: 7, kind: output, shape index: {}]  }
   0x1   :  { %s1700_s26 = smov 0  }
   0x2 LB: > { %s36_s27 = sadd.s32 1, %s1635_s25  ;;  %p1470_p0 = scmp.ge.s32.totalorder %s1639_s26, 1  ;;  %s1639_s26 = sphi %s1700_s26, %s17_s26   ;;  %s1635_s25 = sphi %s1698_s25, %s1966_s25   ;;  %s1631_s24 = sphi %s1696_s24, %s1965_s24  }
   0x3   : > { %p38_p1 = scmp.ge.s32.totalorder %s36_s27, 2  ;;  %p334_p2 = scmp.lt.s32.totalorder %s1639_s26, 3 }
   0x5   : > { %s1968_s27 = smov (%p38_p1, %s36_s27), 0  ;;  %p335_p3 = pnand %p1470_p0, %p334_p2 }
   0x6   : > { %p408_p4 = scmp.lt.s32.totalorder (!%p335_p3), %s1631_s24, 1  ;;  %s1642_s12 = smov (!%p335_p3), 124  }
   0x7   : > { %338 = sbr.rel (%p335_p3) target bundleno = 1547 (0x60b), region = 48  ;;  %s1644_s13 = smov (!%p335_p3), 4  }
   0x8   : > { %s1645_s14 = smov (!%p335_p3), 116   ;;  %s1646_s15 = smov (!%p335_p3), 108  }
   0x9   : > { %s1647_s16 = smov (!%p335_p3), 100   ;;  %s1648_s30 = smov (!%p335_p3), 8  }
   0xa   : > { %s1651_s9 = smov (!%p335_p3), 24   ;;  %s1653_s10 = smov (!%p335_p3), 112  }
   0xc   : > { %s1970_s24 = smov (!%p408_p4, %s1631_s24), 1  ;;  %vm474_vm0 = vcmask 64512   ;;  %v1641_v4 = vmov 0.0   ;;  %vm1643_vm1 = vmmov 0   ;;  %v1758_v7 = vld [vmem:[%s1958_s3] sm:$0xff]  ;;  %vm492_vm2 = vcmask 31744  }
   0xd   : > { %s1717_s28 = smul.u32 24, %s1970_s24  ;;  %1503 = vmatprep.subr.bf16.mxu0 %v1641_v4  ;;  %475 = vst.msk [vmem:[#allocation5] sm:$0xff] %vm474_vm0, %v1641_v4  ;;  %476 = vst.msk [vmem:[#allocation5 + $0x8] sm:$0xff] %vm474_vm0, %v1641_v4  ;;  %1509 = vmatprep.subr.bf16.mxu1 %v1641_v4  ;;  %v1763_v8 = vld [vmem:[%s1960_s5] sm:$0xff]  ;;  %vm465_vm3 = vcmask 7168   ;;  %v576_v51 = vlaneseq  ;;  %v1652_v62 = vmov 0  }
   0xe   : > { %477 = vst.msk [vmem:[#allocation5 + $0x10] sm:$0xff] %vm474_vm0, %v1641_v4  ;;  %478 = vst.msk [vmem:[#allocation5 + $0x18] sm:$0xff] %vm474_vm0, %v1641_v4  ;;  %1505 = vmatprep.mubr.msk.bf16.mxu0 %vm1643_vm1, %v1641_v4  ;;  %1511 = vmatprep.mubr.msk.bf16.mxu1 %vm1643_vm1, %v1641_v4  ;;  %v1768_v9 = vld [vmem:[%s1961_s6] sm:$0xff]  ;;  %v1650_v40 = vmov -1e+30   ;;  %vm683_vm7 = vcmask 1043456  }
   0xf   : > { %s1357_s8 = scalar_lea.vmem %s1956_s1, %s1717_s28  ;;  %s416_s11 = scalar_lea.vmem %s1955_s0, %s1717_s28  ;;  %v481_v10 = vld [vmem:[%s1959_s4] sm:$0xff]  ;;  %466 = vst.msk [vmem:[#allocation3] sm:$0xff] %vm465_vm3, %v1650_v40  ;;  %467 = vst.msk [vmem:[#allocation3 + $0x8] sm:$0xff] %vm465_vm3, %v1650_v40  ;;  %v577_v52 = vshrl.u32 %v576_v51, 7  ;;  %v582_v53 = vand.u32 127, %v576_v51  ;;  %1591 = vset.pattern.permute.xlu1 %v1652_v62  ;;  %1592 = vset.pattern.permute.xlu0 %v1652_v62  ;;  %vm1262_vm8 = vcmask 130048  }
  0x10   : > { %v1727_v0 = vld [vmem:[%s1357_s8 + $0x8] sm:$0xff]  ;;  %v1729_v1 = vld [vmem:[%s416_s11] sm:$0xff]  ;;  %s1649_s8 = smov 16   ;;  %468 = vst.msk [vmem:[#allocation3 + $0x10] sm:$0xff] %vm465_vm3, %v1650_v40  ;;  %469 = vst.msk [vmem:[#allocation3 + $0x18] sm:$0xff] %vm465_vm3, %v1650_v40  ;;  %s1654_s11 = smov 120  }
  0x11   : > { %v589_v2 = vsub.f32 0.0, %v1727_v0  ;;  %v483_v3 = vsub.f32 0.0, %v1729_v1  ;;  %v482_v13 = vmul.f32 %v1758_v7, %v1729_v1  ;;  %v588_v14 = vmul.f32 %v1727_v0, %v1763_v8  ;;  %470 = vst.msk [vmem:[#allocation4] sm:$0xff] %vm465_vm3, %v1641_v4  ;;  %471 = vst.msk [vmem:[#allocation4 + $0x8] sm:$0xff] %vm465_vm3, %v1641_v4 }
  0x12   : > { %472 = vst.msk [vmem:[#allocation4 + $0x10] sm:$0xff] %vm465_vm3, %v1641_v4  ;;  %473 = vst.msk [vmem:[#allocation4 + $0x18] sm:$0xff] %vm465_vm3, %v1641_v4  ;;  %vm585_vm4 = vcmp.lt.s32.totalorder %v582_v53, 8  ;;  %vm586_vm5 = vcmp.le.s32.totalorder %v582_v53, %v577_v52  ;;  %vm1264_vm9 = vcmask 195584   ;;  %vm1266_vm10 = vcmask 261120  }
  0x13   : > { %591 = vrot.lane.b32.xlu1 %v589_v2, %s1642_s12  ;;  %485 = vrot.lane.b32.xlu0 %v483_v3, %s1642_s12  ;;  %vm1823_vm6 = vmand %vm585_vm4, %vm586_vm5 }
  0x17   : > { %595 = vrot.lane.b32.xlu1 %v1727_v0, %s1644_s13  ;;  %489 = vrot.lane.b32.xlu0 %v1729_v1, %s1644_s13  ;;  %v1122_v54 = vld [vmem:[#allocation3 + $0x18] sm:$0xff] }
  0x1b   : > { %506 = vrot.lane.b32.xlu1 %v1729_v1, %s1642_s12  ;;  %503 = vrot.lane.b32.xlu0 %v483_v3, %s1645_s14 }
  0x1f   : > { %744 = vrot.lane.b32.xlu1 %v1727_v0, %s1642_s12  ;;  %741 = vrot.lane.b32.xlu0 %v589_v2, %s1645_s14 }
  0x23   : > { %530 = vrot.lane.b32.xlu1 %v1729_v1, %s1645_s14  ;;  %527 = vrot.lane.b32.xlu0 %v483_v3, %s1646_s15 }
  0x27   : > { %901 = vrot.lane.b32.xlu1 %v1727_v0, %s1645_s14  ;;  %898 = vrot.lane.b32.xlu0 %v589_v2, %s1646_s15  ;;  %s1363_s14 = scalar_lea.vmem %s1957_s2, %s1717_s28  ;;  %s1474_s28 = sshll.u32 %s1970_s24, 2 }
  0x28   : > { %s459_s18 = scalar_lea.vmem %s1962_s7, %s1474_s28 }
  0x2b   : > { %554 = vrot.lane.b32.xlu1 %v1729_v1, %s1646_s15  ;;  %551 = vrot.lane.b32.xlu0 %v483_v3, %s1647_s16 }
  0x2f   : > { %1057 = vrot.lane.b32.xlu1 %v1727_v0, %s1646_s15  ;;  %1054 = vrot.lane.b32.xlu0 %v589_v2, %s1647_s16  ;;  %s1655_s15 = smov 104  }
  0x33   : > { %499 = vrot.lane.b32.xlu1 %v1758_v7, %s1648_s30 }
  0x85   : > { %v592_v5 = vpop.permute.xlu1 %591  ;;  %v486_v6 = vpop.permute.xlu0 %485 }
  0x89   : > { %v596_v11 = vpop.permute.xlu1 %595  ;;  %v490_v12 = vpop.permute.xlu0 %489 }
  0x8a   : > { %v599_v15 = vsel %vm492_vm2, %v592_v5, %v596_v11  ;;  %v493_v16 = vsel %vm492_vm2, %v486_v6, %v490_v12 }
  0x8b   : > { %v600_v17 = vmul.f32 %v599_v15, %v1768_v9  ;;  %v494_v18 = vmul.f32 %v493_v16, %v481_v10 }
  0x8d   : > { %v495_v19 = vadd.f32 %v494_v18, %v482_v13  ;;  %v601_v20 = vadd.f32 %v600_v17, %v588_v14  ;;  %v507_v26 = vpop.permute.xlu1 %506  ;;  %v504_v27 = vpop.permute.xlu0 %503  ;;  %v1839_v18 = vld [vmem:[#allocation3] sm:$0xff] }
  0x8e   : > { %v509_v28 = vsel %vm492_vm2, %v504_v27, %v507_v26 }
  0x8f   : > { %v496_v21 = vmul.f32 0.35355338, %v495_v19  ;;  %v604_v22 = vpack.c.bf16 %v601_v20, %v601_v20  ;;  %v510_v29 = vmul.f32 %v509_v28, %v481_v10 }
  0x91   : > { %497 = vst.msk [vmem:[#allocation2] sm:$0xff] %vm474_vm0, %v496_v21  ;;  %v610_v23 = vsel %vm474_vm0, %v604_v22, 0  ;;  %v745_v30 = vpop.permute.xlu1 %744  ;;  %v742_v31 = vpop.permute.xlu0 %741  ;;  %512 = vrot.lane.b32.xlu1 %v510_v29, %s1648_s30 }
  0x92   : > { %1504 = vmatpush3.bf16.xpose.msra.mxu0 %v610_v23  ;;  %v747_v32 = vsel %vm492_vm2, %v742_v31, %v745_v30  ;;  %v1476_v31 = vld [vmem:[%s1363_s14 + $0x10] sm:$0xff] }
  0x93   : > { %1521 = vmatprep.subr.bf16.mxu0 %v1641_v4  ;;  %v748_v33 = vmul.f32 %v747_v32, %v1768_v9 }
  0x95   : > { %737 = vrot.lane.b32.xlu1 %v1763_v8, %s1648_s30  ;;  %v531_v34 = vpop.permute.xlu1 %530  ;;  %v528_v35 = vpop.permute.xlu0 %527 }
  0x96   : > { %v533_v36 = vsel %vm492_vm2, %v528_v35, %v531_v34 }
  0x97   : > { %v534_v37 = vmul.f32 %v533_v36, %v481_v10 }
  0x98   : > { %v602_v24 = vld [vmem:[#allocation2] sm:$0xff] }
  0x99   : > { %v603_v25 = vpack.c.bf16 %v602_v24, %v602_v24  ;;  %750 = vrot.lane.b32.xlu1 %v748_v33, %s1648_s30  ;;  %v902_v38 = vpop.permute.xlu1 %901  ;;  %v899_v39 = vpop.permute.xlu0 %898  ;;  %v1857_v33 = vpack.c.bf16 %v1476_v31, %v1476_v31 }
  0x9a   : > { %v904_v41 = vsel %vm492_vm2, %v899_v39, %v902_v38 }
  0x9b   : > { %1506 = vmatmul.mubr.msk.bf16.vlgmr.msra.gmra.mxu0 %vm474_vm0, %v603_v25  ;;  %v905_v44 = vmul.f32 %v904_v41, %v1768_v9 }
  0x9c   : > { %1523 = vmatprep.mubr.msk.bf16.mxu0 %vm1643_vm1, %v1641_v4 }
  0x9d   : > { %523 = vrot.lane.b32.xlu1 %v1758_v7, %s1649_s8  ;;  %v555_v42 = vpop.permute.xlu1 %554  ;;  %v552_v43 = vpop.permute.xlu0 %551 }
  0x9e   : > { %v557_v45 = vsel %vm492_vm2, %v552_v43, %v555_v42 }
  0x9f   : > { %v558_v46 = vmul.f32 %v557_v45, %v481_v10 }
  0xa1   : > { %536 = vrot.lane.b32.xlu1 %v534_v37, %s1649_s8  ;;  %v1058_v47 = vpop.permute.xlu1 %1057  ;;  %v1055_v48 = vpop.permute.xlu0 %1054 }
  0xa2   : > { %v1060_v49 = vsel %vm492_vm2, %v1055_v48, %v1058_v47 }
  0xa3   : > { %v1061_v50 = vmul.f32 %v1060_v49, %v1768_v9 }
  0xa5   : > { %894 = vrot.lane.b32.xlu1 %v1763_v8, %s1649_s8  ;;  %v500_v61 = vpop.permute.xlu1 %499 }
  0xa6   : > { %v502_v63 = vmul.f32 %v500_v61, %v1729_v1 }
  0xa9   : > { %907 = vrot.lane.b32.xlu1 %v905_v44, %s1649_s8 }
  0xad   : > { %560 = vrot.lane.b32.xlu1 %v558_v46, %s1651_s9 }
  0xb1   : > { %1050 = vrot.lane.b32.xlu1 %v1763_v8, %s1651_s9 }
  0xb5   : > { %1063 = vrot.lane.b32.xlu1 %v1061_v50, %s1651_s9 }
 0x103   : > { %v513_v2 = vpop.permute.xlu1 %512 }
 0x104   : > { %v515_v3 = vadd.f32 %v513_v2, %v502_v63 }
 0x106   : > { %v516_v22 = vmul.f32 0.35355338, %v515_v3 }
 0x107   : > { %v738_v5 = vpop.permute.xlu1 %737 }
 0x108   : > { %v740_v6 = vmul.f32 %v1727_v0, %v738_v5 }
 0x10b   : > { %v751_v8 = vpop.permute.xlu1 %750 }
 0x10c   : > { %v753_v9 = vadd.f32 %v751_v8, %v740_v6 }
 0x10e   : > { %v757_v26 = vpack.c.bf16 %v753_v9, %v753_v9 }
 0x10f   : > { %v524_v10 = vpop.permute.xlu1 %523 }
 0x110   : > { %v526_v11 = vmul.f32 %v524_v10, %v1729_v1 }
 0x113   : > { %v537_v12 = vpop.permute.xlu1 %536 }
 0x114   : > { %v539_v13 = vadd.f32 %v537_v12, %v526_v11 }
 0x116   : > { %v540_v14 = vmul.f32 0.35355338, %v539_v13 }
 0x117   : > { %v895_v15 = vpop.permute.xlu1 %894 }
 0x118   : > { %v897_v23 = vmul.f32 %v1727_v0, %v895_v15 }
 0x11b   : > { %v908_v16 = vpop.permute.xlu1 %907 }
 0x11c   : > { %v910_v27 = vadd.f32 %v908_v16, %v897_v23 }
 0x11f   : > { %v561_v17 = vpop.permute.xlu1 %560 }
 0x123   : > { %v1051_v20 = vpop.permute.xlu1 %1050 }
 0x124   : > { %v1053_v29 = vmul.f32 %v1727_v0, %v1051_v20  ;;  %v685_v0 = vsel %vm683_vm7, %v1857_v33, 0  ;;  %v809_v20 = vld [vmem:[#allocation3 + $0x8] sm:$0xff] }
 0x125   : > { %1510 = vmatpush3.bf16.msra.mxu1 %v685_v0 }
 0x126   : > { %1515 = vmatprep.subr.bf16.mxu1 %v1641_v4 }
 0x127   : > { %v1064_v30 = vpop.permute.xlu1 %1063 }
 0x128   : > { %v1066_v34 = vadd.f32 %v1064_v30, %v1053_v29 }
 0x12a   : > { %v1070_v36 = vpack.c.bf16 %v1066_v34, %v1066_v34 }
 0x15b   : > { %v646_v55 = vpop.f32.mrf.mxu0 }
 0x15c   : > { %v1829_v56 = vsel %vm1823_vm6, %v646_v55, -1e+30 }
 0x15d   : > { %v1507_v57 = vpop.f32.mrf.mxu0  ;;  %v655_v58 = vsel %vm474_vm0, %v1829_v56, -inf }
 0x15e   : > { %656 = vmax.xlane.f32.xlu0 %v655_v58 }
 0x15f   : > { %v649_v59 = vpop.f32.mrf.mxu0 }
 0x161   : > { %v1508_v60 = vpop.f32.mrf.mxu0 }
 0x174   : > { %547 = vrot.lane.b32.xlu0 %v1758_v7, %s1651_s9 }
 0x178   : > { %542 = vrot.lane.b32.xlu0 %v540_v14, %s1653_s10 }
 0x1e7   : > { %v657_v19 = vpop.xlane.xlu0 %656 }
 0x1e8   : > { %v1842_v7 = vmax.f32 %v1839_v18, %v657_v19 }
 0x1ea   : > { %v659_v21 = vsub.f32 %v1839_v18, %v1842_v7  ;;  %677 = vst.msk [vmem:[#allocation3] sm:$0xff] %vm465_vm3, %v1842_v7  ;;  %664 = vperm.xlu1 %1591, %v1842_v7   ;;  %v811_v7 = vld [vmem:[#allocation4 + $0x8] sm:$0xff] }
 0x1eb   : > { %v548_v24 = vpop.permute.xlu0 %547 }
 0x1ec   : > { %v550_v25 = vmul.f32 %v548_v24, %v1729_v1  ;;  %v914_v1 = vpack.c.bf16 %v910_v27, %v910_v27 }
 0x1ee   : > { %518 = vrot.lane.b32.xlu1 %v516_v22, %s1654_s11  ;;  %v563_v28 = vadd.f32 %v561_v17, %v550_v25  ;;  %v966_v25 = vld [vmem:[#allocation3 + $0x10] sm:$0xff] }
 0x1ef   : > { %v543_v35 = vpop.permute.xlu0 %542 }
 0x1f0   : > { %v564_v32 = vmul.f32 0.35355338, %v563_v28  ;;  %546 = vst.msk [vmem:[#allocation2 + $0x10] sm:$0xff] %vm474_vm0, %v543_v35 }
 0x1f2   : > { %759 = vrot.lane.b32.xlu1 %v757_v26, %s1654_s11  ;;  %566 = vrot.lane.b32.xlu0 %v564_v32, %s1655_s15 }
 0x1f6   : > { %916 = vrot.lane.b32.xlu1 %v914_v1, %s1653_s10 }
 0x1f7   : > { %v912_v51 = vld [vmem:[#allocation2 + $0x10] sm:$0xff] }
 0x1f8   : > { %v913_v53 = vpack.c.bf16 %v912_v51, %v912_v51 }
 0x1fa   : > { %1072 = vrot.lane.b32.xlu1 %v1070_v36, %s1655_s15 }
 0x264   : > { %v567_v37 = vpop.permute.xlu0 %566 }
 0x265   : > { %v665_v38 = vpop.permute.xlu1 %664  ;;  %570 = vst.msk [vmem:[#allocation2 + $0x18] sm:$0xff] %vm474_vm0, %v567_v37 }
 0x266   : > { %v667_v39 = vsub.f32 %v1829_v56, %v665_v38 }
 0x268   : > { %v668_v40 = vmul.f32 1.442695, %v667_v39 }
 0x269   : > { %v519_v41 = vpop.permute.xlu1 %518 }
 0x26a   : > { %1593 = vpow2.f32 %v668_v40  ;;  %522 = vst.msk [vmem:[#allocation2 + $0x8] sm:$0xff] %vm474_vm0, %v519_v41 }
 0x26c   : > { %v1068_v55 = vld [vmem:[#allocation2 + $0x18] sm:$0xff] }
 0x26d   : > { %v760_v43 = vpop.permute.xlu1 %759  ;;  %v1069_v56 = vpack.c.bf16 %v1068_v55, %v1068_v55  ;;  %v660_v55 = vmul.f32 1.442695, %v659_v21 }
 0x26e   : > { %v765_v45 = vsel %vm474_vm0, %v760_v43, 0 }
 0x271   : > { %v755_v46 = vld [vmem:[#allocation2 + $0x8] sm:$0xff]  ;;  %v917_v47 = vpop.permute.xlu1 %916 }
 0x272   : > { %v756_v48 = vpack.c.bf16 %v755_v46, %v755_v46  ;;  %v922_v49 = vsel %vm474_vm0, %v917_v47, 0 }
 0x275   : > { %v1073_v50 = vpop.permute.xlu1 %1072 }
 0x276   : > { %v1078_v52 = vsel %vm474_vm0, %v1073_v50, 0 }
 0x277   : > { %v1870_v42 = vpop.eup %1593 }
 0x278   : > { %v678_v44 = vpack.c.bf16 %v1870_v42, %v1870_v42  ;;  %v671_v50 = vsel %vm474_vm0, %v1870_v42, 0.0 }
 0x27a   : > { %1512 = vmatmul.mubr.msk.bf16.vlgmr.msra.gmra.mxu1 %vm474_vm0, %v678_v44 }
 0x27b   : > { %1516 = vmatpush3.bf16.xpose.msra.mxu1 %v765_v45  ;;  %1517 = vmatprep.mubr.msk.bf16.mxu1 %vm1643_vm1, %v1641_v4 }
 0x27c   : > { %1527 = vmatprep.subr.bf16.mxu1 %v1641_v4 }
 0x282   : > { %1518 = vmatmul.mubr.msk.bf16.vlgmr.msra.gmra.mxu1 %vm474_vm0, %v756_v48 }
 0x283   : > { %1528 = vmatpush3.bf16.xpose.msra.mxu1 %v922_v49  ;;  %1529 = vmatprep.mubr.msk.bf16.mxu1 %vm1643_vm1, %v1641_v4 }
 0x284   : > { %1539 = vmatprep.subr.bf16.mxu1 %v1641_v4 }
 0x28a   : > { %1530 = vmatmul.mubr.msk.bf16.vlgmr.msra.gmra.mxu1 %vm474_vm0, %v913_v53 }
 0x28b   : > { %1540 = vmatpush3.bf16.xpose.msra.mxu1 %v1078_v52  ;;  %1541 = vmatprep.mubr.msk.bf16.mxu1 %vm1643_vm1, %v1641_v4 }
 0x292   : > { %1542 = vmatmul.mubr.msk.bf16.vlgmr.msra.gmra.mxu1 %vm474_vm0, %v1069_v56 }
 0x33a   : > { %v1889_v57 = vpop.f32.mrf.mxu1 }
 0x33c   : > { %v1513_v58 = vpop.f32.mrf.mxu1 }
 0x33e   : > { %v724_v59 = vpop.f32.mrf.mxu1 }
 0x340   : > { %v1514_v60 = vpop.f32.mrf.mxu1 }
 0x342   : > { %v801_v61 = vpop.f32.mrf.mxu1 }
 0x343   : > { %v807_v62 = vsel %vm1823_vm6, %v801_v61, -1e+30 }
 0x344   : > { %v1519_v63 = vpop.f32.mrf.mxu1  ;;  %v812_v2 = vsel %vm474_vm0, %v807_v62, -inf }
 0x345   : > { %813 = vmax.xlane.f32.xlu0 %v812_v2 }
 0x346   : > { %v804_v3 = vpop.f32.mrf.mxu1 }
 0x347   : > { %v968_v3 = vld [vmem:[#allocation4 + $0x10] sm:$0xff] }
 0x348   : > { %v1520_v5 = vpop.f32.mrf.mxu1 }
 0x34a   : > { %v958_v6 = vpop.f32.mrf.mxu1 }
 0x34b   : > { %v964_v8 = vsel %vm1823_vm6, %v958_v6, -1e+30 }
 0x34c   : > { %v1531_v9 = vpop.f32.mrf.mxu1  ;;  %v969_v10 = vsel %vm474_vm0, %v964_v8, -inf }
 0x34d   : > { %970 = vmax.xlane.f32.xlu1 %v969_v10 }
 0x34e   : > { %v961_v11 = vpop.f32.mrf.mxu1 }
 0x350   : > { %v1532_v12 = vpop.f32.mrf.mxu1 }
 0x352   : > { %v1114_v13 = vpop.f32.mrf.mxu1 }
 0x353   : > { %v1120_v14 = vsel %vm1823_vm6, %v1114_v13, -1e+30 }
 0x354   : > { %v1543_v15 = vpop.f32.mrf.mxu1  ;;  %v1125_v16 = vsel %vm474_vm0, %v1120_v14, -inf }
 0x355   : > { %1126 = vmax.xlane.f32.xlu0 %v1125_v16 }
 0x356   : > { %v1117_v17 = vpop.f32.mrf.mxu1 }
 0x358   : > { %v1544_v19 = vpop.f32.mrf.mxu1 }
 0x3ce   : > { %v814_v22 = vpop.xlane.xlu0 %813 }
 0x3cf   : > { %v815_v23 = vmax.f32 %v809_v20, %v814_v22 }
 0x3d1   : > { %v816_v24 = vsub.f32 %v809_v20, %v815_v23  ;;  %833 = vst.msk [vmem:[#allocation3 + $0x8] sm:$0xff] %vm465_vm3, %v815_v23  ;;  %821 = vperm.xlu0 %1592, %v815_v23   ;;  %v727_v20 = vld [vmem:[#allocation5] sm:$0xff] }
 0x3d3   : > { %v817_v58 = vmul.f32 1.442695, %v816_v24 }
 0x3d6   : > { %v971_v26 = vpop.xlane.xlu1 %970 }
 0x3d7   : > { %v972_v27 = vmax.f32 %v966_v25, %v971_v26 }
 0x3d9   : > { %v973_v28 = vsub.f32 %v966_v25, %v972_v27  ;;  %990 = vst.msk [vmem:[#allocation3 + $0x10] sm:$0xff] %vm465_vm3, %v972_v27  ;;  %978 = vperm.xlu1 %1591, %v972_v27  }
 0x3db   : > { %v974_v42 = vmul.f32 1.442695, %v973_v28 }
 0x3de   : > { %v1127_v29 = vpop.xlane.xlu0 %1126 }
 0x3df   : > { %v1128_v30 = vmax.f32 %v1122_v54, %v1127_v29 }
 0x3e1   : > { %v1129_v31 = vsub.f32 %v1122_v54, %v1128_v30  ;;  %1146 = vst.msk [vmem:[#allocation3 + $0x18] sm:$0xff] %vm465_vm3, %v1128_v30  ;;  %1134 = vperm.xlu1 %1591, %v1128_v30  }
 0x3e3   : > { %v1130_v60 = vmul.f32 1.442695, %v1129_v31 }
 0x3e5   : > { %836 = vrot.lane.b32.xlu1 %v1857_v33, %s1654_s11 }
 0x3e9   : > { %992 = vrot.lane.b32.xlu1 %v1857_v33, %s1653_s10 }
 0x3ed   : > { %1148 = vrot.lane.b32.xlu1 %v1857_v33, %s1655_s15 }
 0x44c   : > { %v822_v32 = vpop.permute.xlu0 %821 }
 0x44d   : > { %v824_v1 = vsub.f32 %v807_v62, %v822_v32 }
 0x44f   : > { %v825_v34 = vmul.f32 1.442695, %v824_v1 }
 0x451   : > { %1595 = vpow2.f32 %v825_v34  ;;  %v885_v34 = vld [vmem:[#allocation5 + $0x8] sm:$0xff] }
 0x454   : > { %v979_v0 = vpop.permute.xlu1 %978 }
 0x455   : > { %v981_v35 = vsub.f32 %v964_v8, %v979_v0  ;;  %v654_v8 = vld [vmem:[#allocation4] sm:$0xff] }
 0x457   : > { %v982_v36 = vmul.f32 1.442695, %v981_v35 }
 0x459   : > { %1597 = vpow2.f32 %v982_v36 }
 0x45c   : > { %v1135_v37 = vpop.permute.xlu1 %1134 }
 0x45d   : > { %v1137_v38 = vsub.f32 %v1120_v14, %v1135_v37  ;;  %v1124_v14 = vld [vmem:[#allocation4 + $0x18] sm:$0xff] }
 0x45e   : > { %v1596_v39 = vpop.eup %1595 }
 0x45f   : > { %v1138_v40 = vmul.f32 1.442695, %v1137_v38  ;;  %v828_v41 = vsel %vm474_vm0, %v1596_v39, 0.0  ;;  %v834_v33 = vpack.c.bf16 %v1596_v39, %v1596_v39  ;;  %v1041_v38 = vld [vmem:[#allocation5 + $0x10] sm:$0xff] }
 0x460   : > { %v837_v43 = vpop.permute.xlu1 %836  ;;  %829 = vadd.xlane.f32.xlu1 %v828_v41 }
 0x461   : > { %1599 = vpow2.f32 %v1138_v40  ;;  %v842_v44 = vsel %vm683_vm7, %v837_v43, 0 }
 0x462   : > { %1522 = vmatpush3.bf16.msra.mxu0 %v842_v44  ;;  %1601 = vpow2.f32 %v660_v55 }
 0x463   : > { %1533 = vmatprep.subr.bf16.mxu0 %v1641_v4  ;;  %1603 = vpow2.f32 %v817_v58 }
 0x464   : > { %v993_v45 = vpop.permute.xlu1 %992  ;;  %1605 = vpow2.f32 %v974_v42 }
 0x465   : > { %1524 = vmatmul.mubr.msk.bf16.vlgmr.msra.gmra.mxu0 %vm474_vm0, %v834_v33  ;;  %v998_v46 = vsel %vm683_vm7, %v993_v45, 0  ;;  %1607 = vpow2.f32 %v1130_v60 }
 0x466   : > { %v1598_v47 = vpop.eup %1597  ;;  %1534 = vmatpush3.bf16.msra.mxu0 %v998_v46  ;;  %1535 = vmatprep.mubr.msk.bf16.mxu0 %vm1643_vm1, %v1641_v4  ;;  %v1197_v46 = vld [vmem:[#allocation5 + $0x18] sm:$0xff] }
 0x467   : > { %v985_v48 = vsel %vm474_vm0, %v1598_v47, 0.0  ;;  %1545 = vmatprep.subr.bf16.mxu0 %v1641_v4  ;;  %v991_v51 = vpack.c.bf16 %v1598_v47, %v1598_v47 }
 0x468   : > { %986 = vadd.xlane.f32.xlu0 %v985_v48  ;;  %v1149_v49 = vpop.permute.xlu1 %1148 }
 0x469   : > { %v1154_v52 = vsel %vm683_vm7, %v1149_v49, 0 }
 0x46c   : > { %672 = vadd.xlane.f32.xlu0 %v671_v50 }
 0x46d   : > { %1536 = vmatmul.mubr.msk.bf16.vlgmr.msra.gmra.mxu0 %vm474_vm0, %v991_v51 }
 0x46e   : > { %v1600_v53 = vpop.eup %1599  ;;  %1546 = vmatpush3.bf16.msra.mxu0 %v1154_v52  ;;  %1547 = vmatprep.mubr.msk.bf16.mxu0 %vm1643_vm1, %v1641_v4 }
 0x46f   : > { %v1141_v56 = vsel %vm474_vm0, %v1600_v53, 0.0  ;;  %v1147_v59 = vpack.c.bf16 %v1600_v53, %v1600_v53  ;;  %v1602_v61 = vpop.eup %1601 }
 0x470   : > { %1142 = vadd.xlane.f32.xlu1 %v1141_v56  ;;  %v1604_v62 = vpop.eup %1603  ;;  %v670_v11 = vmul.f32 %v1602_v61, %v654_v8 }
 0x471   : > { %v1606_v4 = vpop.eup %1605  ;;  %v827_v21 = vmul.f32 %v1604_v62, %v811_v7 }
 0x472   : > { %v1608_v18 = vpop.eup %1607  ;;  %v984_v5 = vmul.f32 %v1606_v4, %v968_v3 }
 0x473   : > { %v1140_v16 = vmul.f32 %v1608_v18, %v1124_v14 }
 0x475   : > { %1548 = vmatmul.mubr.msk.bf16.vlgmr.msra.gmra.mxu0 %vm474_vm0, %v1147_v59 }
 0x481   : > { %730 = vperm.xlu1 %1591, %v1602_v61  }
 0x482   : > { %888 = vperm.xlu0 %1592, %v1604_v62  }
 0x485   : > { %1044 = vperm.xlu1 %1591, %v1606_v4  }
 0x489   : > { %1200 = vperm.xlu1 %1591, %v1608_v18  }
 0x4e9   : > { %v830_v63 = vpop.xlane.xlu1 %829 }
 0x4ea   : > { %v831_v2 = vadd.f32 %v830_v63, %v827_v21 }
 0x4ec   : > { %832 = vst.msk [vmem:[#allocation4 + $0x8] sm:$0xff] %vm465_vm3, %v831_v2 }
 0x4f1   : > { %v987_v6 = vpop.xlane.xlu0 %986 }
 0x4f2   : > { %v988_v9 = vadd.f32 %v987_v6, %v984_v5 }
 0x4f3   : > { %v1219_v10 = vld [vmem:[#allocation4 + $0x8] sm:$0xff] }
 0x4f4   : > { %989 = vst.msk [vmem:[#allocation4 + $0x10] sm:$0xff] %vm465_vm3, %v988_v9  ;;  %v1220_v12 = vmax.f32 %v1219_v10, 1e-30 }
 0x4f5   : > { %v673_v13 = vpop.xlane.xlu0 %672 }
 0x4f6   : > { %v674_v15 = vadd.f32 %v673_v13, %v670_v11  ;;  %1609 = vrcp.f32 %v1220_v12 }
 0x4f8   : > { %676 = vst.msk [vmem:[#allocation4] sm:$0xff] %vm465_vm3, %v674_v15 }
 0x4f9   : > { %v1143_v17 = vpop.xlane.xlu1 %1142 }
 0x4fa   : > { %v1144_v19 = vadd.f32 %v1143_v17, %v1140_v16 }
 0x4fb   : > { %v1229_v24 = vld [vmem:[#allocation4 + $0x10] sm:$0xff] }
 0x4fc   : > { %1145 = vst.msk [vmem:[#allocation4 + $0x18] sm:$0xff] %vm465_vm3, %v1144_v19  ;;  %v1230_v28 = vmax.f32 %v1229_v24, 1e-30 }
 0x4fd   : > { %v731_v22 = vpop.permute.xlu1 %730  ;;  %v889_v0 = vpop.permute.xlu0 %888 }
 0x4fe   : > { %v733_v23 = vmul.f32 %v731_v22, %v727_v20 }
 0x4ff   : > { %v1209_v25 = vld [vmem:[#allocation4] sm:$0xff] }
 0x500   : > { %v734_v26 = vadd.f32 %v733_v23, %v1889_v57  ;;  %v1210_v27 = vmax.f32 %v1209_v25, 1e-30  ;;  %v891_v57 = vmul.f32 %v889_v0, %v885_v34 }
 0x501   : > { %v1045_v39 = vpop.permute.xlu1 %1044 }
 0x502   : > { %735 = vst.msk [vmem:[#allocation5] sm:$0xff] %vm474_vm0, %v734_v26  ;;  %1611 = vrcp.f32 %v1210_v27  ;;  %v1047_v43 = vmul.f32 %v1045_v39, %v1041_v38 }
 0x503   : > { %v1610_v54 = vpop.eup %1609  ;;  %v1239_v29 = vld [vmem:[#allocation4 + $0x18] sm:$0xff]  ;;  %1613 = vrcp.f32 %v1230_v28 }
 0x504   : > { %1225 = vperm.xlu1 %1591, %v1610_v54   ;;  %v1240_v30 = vmax.f32 %v1239_v29, 1e-30 }
 0x505   : > { %v1201_v47 = vpop.permute.xlu1 %1200 }
 0x506   : > { %1615 = vrcp.f32 %v1240_v30  ;;  %v1203_v50 = vmul.f32 %v1201_v47, %v1197_v46 }
 0x509   : > { %v1212_v2 = vld [vmem:[#allocation5] sm:$0xff] }
 0x50f   : > { %v1612_v31 = vpop.eup %1611 }
 0x510   : > { %1215 = vperm.xlu0 %1592, %v1612_v31   ;;  %v1614_v32 = vpop.eup %1613 }
 0x513   : > { %v1616_v1 = vpop.eup %1615 }
 0x514   : > { %1245 = vperm.xlu1 %1591, %v1616_v1   ;;  %1235 = vperm.xlu0 %1592, %v1614_v32  }
 0x525   : > { %v878_v35 = vpop.f32.mrf.mxu0 }
 0x526   : > { %v892_v36 = vadd.f32 %v891_v57, %v878_v35 }
 0x527   : > { %v1525_v37 = vpop.f32.mrf.mxu0 }
 0x528   : > { %893 = vst.msk [vmem:[#allocation5 + $0x8] sm:$0xff] %vm474_vm0, %v892_v36 }
 0x529   : > { %v881_v40 = vpop.f32.mrf.mxu0 }
 0x52b   : > { %v1526_v41 = vpop.f32.mrf.mxu0 }
 0x52d   : > { %v1034_v44 = vpop.f32.mrf.mxu0 }
 0x52e   : > { %v1048_v33 = vadd.f32 %v1047_v43, %v1034_v44 }
 0x52f   : > { %v1537_v45 = vpop.f32.mrf.mxu0  ;;  %v1222_v42 = vld [vmem:[#allocation5 + $0x8] sm:$0xff] }
 0x530   : > { %1049 = vst.msk [vmem:[#allocation5 + $0x10] sm:$0xff] %vm474_vm0, %v1048_v33 }
 0x531   : > { %v1037_v48 = vpop.f32.mrf.mxu0 }
 0x533   : > { %v1538_v49 = vpop.f32.mrf.mxu0 }
 0x535   : > { %v1190_v51 = vpop.f32.mrf.mxu0 }
 0x536   : > { %v1204_v52 = vadd.f32 %v1203_v50, %v1190_v51 }
 0x537   : > { %v1549_v53 = vpop.f32.mrf.mxu0  ;;  %v1232_v18 = vld [vmem:[#allocation5 + $0x10] sm:$0xff] }
 0x538   : > { %1205 = vst.msk [vmem:[#allocation5 + $0x18] sm:$0xff] %vm474_vm0, %v1204_v52 }
 0x539   : > { %v1193_v55 = vpop.f32.mrf.mxu0 }
 0x53b   : > { %v1550_v56 = vpop.f32.mrf.mxu0 }
 0x53f   : > { %v1242_v62 = vld [vmem:[#allocation5 + $0x18] sm:$0xff] }
 0x57f   : > { %v1226_v58 = vpop.permute.xlu1 %1225 }
 0x580   : > { %v1228_v59 = vmul.f32 %v1226_v58, %v1222_v42 }
 0x582   : > { %1250 = vrot.lane.b32.xlu0 %v1228_v59, %s1648_s30 }
 0x58b   : > { %v1216_v60 = vpop.permute.xlu0 %1215 }
 0x58c   : > { %v1218_v3 = vmul.f32 %v1216_v60, %v1212_v2 }
 0x58f   : > { %v1246_v61 = vpop.permute.xlu1 %1245  ;;  %v1236_v4 = vpop.permute.xlu0 %1235 }
 0x590   : > { %v1248_v7 = vmul.f32 %v1246_v61, %v1242_v62  ;;  %v1238_v21 = vmul.f32 %v1236_v4, %v1232_v18 }
 0x592   : > { %1254 = vrot.lane.b32.xlu1 %v1238_v21, %s1649_s8  ;;  %1258 = vrot.lane.b32.xlu0 %v1248_v7, %s1651_s9 }
 0x5f4   : > { %v1251_v63 = vpop.permute.xlu0 %1250 }
 0x5f5   : > { %v1261_v5 = vsel %vm474_vm0, %v1218_v3, %v1251_v63 }
 0x604   : > { %v1255_v6 = vpop.permute.xlu1 %1254  ;;  %v1259_v8 = vpop.permute.xlu0 %1258 }
 0x605   : > { %v1263_v9 = vsel %vm1262_vm8, %v1261_v5, %v1255_v6 }
 0x606   : > { %v1265_v10 = vsel %vm1264_vm9, %v1263_v9, %v1259_v8 }
 0x607   : > { %v1267_v11 = vsel %vm1266_vm10, %v1265_v10, 0.0 }
 0x608   : > { %v1268_v12 = vpack.c.bf16 %v1267_v11, %v1267_v11 }
 0x60a   : > { %1269 = vst [vmem:[%s459_s18] sm:$0xf] %v1268_v12 }
 0x60b PF: > { %s17_s26 = sadd.s32 1, %s1639_s26   ;;  %s1965_s24 = smov %s1635_s25 }
 0x60c   : > { %p14_p5 = scmp.ge.s32.totalorder %s17_s26, 4   ;;  %s1966_s25 = smov %s1968_s27 }
 0x60e   :  { %16 = sbr.rel (!%p14_p5) target bundleno = 2 (0x2), region = 119 }

// kernel: run.19
= control target key start
LH: loop header
LB: loop body
LE: loop exit
PB: predicated region body
PF: predicated region fallthrough
CT: control target
= control target key end

     0   :  { %v357_v1 = vmov 0.0   ;;  %vm358_vm0 = vmmov 0   ;;  %s432_s0 = inlined_call_operand.vmem [shape: f32[16,256], index: 0, kind: input, shape index: {}, may-alias: {0,1}]   ;;  %s433_s1 = inlined_call_operand.vmem [shape: f32[16,256], index: 1, kind: input, shape index: {}, may-alias: {0,1}]   ;;  %s434_s2 = inlined_call_operand.vmem [shape: bf16[128,128], index: 2, kind: input, shape index: {}]   ;;  %s435_s3 = inlined_call_operand.vmem [shape: f32[16,128], index: 3, kind: input, shape index: {}]   ;;  %s436_s4 = inlined_call_operand.hbm [shape: f32[16,128], index: 4, kind: output, shape index: {}]  }
   0x1   :  { %v319_v0 = vld [vmem:[%s434_s2 + $0x38] sm:$0xff]   ;;  %294 = vmatprep.subr.bf16.mxu0 %v357_v1  ;;  %v320_v2 = vld [vmem:[%s434_s2 + $0x30] sm:$0xff]   ;;  %310 = vmatprep.mubr.msk.bf16.mxu0 %vm358_vm0, %v357_v1  ;;  %v321_v3 = vld [vmem:[%s434_s2 + $0x28] sm:$0xff]  }
   0x2   :  { %295 = vmatpush3.bf16.msra.mxu0 %v319_v0  ;;  %v42_v4 = vld [vmem:[%s432_s0] sm:$0xff]  ;;  %v44_v5 = vld [vmem:[%s432_s0 + $0x10] sm:$0xff] }
   0x3   :  { %296 = vmatprep.subr.bf16.mxu0 %v357_v1  ;;  %v111_v6 = vsub.f32 0.0, %v42_v4  ;;  %v112_v7 = vsub.f32 0.0, %v44_v5 }
   0x6   :  { %297 = vmatpush3.bf16.msra.mxu0 %v320_v2 }
   0x7   :  { %298 = vmatprep.subr.bf16.mxu0 %v357_v1 }
   0x8   :  { %9 = vsyncpa [#allocation6], 0  ;;  %v322_v8 = vld [vmem:[%s434_s2 + $0x20] sm:$0xff]   ;;  %v113_v9 = vmul.f32 1.442695, %v111_v6  ;;  %v323_v11 = vld [vmem:[%s434_s2 + $0x18] sm:$0xff]  }
   0x9   :  { %v115_v10 = vmul.f32 1.442695, %v112_v7  ;;  %v324_v12 = vld [vmem:[%s434_s2 + $0x10] sm:$0xff]   ;;  %v325_v13 = vld [vmem:[%s434_s2 + $0x8] sm:$0xff]   ;;  %v326_v15 = vld [vmem:[%s434_s2] sm:$0xff]   ;;  %s359_s13 = smov [#allocation5]  }
   0xa   :  { %299 = vmatpush3.bf16.msra.mxu0 %v321_v3  ;;  %327 = vpow2.f32 %v113_v9  ;;  %v275_v20 = vld [vmem:[%s433_s1 + $0x8] sm:$0xff]  ;;  %v276_v22 = vld [vmem:[%s433_s1 + $0x18] sm:$0xff]  ;;  %v244_v28 = vld [vmem:[%s435_s3] sm:$0xff]  ;;  %s255_s14 = sshll.u32 %s359_s13, 4  ;;  %s256_s14 = int_to_ptr.vmem [resolvable:$true] %s255_s14 }
   0xb   :  { %300 = vmatprep.subr.bf16.mxu0 %v357_v1  ;;  %329 = vpow2.f32 %v115_v10  ;;  %v245_v32 = vld [vmem:[%s435_s3 + $0x8] sm:$0xff]  ;;  %s335_s1 = scalar_lea.vmem %s256_s14, 256  ;;  %p340_p1 = scmp.lt.s32.totalorder %s256_s14, %s256_s14 }
   0xc   :  { %p336_p0 = scmp.ne.s32.totalorder %s256_s14, %s335_s1  ;;  %p341_p2 = scmp.lt.s32.totalorder %s335_s1, %s335_s1 }
   0xe   :  { %301 = vmatpush3.bf16.msra.mxu0 %v322_v8  ;;  %p342_p3 = por %p341_p2, %p340_p1 }
   0xf   :  { %302 = vmatprep.subr.bf16.mxu0 %v357_v1 }
  0x10   :  { %p343_p4 = pnand %p342_p3, %p336_p0 }
  0x12   :  { %303 = vmatpush3.bf16.msra.mxu0 %v323_v11 }
  0x13   :  { %304 = vmatprep.subr.bf16.mxu0 %v357_v1 }
  0x16   :  { %305 = vmatpush3.bf16.msra.mxu0 %v324_v12 }
  0x17   :  { %306 = vmatprep.subr.bf16.mxu0 %v357_v1  ;;  %v328_v14 = vpop.eup %327 }
  0x18   :  { %v330_v16 = vpop.eup %329  ;;  %v117_v17 = vadd.f32 1.0, %v328_v14 }
  0x19   :  { %v118_v18 = vadd.f32 1.0, %v330_v16 }
  0x1a   :  { %307 = vmatpush3.bf16.msra.mxu0 %v325_v13  ;;  %331 = vrcp.f32 %v117_v17 }
  0x1b   :  { %308 = vmatprep.subr.bf16.mxu0 %v357_v1  ;;  %333 = vrcp.f32 %v118_v18 }
  0x1e   :  { %309 = vmatpush3.bf16.msra.mxu0 %v326_v15 }
  0x27   :  { %v332_v19 = vpop.eup %331 }
  0x28   :  { %v334_v21 = vpop.eup %333  ;;  %v123_v23 = vmul.f32 %v332_v19, %v42_v4 }
  0x29   :  { %v124_v24 = vmul.f32 %v334_v21, %v44_v5 }
  0x2a   :  { %v125_v25 = vmul.f32 %v275_v20, %v123_v23 }
  0x2b   :  { %v126_v26 = vmul.f32 %v276_v22, %v124_v24 }
  0x2d   :  { %v129_v27 = vpack.c.bf16 %v126_v26, %v125_v25 }
  0x2f   :  { %311 = vmatmul.mubr.bf16.vlgmr.msra.gmra.mxu0 %v129_v27 }
  0xef   :  { %v228_v29 = vpop.f32.mrf.mxu0 }
  0xf0   :  { %v246_v30 = vadd.f32 %v244_v28, %v228_v29 }
  0xf1   :  { %v312_v31 = vpop.f32.mrf.mxu0 }
  0xf2   :  { %248 = vst [vmem:[#allocation5] sm:$0xff] %v246_v30 }
  0xf3   :  { %v231_v33 = vpop.f32.mrf.mxu0 }
  0xf4   :  { %v247_v34 = vadd.f32 %v245_v32, %v231_v33 }
  0xf5   :  { %v313_v35 = vpop.f32.mrf.mxu0 }
  0xf6   :  { %249 = vst [vmem:[#allocation5 + $0x8] sm:$0xff] %v247_v34 }
  0xf7   :  { %346 = shalt.err (!%p343_p4)
}
  0xf8   :  { %s360_s17 = smov 128   ;;  %s361_s18 = smov 8  }
  0xf9   :  { %261 = dma.vmem_to_hbm [thread:$0]  %s256_s14, 256, %s436_s4, [#allocation6], %s360_s17, %s360_s17, %s361_s18  }
  0xfa   :  { %355 = dma.done.wait [#allocation6], 256  }
  0xfb   :  { %356 = vsyncadd [#allocation6], 4294967040 }
  0xfc   :  { %265 = vsyncpa [#allocation6], 1 }

// kernel: run.15
= control target key start
LH: loop header
LB: loop body
LE: loop exit
PB: predicated region body
PF: predicated region fallthrough
CT: control target
= control target key end

     0   :  { %s771_s12 = smov 0   ;;  %s773_s13 = smov 0   ;;  %s887_s0 = inlined_call_operand.vmem [shape: f32[16,128], index: 0, kind: input, shape index: {}]   ;;  %s888_s1 = inlined_call_operand.vmem [shape: f32[1,128], index: 1, kind: input, shape index: {}]   ;;  %s889_s2 = inlined_call_operand.vmem [shape: bf16[128,384], index: 2, kind: input, shape index: {}]   ;;  %s890_s3 = inlined_call_operand.vmem [shape: f32[16,384], index: 3, kind: output, shape index: {}]  }
   0x1   :  { %s775_s14 = smov 0   ;;  %s777_s15 = smov 0  }
   0x2   :  { %s779_s16 = smov 0  }
   0x3 LB: > { %s22_s17 = sadd.s32 1, %s743_s15  ;;  %s591_s18 = sadd.s32 4294967295, %s747_s16   ;;  %s747_s16 = sphi %s779_s16, %s13_s16   ;;  %s743_s15 = sphi %s777_s15, %s895_s15   ;;  %s739_s14 = sphi %s775_s14, %s894_s14   ;;  %s735_s13 = sphi %s773_s13, %s893_s13   ;;  %s731_s12 = sphi %s771_s12, %s892_s12  }
   0x4   : > { %p23_p0 = scmp.ge.s32.totalorder %s22_s17, 3  ;;  %p86_p1 = scmp.ne.s32.totalorder %s735_s13, %s731_s12 }
   0x5   : > { %p87_p2 = scmp.eq.s32.totalorder %s747_s16, 0  ;;  %p118_p4 = scmp.eq.s32.totalorder %s591_s18, 2 }
   0x6   : > { %s897_s17 = smov (%p23_p0, %s22_s17), 0  ;;  %s79_s20 = sadd.s32 1, %s735_s13 }
   0x7   : > { %p88_p3 = por %p87_p2, %p86_p1  ;;  %s76_s19 = ssub.s32 %s743_s15, %s897_s17 }
   0x8   : > { %p77_p5 = scmp.eq.s32.totalorder %s76_s19, 0  ;;  %p806_p6 = por %p118_p4, %p86_p1 }
   0x9   : > { %p595_p7 = scmp.ge.s32.totalorder %s747_s16, 3 }
   0xa   : > { %s811_s22 = scalar_select %p77_p5, %s735_s13, %s79_s20  }
   0xb   : > { %152 = sbr.rel (%p595_p7) target bundleno = 30 (0x1e), region = 24 }
  0x10   : > { %155 = sbr.rel (!%p88_p3) target bundleno = 30 (0x1e), region = 28  ;;  %s157_s23 = sand.u32 (%p88_p3), 1, %s735_s13  }
  0x11   : > { %s597_s24 = sshll.u32 (%p88_p3), %s743_s15, 2  ;;  %s596_s25 = sshll.u32 (%p88_p3), %s157_s23, 6 }
  0x12   : > { %s819_s28 = scalar_lea.vmem (%p88_p3), %s889_s2, %s597_s24  ;;  %s159_s29 = scalar_lea.vmem (%p88_p3), [#allocation3], %s596_s25 }
  0x13   : > { %v178_v0 = vld [vmem:[%s819_s28] sm:$0xf] (%p88_p3)  ;;  %v180_v1 = vld [vmem:[%s819_s28 + $0xc] sm:$0xf] (%p88_p3)  ;;  %v182_v2 = vld [vmem:[%s819_s28 + $0x18] sm:$0xf] (%p88_p3) }
  0x14   : > { %179 = vst [vmem:[%s159_s29] sm:$0xf] (%p88_p3), %v178_v0  ;;  %181 = vst [vmem:[%s159_s29 + $0x4] sm:$0xf] (%p88_p3), %v180_v1  ;;  %v184_v3 = vld [vmem:[%s819_s28 + $0x24] sm:$0xf] (%p88_p3) }
  0x15   : > { %v186_v4 = vld [vmem:[%s819_s28 + $0x30] sm:$0xf]  ;;  %183 = vst [vmem:[%s159_s29 + $0x8] sm:$0xf] %v182_v2  ;;  %185 = vst [vmem:[%s159_s29 + $0xc] sm:$0xf] %v184_v3 }
  0x16   : > { %187 = vst [vmem:[%s159_s29 + $0x10] sm:$0xf] %v186_v4  ;;  %v188_v5 = vld [vmem:[%s819_s28 + $0x3c] sm:$0xf]  ;;  %v190_v6 = vld [vmem:[%s819_s28 + $0x48] sm:$0xf] }
  0x17   : > { %v192_v7 = vld [vmem:[%s819_s28 + $0x54] sm:$0xf]  ;;  %189 = vst [vmem:[%s159_s29 + $0x14] sm:$0xf] %v188_v5  ;;  %191 = vst [vmem:[%s159_s29 + $0x18] sm:$0xf] %v190_v6 }
  0x18   : > { %193 = vst [vmem:[%s159_s29 + $0x1c] sm:$0xf] %v192_v7  ;;  %v194_v8 = vld [vmem:[%s819_s28 + $0x60] sm:$0xf]  ;;  %v196_v9 = vld [vmem:[%s819_s28 + $0x6c] sm:$0xf] }
  0x19   : > { %v198_v10 = vld [vmem:[%s819_s28 + $0x78] sm:$0xf]  ;;  %195 = vst [vmem:[%s159_s29 + $0x20] sm:$0xf] %v194_v8  ;;  %197 = vst [vmem:[%s159_s29 + $0x24] sm:$0xf] %v196_v9 }
  0x1a   : > { %199 = vst [vmem:[%s159_s29 + $0x28] sm:$0xf] %v198_v10  ;;  %v200_v11 = vld [vmem:[%s819_s28 + $0x84] sm:$0xf]  ;;  %v202_v12 = vld [vmem:[%s819_s28 + $0x90] sm:$0xf] }
  0x1b   : > { %v204_v13 = vld [vmem:[%s819_s28 + $0x9c] sm:$0xf]  ;;  %201 = vst [vmem:[%s159_s29 + $0x2c] sm:$0xf] %v200_v11  ;;  %203 = vst [vmem:[%s159_s29 + $0x30] sm:$0xf] %v202_v12 }
  0x1c   : > { %205 = vst [vmem:[%s159_s29 + $0x34] sm:$0xf] %v204_v13  ;;  %v206_v14 = vld [vmem:[%s819_s28 + $0xa8] sm:$0xf]  ;;  %v208_v15 = vld [vmem:[%s819_s28 + $0xb4] sm:$0xf] }
  0x1d   : > { %207 = vst [vmem:[%s159_s29 + $0x38] sm:$0xf] %v206_v14  ;;  %209 = vst [vmem:[%s159_s29 + $0x3c] sm:$0xf] %v208_v15 }
  0x1e PF: > { %p598_p8 = scmp.ge.s32.totalorder %s747_s16, 1  ;;  %p264_p9 = scmp.lt.s32.totalorder %s747_s16, 4 }
  0x20   : > { %p265_p10 = pnand %p598_p8, %p264_p9 }
  0x21   : > { %s271_s30 = sand.u32 (!%p265_p10), 1, %s731_s12   ;;  %p601_p11 = scmp.ne.s32.totalorder (!%p265_p10), %s739_s14, 0 }
  0x22   : > { %268 = sbr.rel (%p265_p10) target bundleno = 453 (0x1c5), region = 69  ;;  %s599_s4 = sshll.u32 (!%p265_p10), %s271_s30, 6 }
  0x23   : > { %s600_s5 = sshll.u32 (!%p265_p10), %s271_s30, 4  ;;  %s840_s6 = scalar_lea.vmem (!%p265_p10), [#allocation3], %s599_s4 }
  0x24   : > { %s842_s7 = scalar_lea.vmem (!%p265_p10), [#allocation4], %s600_s5 }
  0x27   : > { %309 = sbr.rel (%p601_p11) target bundleno = 214 (0xd6), region = 77 }
  0x2c   : > { %v310_v16 = vld [vmem:[%s887_s0] sm:$0xff]  ;;  %v311_v17 = vld [vmem:[%s887_s0 + $0x8] sm:$0xff] }
  0x2d   : > { %v312_v18 = vmul.f32 %v310_v16, %v310_v16  ;;  %v313_v19 = vmul.f32 %v311_v17, %v311_v17  ;;  %v602_v29 = vld [vmem:[%s888_s1] ss:$0 sm:$0xff] }
  0x2f   : > { %314 = vadd.xlane.f32.xlu0 %v312_v18 }
  0x33   : > { %316 = vadd.xlane.f32.xlu0 %v313_v19 }
  0xb8   : > { %v315_v20 = vpop.xlane.xlu0 %314 }
  0xb9   : > { %v318_v21 = vmul.f32 0.03125, %v315_v20 }
  0xbb   : > { %v320_v22 = vadd.f32 1e-08, %v318_v21 }
  0xbc   : > { %v317_v23 = vpop.xlane.xlu0 %316 }
  0xbd   : > { %696 = vrsqrt.f32 %v320_v22  ;;  %v319_v24 = vmul.f32 0.03125, %v317_v23 }
  0xbf   : > { %v321_v25 = vadd.f32 1e-08, %v319_v24 }
  0xc1   : > { %698 = vrsqrt.f32 %v321_v25 }
  0xca   : > { %v697_v26 = vpop.eup %696 }
  0xcb   : > { %v324_v27 = vmul.f32 %v697_v26, %v310_v16 }
  0xcd   : > { %v333_v31 = vmul.f32 %v602_v29, %v324_v27 }
  0xce   : > { %v699_v28 = vpop.eup %698 }
  0xcf   : > { %v325_v30 = vmul.f32 %v699_v28, %v311_v17 }
  0xd1   : > { %v334_v32 = vmul.f32 %v602_v29, %v325_v30 }
  0xd3   : > { %v623_v33 = vpack.c.bf16 %v334_v32, %v333_v31 }
  0xd5   : > { %624 = vst [vmem:[#allocation2] sm:$0xff] %v623_v33  }
  0xd6 PF: > { %v700_v34 = vld [vmem:[%s840_s6 + $0x38] sm:$0xff]   ;;  %v749_v35 = vmov 0.0   ;;  %v701_v36 = vld [vmem:[%s840_s6 + $0x30] sm:$0xff]   ;;  %vm750_vm0 = vmmov 0   ;;  %v702_v37 = vld [vmem:[%s840_s6 + $0x28] sm:$0xff]   ;;  %s615_s19 = sshll.u32 (%p806_p6), %s739_s14, 3 }
  0xd7   : > { %634 = vmatprep.subr.bf16.mxu0 %v749_v35  ;;  %650 = vmatprep.mubr.msk.bf16.mxu0 %vm750_vm0, %v749_v35  ;;  %v703_v38 = vld [vmem:[%s840_s6 + $0x20] sm:$0xff]   ;;  %v704_v39 = vld [vmem:[%s840_s6 + $0x18] sm:$0xff]   ;;  %v705_v40 = vld [vmem:[%s840_s6 + $0x10] sm:$0xff]   ;;  %s471_s24 = scalar_lea.vmem (%p806_p6), %s890_s3, %s615_s19 }
  0xd8   : > { %635 = vmatpush3.bf16.msra.mxu0 %v700_v34  ;;  %v706_v41 = vld [vmem:[%s840_s6 + $0x8] sm:$0xff]   ;;  %v707_v42 = vld [vmem:[%s840_s6] sm:$0xff]  }
  0xd9   : > { %636 = vmatprep.subr.bf16.mxu0 %v749_v35 }
  0xdc   : > { %637 = vmatpush3.bf16.msra.mxu0 %v701_v36  ;;  %v708_v43 = vld [vmem:[#allocation2] sm:$0xff]  }
  0xdd   : > { %638 = vmatprep.subr.bf16.mxu0 %v749_v35 }
  0xe0   : > { %639 = vmatpush3.bf16.msra.mxu0 %v702_v37 }
  0xe1   : > { %640 = vmatprep.subr.bf16.mxu0 %v749_v35 }
  0xe4   : > { %641 = vmatpush3.bf16.msra.mxu0 %v703_v38 }
  0xe5   : > { %642 = vmatprep.subr.bf16.mxu0 %v749_v35 }
  0xe8   : > { %643 = vmatpush3.bf16.msra.mxu0 %v704_v39 }
  0xe9   : > { %644 = vmatprep.subr.bf16.mxu0 %v749_v35 }
  0xec   : > { %645 = vmatpush3.bf16.msra.mxu0 %v705_v40 }
  0xed   : > { %646 = vmatprep.subr.bf16.mxu0 %v749_v35 }
  0xf0   : > { %647 = vmatpush3.bf16.msra.mxu0 %v706_v41 }
  0xf1   : > { %648 = vmatprep.subr.bf16.mxu0 %v749_v35 }
  0xf4   : > { %649 = vmatpush3.bf16.msra.mxu0 %v707_v42 }
  0xf7   : > { %651 = vmatmul.mubr.bf16.vlgmr.msra.gmra.mxu0 %v708_v43 }
 0x1b7   : > { %v451_v44 = vpop.f32.mrf.mxu0 }
 0x1b8   : > { %458 = vst [vmem:[%s842_s7] sm:$0xff] %v451_v44 }
 0x1b9   : > { %v652_v45 = vpop.f32.mrf.mxu0  ;;  %466 = sbr.rel (!%p806_p6) target bundleno = 453 (0x1c5), region = 81 }
 0x1bb   : > { %v454_v46 = vpop.f32.mrf.mxu0 }
 0x1bc   : > { %459 = vst [vmem:[%s842_s7 + $0x8] sm:$0xff] %v454_v46 }
 0x1bd   : > { %v653_v47 = vpop.f32.mrf.mxu0 }
 0x1bf   : > { %v502_v48 = vld [vmem:[%s842_s7] sm:$0xff] }
 0x1c0   : > { %503 = vst [vmem:[%s471_s24] sm:$0xff] %v502_v48 }
 0x1c3   : > { %v504_v49 = vld [vmem:[%s842_s7 + $0x8] sm:$0xff] }
 0x1c4   : > { %505 = vst [vmem:[%s471_s24 + $0x18] sm:$0xff] %v504_v49 }
 0x1c5 PF: > { %s13_s16 = sadd.s32 1, %s747_s16   ;;  %s892_s12 = smov %s735_s13 }
 0x1c6   : > { %p10_p12 = scmp.ge.s32.totalorder %s13_s16, 5   ;;  %s893_s13 = smov %s811_s22 }
 0x1c7   : > { %s894_s14 = smov %s743_s15  ;;  %s895_s15 = smov %s897_s17 }
 0x1c8   :  { %12 = sbr.rel (!%p10_p12) target bundleno = 3 (0x3), region = 153 }

</bundles_post_ra>
